<compile_context>
chip_gen: v5e
topology: v5e:2x2
jax: 0.10.0
libtpu: 0.0.40
codegen_flags: <defaults>
</compile_context>

<pallas_src>
import jax
import jax.numpy as jnp
import numpy as np
from jax.experimental import pallas as pl
from jax.experimental.pallas import tpu as pltpu

# ----------------------------- model constants -----------------------------
BATCH = 2
L_IN = 512                     # input length implied by Flatten -> 64*60
C0, C1, C2, C3 = 1, 15, 30, 60
C1P, C2P = 16, 32              # sublane-friendly padded channel counts
K1, ST1, P1 = 5, 2, 2
K2, ST2, P2 = 2, 2, 0
K3, ST3, P3 = 5, 2, 2
L1, L2, L3 = 256, 128, 64      # lengths after conv1 / conv2 / conv3
FLAT = C3 * L3                 # 3840
FC_H = 40
N_OUT = 1
BN_EPS = 1e-5
KPAD = 8                       # conv1 taps zero-padded 5 -> 8 (tidy MXU K dim)

# Lane permutation for conv1's im2col: lane q = p1*128 + p2*64 + l4 holds the
# conv1 output position l1 = 4*l4 + 2*p2 + p1.  With this ordering, conv2's
# stride-2 taps are contiguous 128-lane blocks of h1, and conv3's stride-2
# taps are 64-lane halves of h2 (plus +-1 lane shifts for the k=5 window).
_q = np.arange(L1)
_l1 = 4 * (_q % 64) + 2 * ((_q // 64) % 2) + (_q // 128)
_IDX = (2 * _l1[None, :] + np.arange(K1)[:, None]).astype(np.int32)   # (K1, 256)


# --------------------------------- kernel ----------------------------------
def _crnn_reg_kernel(xt_ref, w1_ref, b1_ref, w2_ref, b2_ref, a2s_ref, a2t_ref,
                     w3_ref, wf1_hbm_ref, bf1_ref, wf2_ref, bf2_ref,
                     out_ref, flat_ref, wf1_vmem, wf1_sem):
    f32 = jnp.float32

    # Stream the (largest) FC1 weight while the conv stack computes.
    wf1_copy = pltpu.make_async_copy(wf1_hbm_ref, wf1_vmem, wf1_sem)
    wf1_copy.start()

    lane = jax.lax.broadcasted_iota(jnp.int32, (1, 128), 1)
    lo64 = lane < 64
    edge_first = (lane % 64) == 0
    edge_last = (lane % 64) == 63

    # ---- conv1 (+bias, ReLU); BN1 is folded into conv2 ----  (16, 512)
    h1 = jnp.dot(w1_ref[...], xt_ref[...], preferred_element_type=f32) + b1_ref[...]
    h1 = jnp.maximum(h1, 0.0)

    # ---- conv2 taps: aligned 128-lane blocks thanks to the lane permutation ----
    z0 = jnp.concatenate([h1[:, 0:128], h1[:, 256:384]], axis=1)     # tap j=0 (16,256)
    z1 = jnp.concatenate([h1[:, 128:256], h1[:, 384:512]], axis=1)   # tap j=1 (16,256)
    zc = jnp.concatenate([z0, z1], axis=0)                           # (32, 256)

    # ---- conv2 (+folded BN1 bias) -> ReLU -> BN2 ----        (32, 256)
    y2 = jnp.dot(w2_ref[...], zc, preferred_element_type=f32) + b2_ref[...]
    h2 = jnp.maximum(y2, 0.0) * a2s_ref[...] + a2t_ref[...]

    # ---- conv3 taps: even/odd 64-lane halves, shifted +-1 within each batch
    #      block (zero fill == the conv's zero padding) ----
    h2a = h2[:, 0:128]                         # batch 0: [even l2 | odd l2]
    h2b = h2[:, 128:256]                       # batch 1: [even l2 | odd l2]
    h2a_r = pltpu.roll(h2a, 64, axis=1)
    h2b_r = pltpu.roll(h2b, 64, axis=1)
    ev = jnp.where(lo64, h2a, h2b_r)           # (32,128) lanes b*64+l3 -> l2=2*l3
    od = jnp.where(lo64, h2a_r, h2b)           # (32,128) lanes b*64+l3 -> l2=2*l3+1
    t0 = jnp.where(edge_first, 0.0, pltpu.roll(ev, 1, axis=1))    # j=0
    t1 = jnp.where(edge_first, 0.0, pltpu.roll(od, 1, axis=1))    # j=1
    t4 = jnp.where(edge_last, 0.0, pltpu.roll(ev, 127, axis=1))   # j=4
    z2 = jnp.concatenate([t0, t1, ev, od, t4], axis=0)            # (160, 128)

    # ---- conv3 (bias + BN3 folded into FC1) ----             (60, 128)
    h3 = jnp.dot(w3_ref[...], z2, preferred_element_type=f32)

    # ---- flatten to PyTorch order flat[b, c*64+l] with 30 aligned (2,128)
    #      stores (roll + lane-select packs two channels per row) ----
    for p in range(C3 // 2):
        pair = h3[2 * p:2 * p + 2, :]
        pair_r = pltpu.roll(pair, 64, axis=1)
        row_b0 = jnp.where(lo64, pair[0:1, :], pair_r[1:2, :])   # [c=2p b0 | c=2p+1 b0]
        row_b1 = jnp.where(lo64, pair_r[0:1, :], pair[1:2, :])   # [c=2p b1 | c=2p+1 b1]
        flat_ref[:, 128 * p:128 * (p + 1)] = jnp.concatenate([row_b0, row_b1], axis=0)

    # ---- FC head: Linear(3840,40) -> ReLU -> Dropout(id) -> Linear(40,1) ----
    wf1_copy.wait()
    zf = jnp.dot(flat_ref[...], wf1_vmem[...], preferred_element_type=f32) + bf1_ref[...]
    zf = jnp.maximum(zf, 0.0)
    # TODO(synk): Dropout(p=0.2) is identity at inference; training-mode RNG mask not implemented.
    out_ref[...] = jnp.sum(zf * wf2_ref[...], axis=1, keepdims=True) + bf2_ref[...]


# ----------------------- one-time parameter packing -------------------------
def pack_params(params):
    """Called ONCE (outside the jitted per-call path)."""
    f32 = jnp.float32

    def bn_affine(g, b, m, v):
        s = g / jnp.sqrt(v + BN_EPS)
        return s, b - m * s

    s1, t1 = bn_affine(params["bn0_g"], params["bn0_b"], params["bn0_m"], params["bn0_v"])
    s2, t2 = bn_affine(params["bn1_g"], params["bn1_b"], params["bn1_m"], params["bn1_v"])
    s3, t3 = bn_affine(params["bn2_g"], params["bn2_b"], params["bn2_m"], params["bn2_v"])

    # conv1: (15,1,5) -> (16,8) zero-padded taps/channels; bias -> (16,1).
    w1 = jnp.zeros((C1P, KPAD), f32).at[:C1, :K1].set(params["conv0_w"][:, 0, :])
    b1 = jnp.zeros((C1P, 1), f32).at[:C1, 0].set(params["conv0_b"])

    # conv2 with BN1 folded: column j*16+cin carries w2[:,cin,j]*s1[cin].
    w2s = params["conv1_w"] * s1[None, :, None]                       # (30,15,2)
    w2 = jnp.zeros((C2P, K2 * C1P), f32)
    for j in range(K2):
        w2 = w2.at[:C2, j * C1P:j * C1P + C1].set(w2s[:, :, j])
    b2v = params["conv1_b"] + jnp.einsum("ock,c->o", params["conv1_w"], t1)
    b2 = jnp.zeros((C2P, 1), f32).at[:C2, 0].set(b2v)

    a2s = jnp.zeros((C2P, 1), f32).at[:C2, 0].set(s2)
    a2t = jnp.zeros((C2P, 1), f32).at[:C2, 0].set(t2)

    # conv3: column 32*j+cin carries w3[:,cin,j]; bias/BN3 folded into FC1.
    w3 = jnp.zeros((C3, K3 * C2P), f32)
    for j in range(K3):
        w3 = w3.at[:, j * C2P:j * C2P + C2].set(params["conv2_w"][:, :, j])

    scale_rows = jnp.repeat(s3, L3)                                   # (3840,)
    shift_rows = jnp.repeat(s3 * params["conv2_b"] + t3, L3)          # (3840,)
    wf1 = params["fc1_w"] * scale_rows[:, None]                       # (3840,40)
    bf1 = params["fc1_b"] + shift_rows @ params["fc1_w"]              # (40,)

    return dict(w1=w1, b1=b1, w2=w2, b2=b2, a2s=a2s, a2t=a2t, w3=w3,
                wf1=wf1, bf1=bf1[None, :],
                wf2=params["fc2_w"][:, 0][None, :],                   # (1,40)
                bf2=params["fc2_b"][None, :])                         # (1,1)


# --------------------------------- wrapper ----------------------------------
def crnn_reg_forward(x, pk):
    """x: (B, 1, 512) float32 (PyTorch N,C,L). pk: pack_params(...) pytree."""
    assert x.shape == (BATCH, C0, L_IN)

    # conv1 im2col (C_in == 1) with the baked lane permutation.
    xpad = jnp.pad(x[:, 0, :], ((0, 0), (P1, P1)))                    # (B, 516)
    taps = xpad[:, _IDX]                                              # (B, K1, 256)
    x_taps = jnp.transpose(taps, (1, 0, 2)).reshape(K1, BATCH * L1)   # (5, 512)
    x_taps = jnp.pad(x_taps, ((0, KPAD - K1), (0, 0)))                # (8, 512)

    vmem = pl.BlockSpec(memory_space=pltpu.MemorySpace.VMEM)
    anyspace = pl.BlockSpec(memory_space=pl.ANY)
    out = pl.pallas_call(
        _crnn_reg_kernel,
        out_shape=jax.ShapeDtypeStruct((BATCH, N_OUT), jnp.float32),
        in_specs=[vmem, vmem, vmem, vmem, vmem, vmem, vmem, vmem,
                  anyspace, vmem, vmem, vmem],
        out_specs=vmem,
        scratch_shapes=[
            pltpu.VMEM((BATCH, FLAT), jnp.float32),    # flat (2, 3840)
            pltpu.VMEM((FLAT, FC_H), jnp.float32),     # FC1 weight landing buffer
            pltpu.SemaphoreType.DMA,
        ],
    )(x_taps, pk["w1"], pk["b1"], pk["w2"], pk["b2"], pk["a2s"], pk["a2t"],
      pk["w3"], pk["wf1"], pk["bf1"], pk["wf2"], pk["bf2"])
    return out


# ---------------------------- pure-JAX reference ----------------------------
def crnn_reg_ref(x, params):
    def conv1d(h, w, b, stride, pad):
        _, _, L = h.shape
        _, _, k = w.shape
        lout = (L + 2 * pad - k) // stride + 1
        hp = jnp.pad(h, ((0, 0), (0, 0), (pad, pad)))
        cols = jnp.stack([hp[:, :, j:j + stride * lout:stride] for j in range(k)],
                         axis=2)                                  # (B, Cin, k, Lout)
        return jnp.einsum("bckl,ock->bol", cols, w) + b[None, :, None]

    def bn(h, g, b, m, v):
        return (h - m[None, :, None]) / jnp.sqrt(v[None, :, None] + BN_EPS) \
               * g[None, :, None] + b[None, :, None]

    h = conv1d(x, params["conv0_w"], params["conv0_b"], ST1, P1)
    h = bn(jnp.maximum(h, 0.0), params["bn0_g"], params["bn0_b"], params["bn0_m"], params["bn0_v"])
    h = conv1d(h, params["conv1_w"], params["conv1_b"], ST2, P2)
    h = bn(jnp.maximum(h, 0.0), params["bn1_g"], params["bn1_b"], params["bn1_m"], params["bn1_v"])
    h = conv1d(h, params["conv2_w"], params["conv2_b"], ST3, P3)
    h = bn(h, params["bn2_g"], params["bn2_b"], params["bn2_m"], params["bn2_v"])
    flat = h.reshape(x.shape[0], -1)
    z = jnp.maximum(flat @ params["fc1_w"] + params["fc1_b"], 0.0)
    return z @ params["fc2_w"] + params["fc2_b"]


# ------------------------------- param init ---------------------------------
def init_params(key):
    ks = list(jax.random.split(key, 24))

    def u(k, shape, bound):
        return jax.random.uniform(k, shape, jnp.float32, minval=-bound, maxval=bound)

    p = {}
    i = 0
    for n, (ci, co, kk) in enumerate([(C0, C1, K1), (C1, C2, K2), (C2, C3, K3)]):
        bd = 1.0 / float(np.sqrt(ci * kk))
        p[f"conv{n}_w"] = u(ks[i], (co, ci, kk), bd); i += 1
        p[f"conv{n}_b"] = u(ks[i], (co,), bd); i += 1
        p[f"bn{n}_g"] = jax.random.uniform(ks[i], (co,), jnp.float32, minval=0.5, maxval=1.5); i += 1
        p[f"bn{n}_b"] = u(ks[i], (co,), 0.5); i += 1
        p[f"bn{n}_m"] = 0.3 * jax.random.normal(ks[i], (co,), jnp.float32); i += 1
        p[f"bn{n}_v"] = jax.random.uniform(ks[i], (co,), jnp.float32, minval=0.5, maxval=1.5); i += 1
    bd1 = 1.0 / float(np.sqrt(FLAT))
    p["fc1_w"] = u(ks[i], (FLAT, FC_H), bd1); i += 1
    p["fc1_b"] = u(ks[i], (FC_H,), bd1); i += 1
    bd2 = 1.0 / float(np.sqrt(FC_H))
    p["fc2_w"] = u(ks[i], (FC_H, N_OUT), bd2); i += 1
    p["fc2_b"] = u(ks[i], (N_OUT,), bd2); i += 1
    return p


if __name__ == "__main__":
    key = jax.random.PRNGKey(0)
    pkey, xkey = jax.random.split(key)
    params = init_params(pkey)
    x = jax.random.normal(xkey, (BATCH, C0, L_IN), jnp.float32)

    packed = pack_params(params)          # one-time weight packing (not per call)

    fwd = jax.jit(crnn_reg_forward)
    out = jax.block_until_ready(fwd(x, packed))
    assert out.shape == (BATCH, N_OUT)

    ref = crnn_reg_ref(x, params)
    np.testing.assert_allclose(np.asarray(out), np.asarray(ref), rtol=1e-3, atol=1e-3)
    print("KERNEL_OK")
</pallas_src>

<mosaic_0001>
module attributes {stable_mosaic.version = 11 : i64} {
  func.func @_crnn_reg_kernel(%arg0: memref<8x512xf32, #tpu.memory_space<vmem>>, %arg1: memref<16x8xf32, #tpu.memory_space<vmem>>, %arg2: memref<16x1xf32, #tpu.memory_space<vmem>>, %arg3: memref<32x32xf32, #tpu.memory_space<vmem>>, %arg4: memref<32x1xf32, #tpu.memory_space<vmem>>, %arg5: memref<32x1xf32, #tpu.memory_space<vmem>>, %arg6: memref<32x1xf32, #tpu.memory_space<vmem>>, %arg7: memref<60x160xf32, #tpu.memory_space<vmem>>, %arg8: memref<3840x40xf32, #tpu.memory_space<any>>, %arg9: memref<1x40xf32, #tpu.memory_space<vmem>>, %arg10: memref<1x40xf32, #tpu.memory_space<vmem>>, %arg11: memref<1x1xf32, #tpu.memory_space<vmem>>, %arg12: memref<2x1xf32, #tpu.memory_space<vmem>>, %arg13: memref<2x3840xf32, #tpu.memory_space<vmem>>, %arg14: memref<3840x40xf32, #tpu.memory_space<vmem>>, %arg15: memref<!tpu.dma_semaphore, #tpu.memory_space<semaphore_mem>>) attributes {dimension_semantics = [], scalar_prefetch = 0 : i64, scratch_operands = 3 : i64, tpu.core_type = #tpu.core_type<tc>} {
    tpu.enqueue_dma source(%arg8 : memref<3840x40xf32, #tpu.memory_space<any>>) target(%arg14 : memref<3840x40xf32, #tpu.memory_space<vmem>>) target_semaphore(%arg15 : memref<!tpu.dma_semaphore, #tpu.memory_space<semaphore_mem>>)
    %0 = tpu.iota {dimensions = array<i32: 1>} : vector<1x128xi32>
    %c64_i32 = arith.constant 64 : i32
    %1 = vector.broadcast %c64_i32 : i32 to vector<1x128xi32>
    %2 = arith.cmpi slt, %0, %1 : vector<1x128xi32>
    %c64_i32_0 = arith.constant 64 : i32
    %c0_i32 = arith.constant 0 : i32
    %3 = arith.cmpi eq, %c64_i32_0, %c0_i32 : i32
    %c1_i32 = arith.constant 1 : i32
    %4 = arith.select %3, %c1_i32, %c64_i32_0 : i32
    %5 = vector.broadcast %4 : i32 to vector<1x128xi32>
    %6 = arith.remsi %0, %5 : vector<1x128xi32>
    %c0_i32_1 = arith.constant 0 : i32
    %7 = vector.broadcast %c0_i32_1 : i32 to vector<1x128xi32>
    %8 = arith.cmpi ne, %6, %7 : vector<1x128xi32>
    %c0_i32_2 = arith.constant 0 : i32
    %9 = vector.broadcast %c0_i32_2 : i32 to vector<1x128xi32>
    %10 = arith.cmpi slt, %6, %9 : vector<1x128xi32>
    %c0_i32_3 = arith.constant 0 : i32
    %11 = arith.cmpi slt, %4, %c0_i32_3 : i32
    %12 = vector.broadcast %11 : i1 to vector<1x128xi1>
    %13 = vector.broadcast %12 : vector<1x128xi1> to vector<1x128xi1>
    %14 = arith.xori %10, %13 : vector<1x128xi1>
    %15 = arith.andi %14, %8 : vector<1x128xi1>
    %16 = vector.broadcast %4 : i32 to vector<1x128xi32>
    %17 = arith.addi %6, %16 : vector<1x128xi32>
    %18 = arith.select %15, %17, %6 : vector<1x128xi1>, vector<1x128xi32>
    %c0_i32_4 = arith.constant 0 : i32
    %19 = vector.broadcast %c0_i32_4 : i32 to vector<1x128xi32>
    %20 = arith.cmpi eq, %18, %19 : vector<1x128xi32>
    %c64_i32_5 = arith.constant 64 : i32
    %c0_i32_6 = arith.constant 0 : i32
    %21 = arith.cmpi eq, %c64_i32_5, %c0_i32_6 : i32
    %c1_i32_7 = arith.constant 1 : i32
    %22 = arith.select %21, %c1_i32_7, %c64_i32_5 : i32
    %23 = vector.broadcast %22 : i32 to vector<1x128xi32>
    %24 = arith.remsi %0, %23 : vector<1x128xi32>
    %c0_i32_8 = arith.constant 0 : i32
    %25 = vector.broadcast %c0_i32_8 : i32 to vector<1x128xi32>
    %26 = arith.cmpi ne, %24, %25 : vector<1x128xi32>
    %c0_i32_9 = arith.constant 0 : i32
    %27 = vector.broadcast %c0_i32_9 : i32 to vector<1x128xi32>
    %28 = arith.cmpi slt, %24, %27 : vector<1x128xi32>
    %c0_i32_10 = arith.constant 0 : i32
    %29 = arith.cmpi slt, %22, %c0_i32_10 : i32
    %30 = vector.broadcast %29 : i1 to vector<1x128xi1>
    %31 = vector.broadcast %30 : vector<1x128xi1> to vector<1x128xi1>
    %32 = arith.xori %28, %31 : vector<1x128xi1>
    %33 = arith.andi %32, %26 : vector<1x128xi1>
    %34 = vector.broadcast %22 : i32 to vector<1x128xi32>
    %35 = arith.addi %24, %34 : vector<1x128xi32>
    %36 = arith.select %33, %35, %24 : vector<1x128xi1>, vector<1x128xi32>
    %c63_i32 = arith.constant 63 : i32
    %37 = vector.broadcast %c63_i32 : i32 to vector<1x128xi32>
    %38 = arith.cmpi eq, %36, %37 : vector<1x128xi32>
    %c0 = arith.constant 0 : index
    %c0_11 = arith.constant 0 : index
    %39 = vector.load %arg1[%c0, %c0_11] : memref<16x8xf32, #tpu.memory_space<vmem>>, vector<16x8xf32>
    %c0_12 = arith.constant 0 : index
    %c0_13 = arith.constant 0 : index
    %40 = vector.load %arg0[%c0_12, %c0_13] : memref<8x512xf32, #tpu.memory_space<vmem>>, vector<8x512xf32>
    %cst = arith.constant dense<0.000000e+00> : vector<16x512xf32>
    %41 = tpu.matmul %39, %40, %cst {dimension_numbers = #tpu.dot_dimension_numbers<[1], [0], [0], [1], [0, 0, 1, 1], [], []>} : vector<16x8xf32>, vector<8x512xf32>, vector<16x512xf32> -> vector<16x512xf32>
    %c0_14 = arith.constant 0 : index
    %c0_15 = arith.constant 0 : index
    %42 = vector.load %arg2[%c0_14, %c0_15] : memref<16x1xf32, #tpu.memory_space<vmem>>, vector<16x1xf32>
    %43 = vector.broadcast %42 : vector<16x1xf32> to vector<16x512xf32>
    %44 = arith.addf %41, %43 : vector<16x512xf32>
    %cst_16 = arith.constant 0.000000e+00 : f32
    %45 = vector.broadcast %cst_16 : f32 to vector<16x512xf32>
    %46 = arith.maximumf %44, %45 : vector<16x512xf32>
    %47 = vector.extract_strided_slice %46 {offsets = [0, 0], sizes = [16, 128], strides = [1, 1]} : vector<16x512xf32> to vector<16x128xf32>
    %48 = vector.extract_strided_slice %46 {offsets = [0, 256], sizes = [16, 128], strides = [1, 1]} : vector<16x512xf32> to vector<16x128xf32>
    %49 = tpu.concatenate %47, %48 in 1 : vector<16x128xf32>, vector<16x128xf32> -> vector<16x256xf32>
    %50 = vector.extract_strided_slice %46 {offsets = [0, 128], sizes = [16, 128], strides = [1, 1]} : vector<16x512xf32> to vector<16x128xf32>
    %51 = vector.extract_strided_slice %46 {offsets = [0, 384], sizes = [16, 128], strides = [1, 1]} : vector<16x512xf32> to vector<16x128xf32>
    %52 = tpu.concatenate %50, %51 in 1 : vector<16x128xf32>, vector<16x128xf32> -> vector<16x256xf32>
    %53 = tpu.concatenate %49, %52 in 0 : vector<16x256xf32>, vector<16x256xf32> -> vector<32x256xf32>
    %c0_17 = arith.constant 0 : index
    %c0_18 = arith.constant 0 : index
    %54 = vector.load %arg3[%c0_17, %c0_18] : memref<32x32xf32, #tpu.memory_space<vmem>>, vector<32x32xf32>
    %cst_19 = arith.constant dense<0.000000e+00> : vector<32x256xf32>
    %55 = tpu.matmul %54, %53, %cst_19 {dimension_numbers = #tpu.dot_dimension_numbers<[1], [0], [0], [1], [0, 0, 1, 1], [], []>} : vector<32x32xf32>, vector<32x256xf32>, vector<32x256xf32> -> vector<32x256xf32>
    %c0_20 = arith.constant 0 : index
    %c0_21 = arith.constant 0 : index
    %56 = vector.load %arg4[%c0_20, %c0_21] : memref<32x1xf32, #tpu.memory_space<vmem>>, vector<32x1xf32>
    %57 = vector.broadcast %56 : vector<32x1xf32> to vector<32x256xf32>
    %58 = arith.addf %55, %57 : vector<32x256xf32>
    %cst_22 = arith.constant 0.000000e+00 : f32
    %59 = vector.broadcast %cst_22 : f32 to vector<32x256xf32>
    %60 = arith.maximumf %58, %59 : vector<32x256xf32>
    %c0_23 = arith.constant 0 : index
    %c0_24 = arith.constant 0 : index
    %61 = vector.load %arg5[%c0_23, %c0_24] : memref<32x1xf32, #tpu.memory_space<vmem>>, vector<32x1xf32>
    %62 = vector.broadcast %61 : vector<32x1xf32> to vector<32x256xf32>
    %63 = arith.mulf %60, %62 : vector<32x256xf32>
    %c0_25 = arith.constant 0 : index
    %c0_26 = arith.constant 0 : index
    %64 = vector.load %arg6[%c0_25, %c0_26] : memref<32x1xf32, #tpu.memory_space<vmem>>, vector<32x1xf32>
    %65 = vector.broadcast %64 : vector<32x1xf32> to vector<32x256xf32>
    %66 = arith.addf %63, %65 : vector<32x256xf32>
    %67 = vector.extract_strided_slice %66 {offsets = [0, 0], sizes = [32, 128], strides = [1, 1]} : vector<32x256xf32> to vector<32x128xf32>
    %68 = vector.extract_strided_slice %66 {offsets = [0, 128], sizes = [32, 128], strides = [1, 1]} : vector<32x256xf32> to vector<32x128xf32>
    %c64_i32_27 = arith.constant 64 : i32
    %69 = tpu.dynamic_rotate %67 by %c64_i32_27 dim 1 : vector<32x128xf32>, i32 -> vector<32x128xf32>
    %c64_i32_28 = arith.constant 64 : i32
    %70 = tpu.dynamic_rotate %68 by %c64_i32_28 dim 1 : vector<32x128xf32>, i32 -> vector<32x128xf32>
    %71 = vector.shape_cast %2 : vector<1x128xi1> to vector<1x128xi1>
    %72 = vector.broadcast %71 : vector<1x128xi1> to vector<32x128xi1>
    %73 = arith.select %72, %67, %70 : vector<32x128xi1>, vector<32x128xf32>
    %74 = vector.shape_cast %2 : vector<1x128xi1> to vector<1x128xi1>
    %75 = vector.broadcast %74 : vector<1x128xi1> to vector<32x128xi1>
    %76 = arith.select %75, %69, %68 : vector<32x128xi1>, vector<32x128xf32>
    %c1_i32_29 = arith.constant 1 : i32
    %77 = tpu.dynamic_rotate %73 by %c1_i32_29 dim 1 : vector<32x128xf32>, i32 -> vector<32x128xf32>
    %cst_30 = arith.constant 0.000000e+00 : f32
    %78 = vector.shape_cast %20 : vector<1x128xi1> to vector<1x128xi1>
    %79 = vector.broadcast %78 : vector<1x128xi1> to vector<32x128xi1>
    %80 = vector.broadcast %cst_30 : f32 to vector<32x128xf32>
    %81 = arith.select %79, %80, %77 : vector<32x128xi1>, vector<32x128xf32>
    %c1_i32_31 = arith.constant 1 : i32
    %82 = tpu.dynamic_rotate %76 by %c1_i32_31 dim 1 : vector<32x128xf32>, i32 -> vector<32x128xf32>
    %cst_32 = arith.constant 0.000000e+00 : f32
    %83 = vector.shape_cast %20 : vector<1x128xi1> to vector<1x128xi1>
    %84 = vector.broadcast %83 : vector<1x128xi1> to vector<32x128xi1>
    %85 = vector.broadcast %cst_32 : f32 to vector<32x128xf32>
    %86 = arith.select %84, %85, %82 : vector<32x128xi1>, vector<32x128xf32>
    %c127_i32 = arith.constant 127 : i32
    %87 = tpu.dynamic_rotate %73 by %c127_i32 dim 1 : vector<32x128xf32>, i32 -> vector<32x128xf32>
    %cst_33 = arith.constant 0.000000e+00 : f32
    %88 = vector.shape_cast %38 : vector<1x128xi1> to vector<1x128xi1>
    %89 = vector.broadcast %88 : vector<1x128xi1> to vector<32x128xi1>
    %90 = vector.broadcast %cst_33 : f32 to vector<32x128xf32>
    %91 = arith.select %89, %90, %87 : vector<32x128xi1>, vector<32x128xf32>
    %92 = tpu.concatenate %81, %86, %73, %76, %91 in 0 : vector<32x128xf32>, vector<32x128xf32>, vector<32x128xf32>, vector<32x128xf32>, vector<32x128xf32> -> vector<160x128xf32>
    %c0_34 = arith.constant 0 : index
    %c0_35 = arith.constant 0 : index
    %93 = vector.load %arg7[%c0_34, %c0_35] : memref<60x160xf32, #tpu.memory_space<vmem>>, vector<60x160xf32>
    %cst_36 = arith.constant dense<0.000000e+00> : vector<60x128xf32>
    %94 = tpu.matmul %93, %92, %cst_36 {dimension_numbers = #tpu.dot_dimension_numbers<[1], [0], [0], [1], [0, 0, 1, 1], [], []>} : vector<60x160xf32>, vector<160x128xf32>, vector<60x128xf32> -> vector<60x128xf32>
    %95 = vector.extract_strided_slice %94 {offsets = [0, 0], sizes = [2, 128], strides = [1, 1]} : vector<60x128xf32> to vector<2x128xf32>
    %c64_i32_37 = arith.constant 64 : i32
    %96 = tpu.dynamic_rotate %95 by %c64_i32_37 dim 1 : vector<2x128xf32>, i32 -> vector<2x128xf32>
    %97 = vector.extract_strided_slice %95 {offsets = [0, 0], sizes = [1, 128], strides = [1, 1]} : vector<2x128xf32> to vector<1x128xf32>
    %98 = vector.extract_strided_slice %96 {offsets = [1, 0], sizes = [1, 128], strides = [1, 1]} : vector<2x128xf32> to vector<1x128xf32>
    %99 = arith.select %2, %97, %98 : vector<1x128xi1>, vector<1x128xf32>
    %100 = vector.extract_strided_slice %96 {offsets = [0, 0], sizes = [1, 128], strides = [1, 1]} : vector<2x128xf32> to vector<1x128xf32>
    %101 = vector.extract_strided_slice %95 {offsets = [1, 0], sizes = [1, 128], strides = [1, 1]} : vector<2x128xf32> to vector<1x128xf32>
    %102 = arith.select %2, %100, %101 : vector<1x128xi1>, vector<1x128xf32>
    %103 = tpu.concatenate %99, %102 in 0 : vector<1x128xf32>, vector<1x128xf32> -> vector<2x128xf32>
    %c0_38 = arith.constant 0 : index
    %c0_39 = arith.constant 0 : index
    %104 = vector.load %arg13[%c0_38, %c0_39] : memref<2x3840xf32, #tpu.memory_space<vmem>>, vector<2x128xf32>
    tpu.vector_store %arg13[%c0_38, %c0_39], %103 {strides = array<i32>} : memref<2x3840xf32, #tpu.memory_space<vmem>>, vector<2x128xf32>,
    %105 = vector.extract_strided_slice %94 {offsets = [2, 0], sizes = [2, 128], strides = [1, 1]} : vector<60x128xf32> to vector<2x128xf32>
    %c64_i32_40 = arith.constant 64 : i32
    %106 = tpu.dynamic_rotate %105 by %c64_i32_40 dim 1 : vector<2x128xf32>, i32 -> vector<2x128xf32>
    %107 = vector.extract_strided_slice %105 {offsets = [0, 0], sizes = [1, 128], strides = [1, 1]} : vector<2x128xf32> to vector<1x128xf32>
    %108 = vector.extract_strided_slice %106 {offsets = [1, 0], sizes = [1, 128], strides = [1, 1]} : vector<2x128xf32> to vector<1x128xf32>
    %109 = arith.select %2, %107, %108 : vector<1x128xi1>, vector<1x128xf32>
    %110 = vector.extract_strided_slice %106 {offsets = [0, 0], sizes = [1, 128], strides = [1, 1]} : vector<2x128xf32> to vector<1x128xf32>
    %111 = vector.extract_strided_slice %105 {offsets = [1, 0], sizes = [1, 128], strides = [1, 1]} : vector<2x128xf32> to vector<1x128xf32>
    %112 = arith.select %2, %110, %111 : vector<1x128xi1>, vector<1x128xf32>
    %113 = tpu.concatenate %109, %112 in 0 : vector<1x128xf32>, vector<1x128xf32> -> vector<2x128xf32>
    %c0_41 = arith.constant 0 : index
    %c128 = arith.constant 128 : index
    %114 = vector.load %arg13[%c0_41, %c128] : memref<2x3840xf32, #tpu.memory_space<vmem>>, vector<2x128xf32>
    tpu.vector_store %arg13[%c0_41, %c128], %113 {strides = array<i32>} : memref<2x3840xf32, #tpu.memory_space<vmem>>, vector<2x128xf32>,
    %115 = vector.extract_strided_slice %94 {offsets = [4, 0], sizes = [2, 128], strides = [1, 1]} : vector<60x128xf32> to vector<2x128xf32>
    %c64_i32_42 = arith.constant 64 : i32
    %116 = tpu.dynamic_rotate %115 by %c64_i32_42 dim 1 : vector<2x128xf32>, i32 -> vector<2x128xf32>
    %117 = vector.extract_strided_slice %115 {offsets = [0, 0], sizes = [1, 128], strides = [1, 1]} : vector<2x128xf32> to vector<1x128xf32>
    %118 = vector.extract_strided_slice %116 {offsets = [1, 0], sizes = [1, 128], strides = [1, 1]} : vector<2x128xf32> to vector<1x128xf32>
    %119 = arith.select %2, %117, %118 : vector<1x128xi1>, vector<1x128xf32>
    %120 = vector.extract_strided_slice %116 {offsets = [0, 0], sizes = [1, 128], strides = [1, 1]} : vector<2x128xf32> to vector<1x128xf32>
    %121 = vector.extract_strided_slice %115 {offsets = [1, 0], sizes = [1, 128], strides = [1, 1]} : vector<2x128xf32> to vector<1x128xf32>
    %122 = arith.select %2, %120, %121 : vector<1x128xi1>, vector<1x128xf32>
    %123 = tpu.concatenate %119, %122 in 0 : vector<1x128xf32>, vector<1x128xf32> -> vector<2x128xf32>
    %c0_43 = arith.constant 0 : index
    %c256 = arith.constant 256 : index
    %124 = vector.load %arg13[%c0_43, %c256] : memref<2x3840xf32, #tpu.memory_space<vmem>>, vector<2x128xf32>
    tpu.vector_store %arg13[%c0_43, %c256], %123 {strides = array<i32>} : memref<2x3840xf32, #tpu.memory_space<vmem>>, vector<2x128xf32>,
    %125 = vector.extract_strided_slice %94 {offsets = [6, 0], sizes = [2, 128], strides = [1, 1]} : vector<60x128xf32> to vector<2x128xf32>
    %c64_i32_44 = arith.constant 64 : i32
    %126 = tpu.dynamic_rotate %125 by %c64_i32_44 dim 1 : vector<2x128xf32>, i32 -> vector<2x128xf32>
    %127 = vector.extract_strided_slice %125 {offsets = [0, 0], sizes = [1, 128], strides = [1, 1]} : vector<2x128xf32> to vector<1x128xf32>
    %128 = vector.extract_strided_slice %126 {offsets = [1, 0], sizes = [1, 128], strides = [1, 1]} : vector<2x128xf32> to vector<1x128xf32>
    %129 = arith.select %2, %127, %128 : vector<1x128xi1>, vector<1x128xf32>
    %130 = vector.extract_strided_slice %126 {offsets = [0, 0], sizes = [1, 128], strides = [1, 1]} : vector<2x128xf32> to vector<1x128xf32>
    %131 = vector.extract_strided_slice %125 {offsets = [1, 0], sizes = [1, 128], strides = [1, 1]} : vector<2x128xf32> to vector<1x128xf32>
    %132 = arith.select %2, %130, %131 : vector<1x128xi1>, vector<1x128xf32>
    %133 = tpu.concatenate %129, %132 in 0 : vector<1x128xf32>, vector<1x128xf32> -> vector<2x128xf32>
    %c0_45 = arith.constant 0 : index
    %c384 = arith.constant 384 : index
    %134 = vector.load %arg13[%c0_45, %c384] : memref<2x3840xf32, #tpu.memory_space<vmem>>, vector<2x128xf32>
    tpu.vector_store %arg13[%c0_45, %c384], %133 {strides = array<i32>} : memref<2x3840xf32, #tpu.memory_space<vmem>>, vector<2x128xf32>,
    %135 = vector.extract_strided_slice %94 {offsets = [8, 0], sizes = [2, 128], strides = [1, 1]} : vector<60x128xf32> to vector<2x128xf32>
    %c64_i32_46 = arith.constant 64 : i32
    %136 = tpu.dynamic_rotate %135 by %c64_i32_46 dim 1 : vector<2x128xf32>, i32 -> vector<2x128xf32>
    %137 = vector.extract_strided_slice %135 {offsets = [0, 0], sizes = [1, 128], strides = [1, 1]} : vector<2x128xf32> to vector<1x128xf32>
    %138 = vector.extract_strided_slice %136 {offsets = [1, 0], sizes = [1, 128], strides = [1, 1]} : vector<2x128xf32> to vector<1x128xf32>
    %139 = arith.select %2, %137, %138 : vector<1x128xi1>, vector<1x128xf32>
    %140 = vector.extract_strided_slice %136 {offsets = [0, 0], sizes = [1, 128], strides = [1, 1]} : vector<2x128xf32> to vector<1x128xf32>
    %141 = vector.extract_strided_slice %135 {offsets = [1, 0], sizes = [1, 128], strides = [1, 1]} : vector<2x128xf32> to vector<1x128xf32>
    %142 = arith.select %2, %140, %141 : vector<1x128xi1>, vector<1x128xf32>
    %143 = tpu.concatenate %139, %142 in 0 : vector<1x128xf32>, vector<1x128xf32> -> vector<2x128xf32>
    %c0_47 = arith.constant 0 : index
    %c512 = arith.constant 512 : index
    %144 = vector.load %arg13[%c0_47, %c512] : memref<2x3840xf32, #tpu.memory_space<vmem>>, vector<2x128xf32>
    tpu.vector_store %arg13[%c0_47, %c512], %143 {strides = array<i32>} : memref<2x3840xf32, #tpu.memory_space<vmem>>, vector<2x128xf32>,
    %145 = vector.extract_strided_slice %94 {offsets = [10, 0], sizes = [2, 128], strides = [1, 1]} : vector<60x128xf32> to vector<2x128xf32>
    %c64_i32_48 = arith.constant 64 : i32
    %146 = tpu.dynamic_rotate %145 by %c64_i32_48 dim 1 : vector<2x128xf32>, i32 -> vector<2x128xf32>
    %147 = vector.extract_strided_slice %145 {offsets = [0, 0], sizes = [1, 128], strides = [1, 1]} : vector<2x128xf32> to vector<1x128xf32>
    %148 = vector.extract_strided_slice %146 {offsets = [1, 0], sizes = [1, 128], strides = [1, 1]} : vector<2x128xf32> to vector<1x128xf32>
    %149 = arith.select %2, %147, %148 : vector<1x128xi1>, vector<1x128xf32>
    %150 = vector.extract_strided_slice %146 {offsets = [0, 0], sizes = [1, 128], strides = [1, 1]} : vector<2x128xf32> to vector<1x128xf32>
    %151 = vector.extract_strided_slice %145 {offsets = [1, 0], sizes = [1, 128], strides = [1, 1]} : vector<2x128xf32> to vector<1x128xf32>
    %152 = arith.select %2, %150, %151 : vector<1x128xi1>, vector<1x128xf32>
    %153 = tpu.concatenate %149, %152 in 0 : vector<1x128xf32>, vector<1x128xf32> -> vector<2x128xf32>
    %c0_49 = arith.constant 0 : index
    %c640 = arith.constant 640 : index
    %154 = vector.load %arg13[%c0_49, %c640] : memref<2x3840xf32, #tpu.memory_space<vmem>>, vector<2x128xf32>
    tpu.vector_store %arg13[%c0_49, %c640], %153 {strides = array<i32>} : memref<2x3840xf32, #tpu.memory_space<vmem>>, vector<2x128xf32>,
    %155 = vector.extract_strided_slice %94 {offsets = [12, 0], sizes = [2, 128], strides = [1, 1]} : vector<60x128xf32> to vector<2x128xf32>
    %c64_i32_50 = arith.constant 64 : i32
    %156 = tpu.dynamic_rotate %155 by %c64_i32_50 dim 1 : vector<2x128xf32>, i32 -> vector<2x128xf32>
    %157 = vector.extract_strided_slice %155 {offsets = [0, 0], sizes = [1, 128], strides = [1, 1]} : vector<2x128xf32> to vector<1x128xf32>
    %158 = vector.extract_strided_slice %156 {offsets = [1, 0], sizes = [1, 128], strides = [1, 1]} : vector<2x128xf32> to vector<1x128xf32>
    %159 = arith.select %2, %157, %158 : vector<1x128xi1>, vector<1x128xf32>
    %160 = vector.extract_strided_slice %156 {offsets = [0, 0], sizes = [1, 128], strides = [1, 1]} : vector<2x128xf32> to vector<1x128xf32>
    %161 = vector.extract_strided_slice %155 {offsets = [1, 0], sizes = [1, 128], strides = [1, 1]} : vector<2x128xf32> to vector<1x128xf32>
    %162 = arith.select %2, %160, %161 : vector<1x128xi1>, vector<1x128xf32>
    %163 = tpu.concatenate %159, %162 in 0 : vector<1x128xf32>, vector<1x128xf32> -> vector<2x128xf32>
    %c0_51 = arith.constant 0 : index
    %c768 = arith.constant 768 : index
    %164 = vector.load %arg13[%c0_51, %c768] : memref<2x3840xf32, #tpu.memory_space<vmem>>, vector<2x128xf32>
    tpu.vector_store %arg13[%c0_51, %c768], %163 {strides = array<i32>} : memref<2x3840xf32, #tpu.memory_space<vmem>>, vector<2x128xf32>,
    %165 = vector.extract_strided_slice %94 {offsets = [14, 0], sizes = [2, 128], strides = [1, 1]} : vector<60x128xf32> to vector<2x128xf32>
    %c64_i32_52 = arith.constant 64 : i32
    %166 = tpu.dynamic_rotate %165 by %c64_i32_52 dim 1 : vector<2x128xf32>, i32 -> vector<2x128xf32>
    %167 = vector.extract_strided_slice %165 {offsets = [0, 0], sizes = [1, 128], strides = [1, 1]} : vector<2x128xf32> to vector<1x128xf32>
    %168 = vector.extract_strided_slice %166 {offsets = [1, 0], sizes = [1, 128], strides = [1, 1]} : vector<2x128xf32> to vector<1x128xf32>
    %169 = arith.select %2, %167, %168 : vector<1x128xi1>, vector<1x128xf32>
    %170 = vector.extract_strided_slice %166 {offsets = [0, 0], sizes = [1, 128], strides = [1, 1]} : vector<2x128xf32> to vector<1x128xf32>
    %171 = vector.extract_strided_slice %165 {offsets = [1, 0], sizes = [1, 128], strides = [1, 1]} : vector<2x128xf32> to vector<1x128xf32>
    %172 = arith.select %2, %170, %171 : vector<1x128xi1>, vector<1x128xf32>
    %173 = tpu.concatenate %169, %172 in 0 : vector<1x128xf32>, vector<1x128xf32> -> vector<2x128xf32>
    %c0_53 = arith.constant 0 : index
    %c896 = arith.constant 896 : index
    %174 = vector.load %arg13[%c0_53, %c896] : memref<2x3840xf32, #tpu.memory_space<vmem>>, vector<2x128xf32>
    tpu.vector_store %arg13[%c0_53, %c896], %173 {strides = array<i32>} : memref<2x3840xf32, #tpu.memory_space<vmem>>, vector<2x128xf32>,
    %175 = vector.extract_strided_slice %94 {offsets = [16, 0], sizes = [2, 128], strides = [1, 1]} : vector<60x128xf32> to vector<2x128xf32>
    %c64_i32_54 = arith.constant 64 : i32
    %176 = tpu.dynamic_rotate %175 by %c64_i32_54 dim 1 : vector<2x128xf32>, i32 -> vector<2x128xf32>
    %177 = vector.extract_strided_slice %175 {offsets = [0, 0], sizes = [1, 128], strides = [1, 1]} : vector<2x128xf32> to vector<1x128xf32>
    %178 = vector.extract_strided_slice %176 {offsets = [1, 0], sizes = [1, 128], strides = [1, 1]} : vector<2x128xf32> to vector<1x128xf32>
    %179 = arith.select %2, %177, %178 : vector<1x128xi1>, vector<1x128xf32>
    %180 = vector.extract_strided_slice %176 {offsets = [0, 0], sizes = [1, 128], strides = [1, 1]} : vector<2x128xf32> to vector<1x128xf32>
    %181 = vector.extract_strided_slice %175 {offsets = [1, 0], sizes = [1, 128], strides = [1, 1]} : vector<2x128xf32> to vector<1x128xf32>
    %182 = arith.select %2, %180, %181 : vector<1x128xi1>, vector<1x128xf32>
    %183 = tpu.concatenate %179, %182 in 0 : vector<1x128xf32>, vector<1x128xf32> -> vector<2x128xf32>
    %c0_55 = arith.constant 0 : index
    %c1024 = arith.constant 1024 : index
    %184 = vector.load %arg13[%c0_55, %c1024] : memref<2x3840xf32, #tpu.memory_space<vmem>>, vector<2x128xf32>
    tpu.vector_store %arg13[%c0_55, %c1024], %183 {strides = array<i32>} : memref<2x3840xf32, #tpu.memory_space<vmem>>, vector<2x128xf32>,
    %185 = vector.extract_strided_slice %94 {offsets = [18, 0], sizes = [2, 128], strides = [1, 1]} : vector<60x128xf32> to vector<2x128xf32>
    %c64_i32_56 = arith.constant 64 : i32
    %186 = tpu.dynamic_rotate %185 by %c64_i32_56 dim 1 : vector<2x128xf32>, i32 -> vector<2x128xf32>
    %187 = vector.extract_strided_slice %185 {offsets = [0, 0], sizes = [1, 128], strides = [1, 1]} : vector<2x128xf32> to vector<1x128xf32>
    %188 = vector.extract_strided_slice %186 {offsets = [1, 0], sizes = [1, 128], strides = [1, 1]} : vector<2x128xf32> to vector<1x128xf32>
    %189 = arith.select %2, %187, %188 : vector<1x128xi1>, vector<1x128xf32>
    %190 = vector.extract_strided_slice %186 {offsets = [0, 0], sizes = [1, 128], strides = [1, 1]} : vector<2x128xf32> to vector<1x128xf32>
    %191 = vector.extract_strided_slice %185 {offsets = [1, 0], sizes = [1, 128], strides = [1, 1]} : vector<2x128xf32> to vector<1x128xf32>
    %192 = arith.select %2, %190, %191 : vector<1x128xi1>, vector<1x128xf32>
    %193 = tpu.concatenate %189, %192 in 0 : vector<1x128xf32>, vector<1x128xf32> -> vector<2x128xf32>
    %c0_57 = arith.constant 0 : index
    %c1152 = arith.constant 1152 : index
    %194 = vector.load %arg13[%c0_57, %c1152] : memref<2x3840xf32, #tpu.memory_space<vmem>>, vector<2x128xf32>
    tpu.vector_store %arg13[%c0_57, %c1152], %193 {strides = array<i32>} : memref<2x3840xf32, #tpu.memory_space<vmem>>, vector<2x128xf32>,
    %195 = vector.extract_strided_slice %94 {offsets = [20, 0], sizes = [2, 128], strides = [1, 1]} : vector<60x128xf32> to vector<2x128xf32>
    %c64_i32_58 = arith.constant 64 : i32
    %196 = tpu.dynamic_rotate %195 by %c64_i32_58 dim 1 : vector<2x128xf32>, i32 -> vector<2x128xf32>
    %197 = vector.extract_strided_slice %195 {offsets = [0, 0], sizes = [1, 128], strides = [1, 1]} : vector<2x128xf32> to vector<1x128xf32>
    %198 = vector.extract_strided_slice %196 {offsets = [1, 0], sizes = [1, 128], strides = [1, 1]} : vector<2x128xf32> to vector<1x128xf32>
    %199 = arith.select %2, %197, %198 : vector<1x128xi1>, vector<1x128xf32>
    %200 = vector.extract_strided_slice %196 {offsets = [0, 0], sizes = [1, 128], strides = [1, 1]} : vector<2x128xf32> to vector<1x128xf32>
    %201 = vector.extract_strided_slice %195 {offsets = [1, 0], sizes = [1, 128], strides = [1, 1]} : vector<2x128xf32> to vector<1x128xf32>
    %202 = arith.select %2, %200, %201 : vector<1x128xi1>, vector<1x128xf32>
    %203 = tpu.concatenate %199, %202 in 0 : vector<1x128xf32>, vector<1x128xf32> -> vector<2x128xf32>
    %c0_59 = arith.constant 0 : index
    %c1280 = arith.constant 1280 : index
    %204 = vector.load %arg13[%c0_59, %c1280] : memref<2x3840xf32, #tpu.memory_space<vmem>>, vector<2x128xf32>
    tpu.vector_store %arg13[%c0_59, %c1280], %203 {strides = array<i32>} : memref<2x3840xf32, #tpu.memory_space<vmem>>, vector<2x128xf32>,
    %205 = vector.extract_strided_slice %94 {offsets = [22, 0], sizes = [2, 128], strides = [1, 1]} : vector<60x128xf32> to vector<2x128xf32>
    %c64_i32_60 = arith.constant 64 : i32
    %206 = tpu.dynamic_rotate %205 by %c64_i32_60 dim 1 : vector<2x128xf32>, i32 -> vector<2x128xf32>
    %207 = vector.extract_strided_slice %205 {offsets = [0, 0], sizes = [1, 128], strides = [1, 1]} : vector<2x128xf32> to vector<1x128xf32>
    %208 = vector.extract_strided_slice %206 {offsets = [1, 0], sizes = [1, 128], strides = [1, 1]} : vector<2x128xf32> to vector<1x128xf32>
    %209 = arith.select %2, %207, %208 : vector<1x128xi1>, vector<1x128xf32>
    %210 = vector.extract_strided_slice %206 {offsets = [0, 0], sizes = [1, 128], strides = [1, 1]} : vector<2x128xf32> to vector<1x128xf32>
    %211 = vector.extract_strided_slice %205 {offsets = [1, 0], sizes = [1, 128], strides = [1, 1]} : vector<2x128xf32> to vector<1x128xf32>
    %212 = arith.select %2, %210, %211 : vector<1x128xi1>, vector<1x128xf32>
    %213 = tpu.concatenate %209, %212 in 0 : vector<1x128xf32>, vector<1x128xf32> -> vector<2x128xf32>
    %c0_61 = arith.constant 0 : index
    %c1408 = arith.constant 1408 : index
    %214 = vector.load %arg13[%c0_61, %c1408] : memref<2x3840xf32, #tpu.memory_space<vmem>>, vector<2x128xf32>
    tpu.vector_store %arg13[%c0_61, %c1408], %213 {strides = array<i32>} : memref<2x3840xf32, #tpu.memory_space<vmem>>, vector<2x128xf32>,
    %215 = vector.extract_strided_slice %94 {offsets = [24, 0], sizes = [2, 128], strides = [1, 1]} : vector<60x128xf32> to vector<2x128xf32>
    %c64_i32_62 = arith.constant 64 : i32
    %216 = tpu.dynamic_rotate %215 by %c64_i32_62 dim 1 : vector<2x128xf32>, i32 -> vector<2x128xf32>
    %217 = vector.extract_strided_slice %215 {offsets = [0, 0], sizes = [1, 128], strides = [1, 1]} : vector<2x128xf32> to vector<1x128xf32>
    %218 = vector.extract_strided_slice %216 {offsets = [1, 0], sizes = [1, 128], strides = [1, 1]} : vector<2x128xf32> to vector<1x128xf32>
    %219 = arith.select %2, %217, %218 : vector<1x128xi1>, vector<1x128xf32>
    %220 = vector.extract_strided_slice %216 {offsets = [0, 0], sizes = [1, 128], strides = [1, 1]} : vector<2x128xf32> to vector<1x128xf32>
    %221 = vector.extract_strided_slice %215 {offsets = [1, 0], sizes = [1, 128], strides = [1, 1]} : vector<2x128xf32> to vector<1x128xf32>
    %222 = arith.select %2, %220, %221 : vector<1x128xi1>, vector<1x128xf32>
    %223 = tpu.concatenate %219, %222 in 0 : vector<1x128xf32>, vector<1x128xf32> -> vector<2x128xf32>
    %c0_63 = arith.constant 0 : index
    %c1536 = arith.constant 1536 : index
    %224 = vector.load %arg13[%c0_63, %c1536] : memref<2x3840xf32, #tpu.memory_space<vmem>>, vector<2x128xf32>
    tpu.vector_store %arg13[%c0_63, %c1536], %223 {strides = array<i32>} : memref<2x3840xf32, #tpu.memory_space<vmem>>, vector<2x128xf32>,
    %225 = vector.extract_strided_slice %94 {offsets = [26, 0], sizes = [2, 128], strides = [1, 1]} : vector<60x128xf32> to vector<2x128xf32>
    %c64_i32_64 = arith.constant 64 : i32
    %226 = tpu.dynamic_rotate %225 by %c64_i32_64 dim 1 : vector<2x128xf32>, i32 -> vector<2x128xf32>
    %227 = vector.extract_strided_slice %225 {offsets = [0, 0], sizes = [1, 128], strides = [1, 1]} : vector<2x128xf32> to vector<1x128xf32>
    %228 = vector.extract_strided_slice %226 {offsets = [1, 0], sizes = [1, 128], strides = [1, 1]} : vector<2x128xf32> to vector<1x128xf32>
    %229 = arith.select %2, %227, %228 : vector<1x128xi1>, vector<1x128xf32>
    %230 = vector.extract_strided_slice %226 {offsets = [0, 0], sizes = [1, 128], strides = [1, 1]} : vector<2x128xf32> to vector<1x128xf32>
    %231 = vector.extract_strided_slice %225 {offsets = [1, 0], sizes = [1, 128], strides = [1, 1]} : vector<2x128xf32> to vector<1x128xf32>
    %232 = arith.select %2, %230, %231 : vector<1x128xi1>, vector<1x128xf32>
    %233 = tpu.concatenate %229, %232 in 0 : vector<1x128xf32>, vector<1x128xf32> -> vector<2x128xf32>
    %c0_65 = arith.constant 0 : index
    %c1664 = arith.constant 1664 : index
    %234 = vector.load %arg13[%c0_65, %c1664] : memref<2x3840xf32, #tpu.memory_space<vmem>>, vector<2x128xf32>
    tpu.vector_store %arg13[%c0_65, %c1664], %233 {strides = array<i32>} : memref<2x3840xf32, #tpu.memory_space<vmem>>, vector<2x128xf32>,
    %235 = vector.extract_strided_slice %94 {offsets = [28, 0], sizes = [2, 128], strides = [1, 1]} : vector<60x128xf32> to vector<2x128xf32>
    %c64_i32_66 = arith.constant 64 : i32
    %236 = tpu.dynamic_rotate %235 by %c64_i32_66 dim 1 : vector<2x128xf32>, i32 -> vector<2x128xf32>
    %237 = vector.extract_strided_slice %235 {offsets = [0, 0], sizes = [1, 128], strides = [1, 1]} : vector<2x128xf32> to vector<1x128xf32>
    %238 = vector.extract_strided_slice %236 {offsets = [1, 0], sizes = [1, 128], strides = [1, 1]} : vector<2x128xf32> to vector<1x128xf32>
    %239 = arith.select %2, %237, %238 : vector<1x128xi1>, vector<1x128xf32>
    %240 = vector.extract_strided_slice %236 {offsets = [0, 0], sizes = [1, 128], strides = [1, 1]} : vector<2x128xf32> to vector<1x128xf32>
    %241 = vector.extract_strided_slice %235 {offsets = [1, 0], sizes = [1, 128], strides = [1, 1]} : vector<2x128xf32> to vector<1x128xf32>
    %242 = arith.select %2, %240, %241 : vector<1x128xi1>, vector<1x128xf32>
    %243 = tpu.concatenate %239, %242 in 0 : vector<1x128xf32>, vector<1x128xf32> -> vector<2x128xf32>
    %c0_67 = arith.constant 0 : index
    %c1792 = arith.constant 1792 : index
    %244 = vector.load %arg13[%c0_67, %c1792] : memref<2x3840xf32, #tpu.memory_space<vmem>>, vector<2x128xf32>
    tpu.vector_store %arg13[%c0_67, %c1792], %243 {strides = array<i32>} : memref<2x3840xf32, #tpu.memory_space<vmem>>, vector<2x128xf32>,
    %245 = vector.extract_strided_slice %94 {offsets = [30, 0], sizes = [2, 128], strides = [1, 1]} : vector<60x128xf32> to vector<2x128xf32>
    %c64_i32_68 = arith.constant 64 : i32
    %246 = tpu.dynamic_rotate %245 by %c64_i32_68 dim 1 : vector<2x128xf32>, i32 -> vector<2x128xf32>
    %247 = vector.extract_strided_slice %245 {offsets = [0, 0], sizes = [1, 128], strides = [1, 1]} : vector<2x128xf32> to vector<1x128xf32>
    %248 = vector.extract_strided_slice %246 {offsets = [1, 0], sizes = [1, 128], strides = [1, 1]} : vector<2x128xf32> to vector<1x128xf32>
    %249 = arith.select %2, %247, %248 : vector<1x128xi1>, vector<1x128xf32>
    %250 = vector.extract_strided_slice %246 {offsets = [0, 0], sizes = [1, 128], strides = [1, 1]} : vector<2x128xf32> to vector<1x128xf32>
    %251 = vector.extract_strided_slice %245 {offsets = [1, 0], sizes = [1, 128], strides = [1, 1]} : vector<2x128xf32> to vector<1x128xf32>
    %252 = arith.select %2, %250, %251 : vector<1x128xi1>, vector<1x128xf32>
    %253 = tpu.concatenate %249, %252 in 0 : vector<1x128xf32>, vector<1x128xf32> -> vector<2x128xf32>
    %c0_69 = arith.constant 0 : index
    %c1920 = arith.constant 1920 : index
    %254 = vector.load %arg13[%c0_69, %c1920] : memref<2x3840xf32, #tpu.memory_space<vmem>>, vector<2x128xf32>
    tpu.vector_store %arg13[%c0_69, %c1920], %253 {strides = array<i32>} : memref<2x3840xf32, #tpu.memory_space<vmem>>, vector<2x128xf32>,
    %255 = vector.extract_strided_slice %94 {offsets = [32, 0], sizes = [2, 128], strides = [1, 1]} : vector<60x128xf32> to vector<2x128xf32>
    %c64_i32_70 = arith.constant 64 : i32
    %256 = tpu.dynamic_rotate %255 by %c64_i32_70 dim 1 : vector<2x128xf32>, i32 -> vector<2x128xf32>
    %257 = vector.extract_strided_slice %255 {offsets = [0, 0], sizes = [1, 128], strides = [1, 1]} : vector<2x128xf32> to vector<1x128xf32>
    %258 = vector.extract_strided_slice %256 {offsets = [1, 0], sizes = [1, 128], strides = [1, 1]} : vector<2x128xf32> to vector<1x128xf32>
    %259 = arith.select %2, %257, %258 : vector<1x128xi1>, vector<1x128xf32>
    %260 = vector.extract_strided_slice %256 {offsets = [0, 0], sizes = [1, 128], strides = [1, 1]} : vector<2x128xf32> to vector<1x128xf32>
    %261 = vector.extract_strided_slice %255 {offsets = [1, 0], sizes = [1, 128], strides = [1, 1]} : vector<2x128xf32> to vector<1x128xf32>
    %262 = arith.select %2, %260, %261 : vector<1x128xi1>, vector<1x128xf32>
    %263 = tpu.concatenate %259, %262 in 0 : vector<1x128xf32>, vector<1x128xf32> -> vector<2x128xf32>
    %c0_71 = arith.constant 0 : index
    %c2048 = arith.constant 2048 : index
    %264 = vector.load %arg13[%c0_71, %c2048] : memref<2x3840xf32, #tpu.memory_space<vmem>>, vector<2x128xf32>
    tpu.vector_store %arg13[%c0_71, %c2048], %263 {strides = array<i32>} : memref<2x3840xf32, #tpu.memory_space<vmem>>, vector<2x128xf32>,
    %265 = vector.extract_strided_slice %94 {offsets = [34, 0], sizes = [2, 128], strides = [1, 1]} : vector<60x128xf32> to vector<2x128xf32>
    %c64_i32_72 = arith.constant 64 : i32
    %266 = tpu.dynamic_rotate %265 by %c64_i32_72 dim 1 : vector<2x128xf32>, i32 -> vector<2x128xf32>
    %267 = vector.extract_strided_slice %265 {offsets = [0, 0], sizes = [1, 128], strides = [1, 1]} : vector<2x128xf32> to vector<1x128xf32>
    %268 = vector.extract_strided_slice %266 {offsets = [1, 0], sizes = [1, 128], strides = [1, 1]} : vector<2x128xf32> to vector<1x128xf32>
    %269 = arith.select %2, %267, %268 : vector<1x128xi1>, vector<1x128xf32>
    %270 = vector.extract_strided_slice %266 {offsets = [0, 0], sizes = [1, 128], strides = [1, 1]} : vector<2x128xf32> to vector<1x128xf32>
    %271 = vector.extract_strided_slice %265 {offsets = [1, 0], sizes = [1, 128], strides = [1, 1]} : vector<2x128xf32> to vector<1x128xf32>
    %272 = arith.select %2, %270, %271 : vector<1x128xi1>, vector<1x128xf32>
    %273 = tpu.concatenate %269, %272 in 0 : vector<1x128xf32>, vector<1x128xf32> -> vector<2x128xf32>
    %c0_73 = arith.constant 0 : index
    %c2176 = arith.constant 2176 : index
    %274 = vector.load %arg13[%c0_73, %c2176] : memref<2x3840xf32, #tpu.memory_space<vmem>>, vector<2x128xf32>
    tpu.vector_store %arg13[%c0_73, %c2176], %273 {strides = array<i32>} : memref<2x3840xf32, #tpu.memory_space<vmem>>, vector<2x128xf32>,
    %275 = vector.extract_strided_slice %94 {offsets = [36, 0], sizes = [2, 128], strides = [1, 1]} : vector<60x128xf32> to vector<2x128xf32>
    %c64_i32_74 = arith.constant 64 : i32
    %276 = tpu.dynamic_rotate %275 by %c64_i32_74 dim 1 : vector<2x128xf32>, i32 -> vector<2x128xf32>
    %277 = vector.extract_strided_slice %275 {offsets = [0, 0], sizes = [1, 128], strides = [1, 1]} : vector<2x128xf32> to vector<1x128xf32>
    %278 = vector.extract_strided_slice %276 {offsets = [1, 0], sizes = [1, 128], strides = [1, 1]} : vector<2x128xf32> to vector<1x128xf32>
    %279 = arith.select %2, %277, %278 : vector<1x128xi1>, vector<1x128xf32>
    %280 = vector.extract_strided_slice %276 {offsets = [0, 0], sizes = [1, 128], strides = [1, 1]} : vector<2x128xf32> to vector<1x128xf32>
    %281 = vector.extract_strided_slice %275 {offsets = [1, 0], sizes = [1, 128], strides = [1, 1]} : vector<2x128xf32> to vector<1x128xf32>
    %282 = arith.select %2, %280, %281 : vector<1x128xi1>, vector<1x128xf32>
    %283 = tpu.concatenate %279, %282 in 0 : vector<1x128xf32>, vector<1x128xf32> -> vector<2x128xf32>
    %c0_75 = arith.constant 0 : index
    %c2304 = arith.constant 2304 : index
    %284 = vector.load %arg13[%c0_75, %c2304] : memref<2x3840xf32, #tpu.memory_space<vmem>>, vector<2x128xf32>
    tpu.vector_store %arg13[%c0_75, %c2304], %283 {strides = array<i32>} : memref<2x3840xf32, #tpu.memory_space<vmem>>, vector<2x128xf32>,
    %285 = vector.extract_strided_slice %94 {offsets = [38, 0], sizes = [2, 128], strides = [1, 1]} : vector<60x128xf32> to vector<2x128xf32>
    %c64_i32_76 = arith.constant 64 : i32
    %286 = tpu.dynamic_rotate %285 by %c64_i32_76 dim 1 : vector<2x128xf32>, i32 -> vector<2x128xf32>
    %287 = vector.extract_strided_slice %285 {offsets = [0, 0], sizes = [1, 128], strides = [1, 1]} : vector<2x128xf32> to vector<1x128xf32>
    %288 = vector.extract_strided_slice %286 {offsets = [1, 0], sizes = [1, 128], strides = [1, 1]} : vector<2x128xf32> to vector<1x128xf32>
    %289 = arith.select %2, %287, %288 : vector<1x128xi1>, vector<1x128xf32>
    %290 = vector.extract_strided_slice %286 {offsets = [0, 0], sizes = [1, 128], strides = [1, 1]} : vector<2x128xf32> to vector<1x128xf32>
    %291 = vector.extract_strided_slice %285 {offsets = [1, 0], sizes = [1, 128], strides = [1, 1]} : vector<2x128xf32> to vector<1x128xf32>
    %292 = arith.select %2, %290, %291 : vector<1x128xi1>, vector<1x128xf32>
    %293 = tpu.concatenate %289, %292 in 0 : vector<1x128xf32>, vector<1x128xf32> -> vector<2x128xf32>
    %c0_77 = arith.constant 0 : index
    %c2432 = arith.constant 2432 : index
    %294 = vector.load %arg13[%c0_77, %c2432] : memref<2x3840xf32, #tpu.memory_space<vmem>>, vector<2x128xf32>
    tpu.vector_store %arg13[%c0_77, %c2432], %293 {strides = array<i32>} : memref<2x3840xf32, #tpu.memory_space<vmem>>, vector<2x128xf32>,
    %295 = vector.extract_strided_slice %94 {offsets = [40, 0], sizes = [2, 128], strides = [1, 1]} : vector<60x128xf32> to vector<2x128xf32>
    %c64_i32_78 = arith.constant 64 : i32
    %296 = tpu.dynamic_rotate %295 by %c64_i32_78 dim 1 : vector<2x128xf32>, i32 -> vector<2x128xf32>
    %297 = vector.extract_strided_slice %295 {offsets = [0, 0], sizes = [1, 128], strides = [1, 1]} : vector<2x128xf32> to vector<1x128xf32>
    %298 = vector.extract_strided_slice %296 {offsets = [1, 0], sizes = [1, 128], strides = [1, 1]} : vector<2x128xf32> to vector<1x128xf32>
    %299 = arith.select %2, %297, %298 : vector<1x128xi1>, vector<1x128xf32>
    %300 = vector.extract_strided_slice %296 {offsets = [0, 0], sizes = [1, 128], strides = [1, 1]} : vector<2x128xf32> to vector<1x128xf32>
    %301 = vector.extract_strided_slice %295 {offsets = [1, 0], sizes = [1, 128], strides = [1, 1]} : vector<2x128xf32> to vector<1x128xf32>
    %302 = arith.select %2, %300, %301 : vector<1x128xi1>, vector<1x128xf32>
    %303 = tpu.concatenate %299, %302 in 0 : vector<1x128xf32>, vector<1x128xf32> -> vector<2x128xf32>
    %c0_79 = arith.constant 0 : index
    %c2560 = arith.constant 2560 : index
    %304 = vector.load %arg13[%c0_79, %c2560] : memref<2x3840xf32, #tpu.memory_space<vmem>>, vector<2x128xf32>
    tpu.vector_store %arg13[%c0_79, %c2560], %303 {strides = array<i32>} : memref<2x3840xf32, #tpu.memory_space<vmem>>, vector<2x128xf32>,
    %305 = vector.extract_strided_slice %94 {offsets = [42, 0], sizes = [2, 128], strides = [1, 1]} : vector<60x128xf32> to vector<2x128xf32>
    %c64_i32_80 = arith.constant 64 : i32
    %306 = tpu.dynamic_rotate %305 by %c64_i32_80 dim 1 : vector<2x128xf32>, i32 -> vector<2x128xf32>
    %307 = vector.extract_strided_slice %305 {offsets = [0, 0], sizes = [1, 128], strides = [1, 1]} : vector<2x128xf32> to vector<1x128xf32>
    %308 = vector.extract_strided_slice %306 {offsets = [1, 0], sizes = [1, 128], strides = [1, 1]} : vector<2x128xf32> to vector<1x128xf32>
    %309 = arith.select %2, %307, %308 : vector<1x128xi1>, vector<1x128xf32>
    %310 = vector.extract_strided_slice %306 {offsets = [0, 0], sizes = [1, 128], strides = [1, 1]} : vector<2x128xf32> to vector<1x128xf32>
    %311 = vector.extract_strided_slice %305 {offsets = [1, 0], sizes = [1, 128], strides = [1, 1]} : vector<2x128xf32> to vector<1x128xf32>
    %312 = arith.select %2, %310, %311 : vector<1x128xi1>, vector<1x128xf32>
    %313 = tpu.concatenate %309, %312 in 0 : vector<1x128xf32>, vector<1x128xf32> -> vector<2x128xf32>
    %c0_81 = arith.constant 0 : index
    %c2688 = arith.constant 2688 : index
    %314 = vector.load %arg13[%c0_81, %c2688] : memref<2x3840xf32, #tpu.memory_space<vmem>>, vector<2x128xf32>
    tpu.vector_store %arg13[%c0_81, %c2688], %313 {strides = array<i32>} : memref<2x3840xf32, #tpu.memory_space<vmem>>, vector<2x128xf32>,
    %315 = vector.extract_strided_slice %94 {offsets = [44, 0], sizes = [2, 128], strides = [1, 1]} : vector<60x128xf32> to vector<2x128xf32>
    %c64_i32_82 = arith.constant 64 : i32
    %316 = tpu.dynamic_rotate %315 by %c64_i32_82 dim 1 : vector<2x128xf32>, i32 -> vector<2x128xf32>
    %317 = vector.extract_strided_slice %315 {offsets = [0, 0], sizes = [1, 128], strides = [1, 1]} : vector<2x128xf32> to vector<1x128xf32>
    %318 = vector.extract_strided_slice %316 {offsets = [1, 0], sizes = [1, 128], strides = [1, 1]} : vector<2x128xf32> to vector<1x128xf32>
    %319 = arith.select %2, %317, %318 : vector<1x128xi1>, vector<1x128xf32>
    %320 = vector.extract_strided_slice %316 {offsets = [0, 0], sizes = [1, 128], strides = [1, 1]} : vector<2x128xf32> to vector<1x128xf32>
    %321 = vector.extract_strided_slice %315 {offsets = [1, 0], sizes = [1, 128], strides = [1, 1]} : vector<2x128xf32> to vector<1x128xf32>
    %322 = arith.select %2, %320, %321 : vector<1x128xi1>, vector<1x128xf32>
    %323 = tpu.concatenate %319, %322 in 0 : vector<1x128xf32>, vector<1x128xf32> -> vector<2x128xf32>
    %c0_83 = arith.constant 0 : index
    %c2816 = arith.constant 2816 : index
    %324 = vector.load %arg13[%c0_83, %c2816] : memref<2x3840xf32, #tpu.memory_space<vmem>>, vector<2x128xf32>
    tpu.vector_store %arg13[%c0_83, %c2816], %323 {strides = array<i32>} : memref<2x3840xf32, #tpu.memory_space<vmem>>, vector<2x128xf32>,
    %325 = vector.extract_strided_slice %94 {offsets = [46, 0], sizes = [2, 128], strides = [1, 1]} : vector<60x128xf32> to vector<2x128xf32>
    %c64_i32_84 = arith.constant 64 : i32
    %326 = tpu.dynamic_rotate %325 by %c64_i32_84 dim 1 : vector<2x128xf32>, i32 -> vector<2x128xf32>
    %327 = vector.extract_strided_slice %325 {offsets = [0, 0], sizes = [1, 128], strides = [1, 1]} : vector<2x128xf32> to vector<1x128xf32>
    %328 = vector.extract_strided_slice %326 {offsets = [1, 0], sizes = [1, 128], strides = [1, 1]} : vector<2x128xf32> to vector<1x128xf32>
    %329 = arith.select %2, %327, %328 : vector<1x128xi1>, vector<1x128xf32>
    %330 = vector.extract_strided_slice %326 {offsets = [0, 0], sizes = [1, 128], strides = [1, 1]} : vector<2x128xf32> to vector<1x128xf32>
    %331 = vector.extract_strided_slice %325 {offsets = [1, 0], sizes = [1, 128], strides = [1, 1]} : vector<2x128xf32> to vector<1x128xf32>
    %332 = arith.select %2, %330, %331 : vector<1x128xi1>, vector<1x128xf32>
    %333 = tpu.concatenate %329, %332 in 0 : vector<1x128xf32>, vector<1x128xf32> -> vector<2x128xf32>
    %c0_85 = arith.constant 0 : index
    %c2944 = arith.constant 2944 : index
    %334 = vector.load %arg13[%c0_85, %c2944] : memref<2x3840xf32, #tpu.memory_space<vmem>>, vector<2x128xf32>
    tpu.vector_store %arg13[%c0_85, %c2944], %333 {strides = array<i32>} : memref<2x3840xf32, #tpu.memory_space<vmem>>, vector<2x128xf32>,
    %335 = vector.extract_strided_slice %94 {offsets = [48, 0], sizes = [2, 128], strides = [1, 1]} : vector<60x128xf32> to vector<2x128xf32>
    %c64_i32_86 = arith.constant 64 : i32
    %336 = tpu.dynamic_rotate %335 by %c64_i32_86 dim 1 : vector<2x128xf32>, i32 -> vector<2x128xf32>
    %337 = vector.extract_strided_slice %335 {offsets = [0, 0], sizes = [1, 128], strides = [1, 1]} : vector<2x128xf32> to vector<1x128xf32>
    %338 = vector.extract_strided_slice %336 {offsets = [1, 0], sizes = [1, 128], strides = [1, 1]} : vector<2x128xf32> to vector<1x128xf32>
    %339 = arith.select %2, %337, %338 : vector<1x128xi1>, vector<1x128xf32>
    %340 = vector.extract_strided_slice %336 {offsets = [0, 0], sizes = [1, 128], strides = [1, 1]} : vector<2x128xf32> to vector<1x128xf32>
    %341 = vector.extract_strided_slice %335 {offsets = [1, 0], sizes = [1, 128], strides = [1, 1]} : vector<2x128xf32> to vector<1x128xf32>
    %342 = arith.select %2, %340, %341 : vector<1x128xi1>, vector<1x128xf32>
    %343 = tpu.concatenate %339, %342 in 0 : vector<1x128xf32>, vector<1x128xf32> -> vector<2x128xf32>
    %c0_87 = arith.constant 0 : index
    %c3072 = arith.constant 3072 : index
    %344 = vector.load %arg13[%c0_87, %c3072] : memref<2x3840xf32, #tpu.memory_space<vmem>>, vector<2x128xf32>
    tpu.vector_store %arg13[%c0_87, %c3072], %343 {strides = array<i32>} : memref<2x3840xf32, #tpu.memory_space<vmem>>, vector<2x128xf32>,
    %345 = vector.extract_strided_slice %94 {offsets = [50, 0], sizes = [2, 128], strides = [1, 1]} : vector<60x128xf32> to vector<2x128xf32>
    %c64_i32_88 = arith.constant 64 : i32
    %346 = tpu.dynamic_rotate %345 by %c64_i32_88 dim 1 : vector<2x128xf32>, i32 -> vector<2x128xf32>
    %347 = vector.extract_strided_slice %345 {offsets = [0, 0], sizes = [1, 128], strides = [1, 1]} : vector<2x128xf32> to vector<1x128xf32>
    %348 = vector.extract_strided_slice %346 {offsets = [1, 0], sizes = [1, 128], strides = [1, 1]} : vector<2x128xf32> to vector<1x128xf32>
    %349 = arith.select %2, %347, %348 : vector<1x128xi1>, vector<1x128xf32>
    %350 = vector.extract_strided_slice %346 {offsets = [0, 0], sizes = [1, 128], strides = [1, 1]} : vector<2x128xf32> to vector<1x128xf32>
    %351 = vector.extract_strided_slice %345 {offsets = [1, 0], sizes = [1, 128], strides = [1, 1]} : vector<2x128xf32> to vector<1x128xf32>
    %352 = arith.select %2, %350, %351 : vector<1x128xi1>, vector<1x128xf32>
    %353 = tpu.concatenate %349, %352 in 0 : vector<1x128xf32>, vector<1x128xf32> -> vector<2x128xf32>
    %c0_89 = arith.constant 0 : index
    %c3200 = arith.constant 3200 : index
    %354 = vector.load %arg13[%c0_89, %c3200] : memref<2x3840xf32, #tpu.memory_space<vmem>>, vector<2x128xf32>
    tpu.vector_store %arg13[%c0_89, %c3200], %353 {strides = array<i32>} : memref<2x3840xf32, #tpu.memory_space<vmem>>, vector<2x128xf32>,
    %355 = vector.extract_strided_slice %94 {offsets = [52, 0], sizes = [2, 128], strides = [1, 1]} : vector<60x128xf32> to vector<2x128xf32>
    %c64_i32_90 = arith.constant 64 : i32
    %356 = tpu.dynamic_rotate %355 by %c64_i32_90 dim 1 : vector<2x128xf32>, i32 -> vector<2x128xf32>
    %357 = vector.extract_strided_slice %355 {offsets = [0, 0], sizes = [1, 128], strides = [1, 1]} : vector<2x128xf32> to vector<1x128xf32>
    %358 = vector.extract_strided_slice %356 {offsets = [1, 0], sizes = [1, 128], strides = [1, 1]} : vector<2x128xf32> to vector<1x128xf32>
    %359 = arith.select %2, %357, %358 : vector<1x128xi1>, vector<1x128xf32>
    %360 = vector.extract_strided_slice %356 {offsets = [0, 0], sizes = [1, 128], strides = [1, 1]} : vector<2x128xf32> to vector<1x128xf32>
    %361 = vector.extract_strided_slice %355 {offsets = [1, 0], sizes = [1, 128], strides = [1, 1]} : vector<2x128xf32> to vector<1x128xf32>
    %362 = arith.select %2, %360, %361 : vector<1x128xi1>, vector<1x128xf32>
    %363 = tpu.concatenate %359, %362 in 0 : vector<1x128xf32>, vector<1x128xf32> -> vector<2x128xf32>
    %c0_91 = arith.constant 0 : index
    %c3328 = arith.constant 3328 : index
    %364 = vector.load %arg13[%c0_91, %c3328] : memref<2x3840xf32, #tpu.memory_space<vmem>>, vector<2x128xf32>
    tpu.vector_store %arg13[%c0_91, %c3328], %363 {strides = array<i32>} : memref<2x3840xf32, #tpu.memory_space<vmem>>, vector<2x128xf32>,
    %365 = vector.extract_strided_slice %94 {offsets = [54, 0], sizes = [2, 128], strides = [1, 1]} : vector<60x128xf32> to vector<2x128xf32>
    %c64_i32_92 = arith.constant 64 : i32
    %366 = tpu.dynamic_rotate %365 by %c64_i32_92 dim 1 : vector<2x128xf32>, i32 -> vector<2x128xf32>
    %367 = vector.extract_strided_slice %365 {offsets = [0, 0], sizes = [1, 128], strides = [1, 1]} : vector<2x128xf32> to vector<1x128xf32>
    %368 = vector.extract_strided_slice %366 {offsets = [1, 0], sizes = [1, 128], strides = [1, 1]} : vector<2x128xf32> to vector<1x128xf32>
    %369 = arith.select %2, %367, %368 : vector<1x128xi1>, vector<1x128xf32>
    %370 = vector.extract_strided_slice %366 {offsets = [0, 0], sizes = [1, 128], strides = [1, 1]} : vector<2x128xf32> to vector<1x128xf32>
    %371 = vector.extract_strided_slice %365 {offsets = [1, 0], sizes = [1, 128], strides = [1, 1]} : vector<2x128xf32> to vector<1x128xf32>
    %372 = arith.select %2, %370, %371 : vector<1x128xi1>, vector<1x128xf32>
    %373 = tpu.concatenate %369, %372 in 0 : vector<1x128xf32>, vector<1x128xf32> -> vector<2x128xf32>
    %c0_93 = arith.constant 0 : index
    %c3456 = arith.constant 3456 : index
    %374 = vector.load %arg13[%c0_93, %c3456] : memref<2x3840xf32, #tpu.memory_space<vmem>>, vector<2x128xf32>
    tpu.vector_store %arg13[%c0_93, %c3456], %373 {strides = array<i32>} : memref<2x3840xf32, #tpu.memory_space<vmem>>, vector<2x128xf32>,
    %375 = vector.extract_strided_slice %94 {offsets = [56, 0], sizes = [2, 128], strides = [1, 1]} : vector<60x128xf32> to vector<2x128xf32>
    %c64_i32_94 = arith.constant 64 : i32
    %376 = tpu.dynamic_rotate %375 by %c64_i32_94 dim 1 : vector<2x128xf32>, i32 -> vector<2x128xf32>
    %377 = vector.extract_strided_slice %375 {offsets = [0, 0], sizes = [1, 128], strides = [1, 1]} : vector<2x128xf32> to vector<1x128xf32>
    %378 = vector.extract_strided_slice %376 {offsets = [1, 0], sizes = [1, 128], strides = [1, 1]} : vector<2x128xf32> to vector<1x128xf32>
    %379 = arith.select %2, %377, %378 : vector<1x128xi1>, vector<1x128xf32>
    %380 = vector.extract_strided_slice %376 {offsets = [0, 0], sizes = [1, 128], strides = [1, 1]} : vector<2x128xf32> to vector<1x128xf32>
    %381 = vector.extract_strided_slice %375 {offsets = [1, 0], sizes = [1, 128], strides = [1, 1]} : vector<2x128xf32> to vector<1x128xf32>
    %382 = arith.select %2, %380, %381 : vector<1x128xi1>, vector<1x128xf32>
    %383 = tpu.concatenate %379, %382 in 0 : vector<1x128xf32>, vector<1x128xf32> -> vector<2x128xf32>
    %c0_95 = arith.constant 0 : index
    %c3584 = arith.constant 3584 : index
    %384 = vector.load %arg13[%c0_95, %c3584] : memref<2x3840xf32, #tpu.memory_space<vmem>>, vector<2x128xf32>
    tpu.vector_store %arg13[%c0_95, %c3584], %383 {strides = array<i32>} : memref<2x3840xf32, #tpu.memory_space<vmem>>, vector<2x128xf32>,
    %385 = vector.extract_strided_slice %94 {offsets = [58, 0], sizes = [2, 128], strides = [1, 1]} : vector<60x128xf32> to vector<2x128xf32>
    %c64_i32_96 = arith.constant 64 : i32
    %386 = tpu.dynamic_rotate %385 by %c64_i32_96 dim 1 : vector<2x128xf32>, i32 -> vector<2x128xf32>
    %387 = vector.extract_strided_slice %385 {offsets = [0, 0], sizes = [1, 128], strides = [1, 1]} : vector<2x128xf32> to vector<1x128xf32>
    %388 = vector.extract_strided_slice %386 {offsets = [1, 0], sizes = [1, 128], strides = [1, 1]} : vector<2x128xf32> to vector<1x128xf32>
    %389 = arith.select %2, %387, %388 : vector<1x128xi1>, vector<1x128xf32>
    %390 = vector.extract_strided_slice %386 {offsets = [0, 0], sizes = [1, 128], strides = [1, 1]} : vector<2x128xf32> to vector<1x128xf32>
    %391 = vector.extract_strided_slice %385 {offsets = [1, 0], sizes = [1, 128], strides = [1, 1]} : vector<2x128xf32> to vector<1x128xf32>
    %392 = arith.select %2, %390, %391 : vector<1x128xi1>, vector<1x128xf32>
    %393 = tpu.concatenate %389, %392 in 0 : vector<1x128xf32>, vector<1x128xf32> -> vector<2x128xf32>
    %c0_97 = arith.constant 0 : index
    %c3712 = arith.constant 3712 : index
    %394 = vector.load %arg13[%c0_97, %c3712] : memref<2x3840xf32, #tpu.memory_space<vmem>>, vector<2x128xf32>
    tpu.vector_store %arg13[%c0_97, %c3712], %393 {strides = array<i32>} : memref<2x3840xf32, #tpu.memory_space<vmem>>, vector<2x128xf32>,
    tpu.wait_dma2 semaphore(%arg15 : memref<!tpu.dma_semaphore, #tpu.memory_space<semaphore_mem>>) src(%arg8 : memref<3840x40xf32, #tpu.memory_space<any>>) dst(%arg14 : memref<3840x40xf32, #tpu.memory_space<vmem>>)
    %c0_98 = arith.constant 0 : index
    %c0_99 = arith.constant 0 : index
    %395 = vector.load %arg13[%c0_98, %c0_99] : memref<2x3840xf32, #tpu.memory_space<vmem>>, vector<2x3840xf32>
    %c0_100 = arith.constant 0 : index
    %c0_101 = arith.constant 0 : index
    %396 = vector.load %arg14[%c0_100, %c0_101] : memref<3840x40xf32, #tpu.memory_space<vmem>>, vector<3840x40xf32>
    %cst_102 = arith.constant dense<0.000000e+00> : vector<2x40xf32>
    %397 = tpu.matmul %395, %396, %cst_102 {dimension_numbers = #tpu.dot_dimension_numbers<[1], [0], [0], [1], [0, 0, 1, 1], [], []>} : vector<2x3840xf32>, vector<3840x40xf32>, vector<2x40xf32> -> vector<2x40xf32>
    %c0_103 = arith.constant 0 : index
    %c0_104 = arith.constant 0 : index
    %398 = vector.load %arg9[%c0_103, %c0_104] : memref<1x40xf32, #tpu.memory_space<vmem>>, vector<1x40xf32>
    %399 = vector.broadcast %398 : vector<1x40xf32> to vector<2x40xf32>
    %400 = arith.addf %397, %399 : vector<2x40xf32>
    %cst_105 = arith.constant 0.000000e+00 : f32
    %401 = vector.broadcast %cst_105 : f32 to vector<2x40xf32>
    %402 = arith.maximumf %400, %401 : vector<2x40xf32>
    %c0_106 = arith.constant 0 : index
    %c0_107 = arith.constant 0 : index
    %403 = vector.load %arg10[%c0_106, %c0_107] : memref<1x40xf32, #tpu.memory_space<vmem>>, vector<1x40xf32>
    %404 = vector.broadcast %403 : vector<1x40xf32> to vector<2x40xf32>
    %405 = arith.mulf %402, %404 : vector<2x40xf32>
    %cst_108 = arith.constant dense<0.000000e+00> : vector<2xf32>
    %406 = vector.multi_reduction <add>, %405, %cst_108 [1] : vector<2x40xf32> to vector<2xf32>
    %407 = vector.shape_cast %406 : vector<2xf32> to vector<2x1xf32>
    %c0_109 = arith.constant 0 : index
    %c0_110 = arith.constant 0 : index
    %408 = vector.load %arg11[%c0_109, %c0_110] : memref<1x1xf32, #tpu.memory_space<vmem>>, vector<1x1xf32>
    %409 = vector.broadcast %408 : vector<1x1xf32> to vector<2x1xf32>
    %410 = arith.addf %407, %409 : vector<2x1xf32>
    %c0_111 = arith.constant 0 : index
    %c0_112 = arith.constant 0 : index
    %411 = vector.load %arg12[%c0_111, %c0_112] : memref<2x1xf32, #tpu.memory_space<vmem>>, vector<2x1xf32>
    tpu.vector_store %arg12[%c0_111, %c0_112], %410 {strides = array<i32>} : memref<2x1xf32, #tpu.memory_space<vmem>>, vector<2x1xf32>,
    return
  }
}

</mosaic_0001>

<bundles_post_ra>
// kernel: crnn_reg_forward.1
= control target key start
LH: loop header
LB: loop body
LE: loop exit
PB: predicated region body
PF: predicated region fallthrough
CT: control target
= control target key end

     0   :  { %s6790_s0 = inlined_call_operand.vmem [shape: f32[8,512], index: 0, kind: input, shape index: {}]   ;;  %s6791_s1 = inlined_call_operand.vmem [shape: f32[16,8], index: 1, kind: input, shape index: {}]   ;;  %s6792_s2 = inlined_call_operand.vmem [shape: f32[16,1], index: 2, kind: input, shape index: {}]   ;;  %s6793_s3 = inlined_call_operand.vmem [shape: f32[32,32], index: 3, kind: input, shape index: {}]   ;;  %s6794_s4 = inlined_call_operand.vmem [shape: f32[32,1], index: 4, kind: input, shape index: {}]   ;;  %s6795_s5 = inlined_call_operand.vmem [shape: f32[32,1], index: 5, kind: input, shape index: {}]   ;;  %s6796_s6 = inlined_call_operand.vmem [shape: f32[32,1], index: 6, kind: input, shape index: {}]   ;;  %s6797_s7 = inlined_call_operand.vmem [shape: f32[60,160], index: 7, kind: input, shape index: {}]   ;;  %s6798_s8 = inlined_call_operand.vmem [shape: f32[3840,40], index: 8, kind: input, shape index: {}]   ;;  %s6799_s9 = inlined_call_operand.vmem [shape: f32[1,40], index: 9, kind: input, shape index: {}]   ;;  %s6800_s10 = inlined_call_operand.vmem [shape: f32[1,40], index: 10, kind: input, shape index: {}]   ;;  %s6801_s11 = inlined_call_operand.<no memory space> [shape: f32[1,1], index: 11, kind: input, shape index: {}]   ;;  %s6802_s12 = inlined_call_operand.vmem [shape: f32[2,1], index: 12, kind: output, shape index: {}]  }
   0x1   :  { %v17_v0 = vstv %s6801_s11  ;;  %v3398_v1 = vld [vmem:[%s6798_s8] sm:$0xff]  ;;  %v3403_v2 = vld [vmem:[%s6798_s8 + $0x8] sm:$0xff]  ;;  %v3408_v3 = vld [vmem:[%s6798_s8 + $0x10] sm:$0xff] }
   0x2   :  { %6803 = vst [vmem:[#allocation8_spill] sm:$0xff] %v3398_v1  ;;  %v3413_v4 = vld [vmem:[%s6798_s8 + $0x18] sm:$0xff]  ;;  %v3418_v5 = vld [vmem:[%s6798_s8 + $0x20] sm:$0xff]  ;;  %v3423_v6 = vld [vmem:[%s6798_s8 + $0x28] sm:$0xff] }
   0x3   :  { %6804 = vst [vmem:[#allocation9_spill] sm:$0xff] %v3403_v2  ;;  %v3428_v7 = vld [vmem:[%s6798_s8 + $0x30] sm:$0xff]  ;;  %v3433_v8 = vld [vmem:[%s6798_s8 + $0x38] sm:$0xff]  ;;  %v3438_v9 = vld [vmem:[%s6798_s8 + $0x40] sm:$0xff] }
   0x4   :  { %6805 = vst [vmem:[#allocation10_spill] sm:$0xff] %v3408_v3  ;;  %v3443_v10 = vld [vmem:[%s6798_s8 + $0x48] sm:$0xff]  ;;  %v3448_v11 = vld [vmem:[%s6798_s8 + $0x50] sm:$0xff]  ;;  %v3453_v12 = vld [vmem:[%s6798_s8 + $0x58] sm:$0xff] }
   0x5   :  { %18 = vst [vmem:[#allocation5] sm:$0x1] %v17_v0  ;;  %v3458_v13 = vld [vmem:[%s6798_s8 + $0x60] sm:$0xff]  ;;  %v3463_v14 = vld [vmem:[%s6798_s8 + $0x68] sm:$0xff]  ;;  %v3468_v15 = vld [vmem:[%s6798_s8 + $0x70] sm:$0xff] }
   0x6   :  { %6806 = vst [vmem:[#allocation11_spill] sm:$0xff] %v3413_v4  ;;  %v3473_v16 = vld [vmem:[%s6798_s8 + $0x78] sm:$0xff]  ;;  %v3478_v17 = vld [vmem:[%s6798_s8 + $0x80] sm:$0xff]  ;;  %v3483_v18 = vld [vmem:[%s6798_s8 + $0x88] sm:$0xff] }
   0x7   :  { %6807 = vst [vmem:[#allocation12_spill] sm:$0xff] %v3418_v5  ;;  %v3488_v19 = vld [vmem:[%s6798_s8 + $0x90] sm:$0xff]  ;;  %v3493_v20 = vld [vmem:[%s6798_s8 + $0x98] sm:$0xff]  ;;  %v3498_v21 = vld [vmem:[%s6798_s8 + $0xa0] sm:$0xff] }
   0x8   :  { %6808 = vst [vmem:[#allocation13_spill] sm:$0xff] %v3423_v6  ;;  %v3503_v22 = vld [vmem:[%s6798_s8 + $0xa8] sm:$0xff]  ;;  %v3508_v23 = vld [vmem:[%s6798_s8 + $0xb0] sm:$0xff]  ;;  %v3513_v24 = vld [vmem:[%s6798_s8 + $0xb8] sm:$0xff] }
   0x9   :  { %6809 = vst [vmem:[#allocation14_spill] sm:$0xff] %v3428_v7  ;;  %v3518_v25 = vld [vmem:[%s6798_s8 + $0xc0] sm:$0xff]  ;;  %v3523_v26 = vld [vmem:[%s6798_s8 + $0xc8] sm:$0xff]  ;;  %v3528_v27 = vld [vmem:[%s6798_s8 + $0xd0] sm:$0xff] }
   0xa   :  { %6810 = vst [vmem:[#allocation15_spill] sm:$0xff] %v3433_v8  ;;  %v3533_v28 = vld [vmem:[%s6798_s8 + $0xd8] sm:$0xff]  ;;  %v3538_v29 = vld [vmem:[%s6798_s8 + $0xe0] sm:$0xff]  ;;  %v3543_v30 = vld [vmem:[%s6798_s8 + $0xe8] sm:$0xff] }
   0xb   :  { %6811 = vst [vmem:[#allocation16_spill] sm:$0xff] %v3478_v17  ;;  %v3548_v31 = vld [vmem:[%s6798_s8 + $0xf0] sm:$0xff]  ;;  %v3553_v32 = vld [vmem:[%s6798_s8 + $0xf8] sm:$0xff]  ;;  %v3558_v33 = vld [vmem:[%s6798_s8 + $0x100] sm:$0xff] }
   0xc   :  { %6812 = vst [vmem:[#allocation17_spill] sm:$0xff] %v3483_v18  ;;  %v3563_v34 = vld [vmem:[%s6798_s8 + $0x108] sm:$0xff]  ;;  %v3568_v35 = vld [vmem:[%s6798_s8 + $0x110] sm:$0xff]  ;;  %v3573_v36 = vld [vmem:[%s6798_s8 + $0x118] sm:$0xff] }
   0xd   :  { %6813 = vst [vmem:[#allocation18_spill] sm:$0xff] %v3488_v19  ;;  %v3578_v37 = vld [vmem:[%s6798_s8 + $0x120] sm:$0xff]  ;;  %v3583_v38 = vld [vmem:[%s6798_s8 + $0x128] sm:$0xff]  ;;  %v3588_v39 = vld [vmem:[%s6798_s8 + $0x130] sm:$0xff] }
   0xe   :  { %6814 = vst [vmem:[#allocation19_spill] sm:$0xff] %v3493_v20  ;;  %v3593_v40 = vld [vmem:[%s6798_s8 + $0x138] sm:$0xff]  ;;  %v3598_v41 = vld [vmem:[%s6798_s8 + $0x140] sm:$0xff]  ;;  %v3603_v42 = vld [vmem:[%s6798_s8 + $0x148] sm:$0xff] }
   0xf   :  { %6815 = vst [vmem:[#allocation20_spill] sm:$0xff] %v3498_v21  ;;  %v3608_v43 = vld [vmem:[%s6798_s8 + $0x150] sm:$0xff]  ;;  %v3613_v44 = vld [vmem:[%s6798_s8 + $0x158] sm:$0xff]  ;;  %v3618_v45 = vld [vmem:[%s6798_s8 + $0x160] sm:$0xff] }
  0x10   :  { %6816 = vst [vmem:[#allocation21_spill] sm:$0xff] %v3503_v22  ;;  %v3623_v46 = vld [vmem:[%s6798_s8 + $0x168] sm:$0xff]  ;;  %v3628_v47 = vld [vmem:[%s6798_s8 + $0x170] sm:$0xff]  ;;  %v3633_v48 = vld [vmem:[%s6798_s8 + $0x178] sm:$0xff] }
  0x11   :  { %6817 = vst [vmem:[#allocation22_spill] sm:$0xff] %v3508_v23  ;;  %v3638_v49 = vld [vmem:[%s6798_s8 + $0x180] sm:$0xff]  ;;  %v3643_v50 = vld [vmem:[%s6798_s8 + $0x188] sm:$0xff]  ;;  %v3648_v51 = vld [vmem:[%s6798_s8 + $0x190] sm:$0xff] }
  0x12   :  { %6818 = vst [vmem:[#allocation23_spill] sm:$0xff] %v3513_v24  ;;  %v3653_v52 = vld [vmem:[%s6798_s8 + $0x198] sm:$0xff]  ;;  %v3658_v53 = vld [vmem:[%s6798_s8 + $0x1a0] sm:$0xff]  ;;  %v3663_v54 = vld [vmem:[%s6798_s8 + $0x1a8] sm:$0xff] }
  0x13   :  { %6819 = vst [vmem:[#allocation24_spill] sm:$0xff] %v3558_v33  ;;  %v3668_v55 = vld [vmem:[%s6798_s8 + $0x1b0] sm:$0xff]  ;;  %v3673_v56 = vld [vmem:[%s6798_s8 + $0x1b8] sm:$0xff]  ;;  %v3678_v57 = vld [vmem:[%s6798_s8 + $0x1c0] sm:$0xff] }
  0x14   :  { %6820 = vst [vmem:[#allocation25_spill] sm:$0xff] %v3563_v34  ;;  %v3683_v58 = vld [vmem:[%s6798_s8 + $0x1c8] sm:$0xff]  ;;  %v3688_v59 = vld [vmem:[%s6798_s8 + $0x1d0] sm:$0xff]  ;;  %v3693_v60 = vld [vmem:[%s6798_s8 + $0x1d8] sm:$0xff] }
  0x15   :  { %6821 = vst [vmem:[#allocation26_spill] sm:$0xff] %v3568_v35  ;;  %v3698_v61 = vld [vmem:[%s6798_s8 + $0x1e0] sm:$0xff]  ;;  %v3703_v62 = vld [vmem:[%s6798_s8 + $0x1e8] sm:$0xff]  ;;  %v3708_v63 = vld [vmem:[%s6798_s8 + $0x1f0] sm:$0xff] }
  0x16   :  { %6822 = vst [vmem:[#allocation27_spill] sm:$0xff] %v3573_v36  ;;  %v3713_v0 = vld [vmem:[%s6798_s8 + $0x1f8] sm:$0xff]  ;;  %v3723_v33 = vld [vmem:[%s6798_s8 + $0x208] sm:$0xff]  ;;  %v3888_v17 = vld [vmem:[%s6798_s8 + $0x310] sm:$0xff] }
  0x17   :  { %6823 = vst [vmem:[#allocation28_spill] sm:$0xff] %v3578_v37  ;;  %v3733_v34 = vld [vmem:[%s6798_s8 + $0x218] sm:$0xff]  ;;  %v3743_v35 = vld [vmem:[%s6798_s8 + $0x228] sm:$0xff] }
  0x18   :  { %6824 = vst [vmem:[#allocation29_spill] sm:$0xff] %v3583_v38  ;;  %v3753_v36 = vld [vmem:[%s6798_s8 + $0x238] sm:$0xff]  ;;  %v3763_v37 = vld [vmem:[%s6798_s8 + $0x248] sm:$0xff] }
  0x19   :  { %6825 = vst [vmem:[#allocation30_spill] sm:$0xff] %v3588_v39  ;;  %v3773_v38 = vld [vmem:[%s6798_s8 + $0x258] sm:$0xff]  ;;  %v3783_v39 = vld [vmem:[%s6798_s8 + $0x268] sm:$0xff] }
  0x1a   :  { %6826 = vst [vmem:[#allocation31_spill] sm:$0xff] %v3593_v40  ;;  %v3793_v40 = vld [vmem:[%s6798_s8 + $0x278] sm:$0xff] }
  0x1b   :  { %6827 = vst [vmem:[#allocation32_spill] sm:$0xff] %v3598_v41  ;;  %v3803_v41 = vld [vmem:[%s6798_s8 + $0x288] sm:$0xff]  ;;  %v3893_v1 = vld [vmem:[%s6798_s8 + $0x318] sm:$0xff] }
  0x1c   :  { %6828 = vst [vmem:[#allocation33_spill] sm:$0xff] %v3603_v42  ;;  %v3813_v42 = vld [vmem:[%s6798_s8 + $0x298] sm:$0xff] }
  0x1d   :  { %6829 = vst [vmem:[#allocation34_spill] sm:$0xff] %v3608_v43  ;;  %v3823_v43 = vld [vmem:[%s6798_s8 + $0x2a8] sm:$0xff] }
  0x1e   :  { %6830 = vst [vmem:[#allocation35_spill] sm:$0xff] %v3613_v44  ;;  %v3833_v44 = vld [vmem:[%s6798_s8 + $0x2b8] sm:$0xff] }
  0x1f   :  { %6831 = vst [vmem:[#allocation36_spill] sm:$0xff] %v3618_v45  ;;  %v3843_v45 = vld [vmem:[%s6798_s8 + $0x2c8] sm:$0xff] }
  0x20   :  { %6832 = vst [vmem:[#allocation37_spill] sm:$0xff] %v3623_v46  ;;  %v3858_v46 = vld [vmem:[%s6798_s8 + $0x2e0] sm:$0xff] }
  0x21   :  { %6833 = vst [vmem:[#allocation38_spill] sm:$0xff] %v3628_v47  ;;  %v3868_v47 = vld [vmem:[%s6798_s8 + $0x2f0] sm:$0xff] }
  0x22   :  { %6834 = vst [vmem:[#allocation39_spill] sm:$0xff] %v3633_v48  ;;  %v3883_v48 = vld [vmem:[%s6798_s8 + $0x308] sm:$0xff] }
  0x23   :  { %6835 = vst [vmem:[#allocation40_spill] sm:$0xff] %v3638_v49  ;;  %v3718_v49 = vld [vmem:[%s6798_s8 + $0x200] sm:$0xff] }
  0x24   :  { %6836 = vst [vmem:[#allocation41_spill] sm:$0xff] %v3643_v50  ;;  %v3728_v50 = vld [vmem:[%s6798_s8 + $0x210] sm:$0xff] }
  0x25   :  { %6837 = vst [vmem:[#allocation42_spill] sm:$0xff] %v3648_v51  ;;  %v3738_v51 = vld [vmem:[%s6798_s8 + $0x220] sm:$0xff] }
  0x26   :  { %6838 = vst [vmem:[#allocation43_spill] sm:$0xff] %v3653_v52  ;;  %v3748_v52 = vld [vmem:[%s6798_s8 + $0x230] sm:$0xff] }
  0x27   :  { %6839 = vst [vmem:[#allocation44_spill] sm:$0xff] %v3658_v53  ;;  %v3758_v53 = vld [vmem:[%s6798_s8 + $0x240] sm:$0xff] }
  0x28   :  { %6840 = vst [vmem:[#allocation45_spill] sm:$0xff] %v3663_v54  ;;  %v3768_v54 = vld [vmem:[%s6798_s8 + $0x250] sm:$0xff] }
  0x29   :  { %6841 = vst [vmem:[#allocation46_spill] sm:$0xff] %v3668_v55  ;;  %v3778_v55 = vld [vmem:[%s6798_s8 + $0x260] sm:$0xff] }
  0x2a   :  { %6842 = vst [vmem:[#allocation47_spill] sm:$0xff] %v3673_v56  ;;  %v3788_v56 = vld [vmem:[%s6798_s8 + $0x270] sm:$0xff] }
  0x2b   :  { %6843 = vst [vmem:[#allocation48_spill] sm:$0xff] %v3678_v57  ;;  %v3798_v57 = vld [vmem:[%s6798_s8 + $0x280] sm:$0xff] }
  0x2c   :  { %6844 = vst [vmem:[#allocation49_spill] sm:$0xff] %v3683_v58  ;;  %v3808_v58 = vld [vmem:[%s6798_s8 + $0x290] sm:$0xff] }
  0x2d   :  { %6845 = vst [vmem:[#allocation50_spill] sm:$0xff] %v3688_v59  ;;  %v3818_v59 = vld [vmem:[%s6798_s8 + $0x2a0] sm:$0xff] }
  0x2e   :  { %6846 = vst [vmem:[#allocation51_spill] sm:$0xff] %v3693_v60  ;;  %v3828_v60 = vld [vmem:[%s6798_s8 + $0x2b0] sm:$0xff] }
  0x2f   :  { %6847 = vst [vmem:[#allocation52_spill] sm:$0xff] %v3698_v61  ;;  %v3838_v61 = vld [vmem:[%s6798_s8 + $0x2c0] sm:$0xff] }
  0x30   :  { %6848 = vst [vmem:[#allocation53_spill] sm:$0xff] %v3703_v62  ;;  %v3853_v62 = vld [vmem:[%s6798_s8 + $0x2d8] sm:$0xff] }
  0x31   :  { %6849 = vst [vmem:[#allocation54_spill] sm:$0xff] %v3708_v63  ;;  %v3863_v63 = vld [vmem:[%s6798_s8 + $0x2e8] sm:$0xff] }
  0x32   :  { %6850 = vst [vmem:[#allocation55_spill] sm:$0xff] %v3713_v0  ;;  %v3878_v0 = vld [vmem:[%s6798_s8 + $0x300] sm:$0xff] }
  0x33   :  { %6851 = vst [vmem:[#allocation56_spill] sm:$0xff] %v3718_v49  ;;  %v3873_v49 = vld [vmem:[%s6798_s8 + $0x2f8] sm:$0xff] }
  0x34   :  { %6852 = vst [vmem:[#allocation57_spill] sm:$0xff] %v3723_v33 }
  0x35   :  { %6853 = vst [vmem:[#allocation58_spill] sm:$0xff] %v3728_v50 }
  0x36   :  { %6854 = vst [vmem:[#allocation59_spill] sm:$0xff] %v3733_v34 }
  0x37   :  { %6855 = vst [vmem:[#allocation60_spill] sm:$0xff] %v3738_v51 }
  0x38   :  { %6856 = vst [vmem:[#allocation61_spill] sm:$0xff] %v3743_v35 }
  0x39   :  { %6857 = vst [vmem:[#allocation62_spill] sm:$0xff] %v3748_v52 }
  0x3a   :  { %6858 = vst [vmem:[#allocation63_spill] sm:$0xff] %v3753_v36 }
  0x3b   :  { %6859 = vst [vmem:[#allocation64_spill] sm:$0xff] %v3798_v57  ;;  %v3848_v57 = vld [vmem:[%s6798_s8 + $0x2d0] sm:$0xff] }
  0x3c   :  { %6860 = vst [vmem:[#allocation65_spill] sm:$0xff] %v3803_v41  ;;  %v3898_v41 = vld [vmem:[%s6798_s8 + $0x320] sm:$0xff] }
  0x3d   :  { %6861 = vst [vmem:[#allocation66_spill] sm:$0xff] %v3808_v58 }
  0x3e   :  { %6862 = vst [vmem:[#allocation67_spill] sm:$0xff] %v3813_v42 }
  0x3f   :  { %6863 = vst [vmem:[#allocation68_spill] sm:$0xff] %v3818_v59 }
  0x40   :  { %6864 = vst [vmem:[#allocation69_spill] sm:$0xff] %v3823_v43 }
  0x41   :  { %6865 = vst [vmem:[#allocation70_spill] sm:$0xff] %v3828_v60 }
  0x42   :  { %6866 = vst [vmem:[#allocation71_spill] sm:$0xff] %v3833_v44 }
  0x43   :  { %6867 = vst [vmem:[#allocation72_spill] sm:$0xff] %v3878_v0  ;;  %v3903_v0 = vld [vmem:[%s6798_s8 + $0x328] sm:$0xff] }
  0x44   :  { %6868 = vst [vmem:[#allocation73_spill] sm:$0xff] %v3883_v48  ;;  %v3908_v48 = vld [vmem:[%s6798_s8 + $0x330] sm:$0xff] }
  0x45   :  { %6869 = vst [vmem:[#allocation74_spill] sm:$0xff] %v3888_v17  ;;  %v3913_v17 = vld [vmem:[%s6798_s8 + $0x338] sm:$0xff] }
  0x46   :  { %6870 = vst [vmem:[#allocation75_spill] sm:$0xff] %v3893_v1  ;;  %v3918_v1 = vld [vmem:[%s6798_s8 + $0x340] sm:$0xff] }
  0x47   :  { %6871 = vst [vmem:[#allocation76_spill] sm:$0xff] %v3898_v41  ;;  %v3923_v41 = vld [vmem:[%s6798_s8 + $0x348] sm:$0xff] }
  0x48   :  { %6872 = vst [vmem:[#allocation77_spill] sm:$0xff] %v3903_v0  ;;  %v3928_v0 = vld [vmem:[%s6798_s8 + $0x350] sm:$0xff] }
  0x49   :  { %6873 = vst [vmem:[#allocation78_spill] sm:$0xff] %v3908_v48  ;;  %v3933_v48 = vld [vmem:[%s6798_s8 + $0x358] sm:$0xff] }
  0x4a   :  { %6874 = vst [vmem:[#allocation79_spill] sm:$0xff] %v3913_v17  ;;  %v3938_v17 = vld [vmem:[%s6798_s8 + $0x360] sm:$0xff] }
  0x4b   :  { %6875 = vst [vmem:[#allocation80_spill] sm:$0xff] %v3918_v1  ;;  %v3943_v1 = vld [vmem:[%s6798_s8 + $0x368] sm:$0xff] }
  0x4c   :  { %6876 = vst [vmem:[#allocation81_spill] sm:$0xff] %v3923_v41  ;;  %v3948_v41 = vld [vmem:[%s6798_s8 + $0x370] sm:$0xff] }
  0x4d   :  { %6877 = vst [vmem:[#allocation82_spill] sm:$0xff] %v3928_v0  ;;  %v3953_v0 = vld [vmem:[%s6798_s8 + $0x378] sm:$0xff] }
  0x4e   :  { %6878 = vst [vmem:[#allocation83_spill] sm:$0xff] %v3933_v48  ;;  %v3958_v48 = vld [vmem:[%s6798_s8 + $0x380] sm:$0xff] }
  0x4f   :  { %6879 = vst [vmem:[#allocation84_spill] sm:$0xff] %v3938_v17  ;;  %v3963_v17 = vld [vmem:[%s6798_s8 + $0x388] sm:$0xff] }
  0x50   :  { %6880 = vst [vmem:[#allocation85_spill] sm:$0xff] %v3943_v1  ;;  %v3968_v1 = vld [vmem:[%s6798_s8 + $0x390] sm:$0xff] }
  0x51   :  { %6881 = vst [vmem:[#allocation86_spill] sm:$0xff] %v3948_v41  ;;  %v3973_v41 = vld [vmem:[%s6798_s8 + $0x398] sm:$0xff] }
  0x52   :  { %6882 = vst [vmem:[#allocation87_spill] sm:$0xff] %v3953_v0  ;;  %v3978_v0 = vld [vmem:[%s6798_s8 + $0x3a0] sm:$0xff] }
  0x53   :  { %6883 = vst [vmem:[#allocation88_spill] sm:$0xff] %v3958_v48  ;;  %v3983_v48 = vld [vmem:[%s6798_s8 + $0x3a8] sm:$0xff] }
  0x54   :  { %6884 = vst [vmem:[#allocation89_spill] sm:$0xff] %v3963_v17  ;;  %v3988_v17 = vld [vmem:[%s6798_s8 + $0x3b0] sm:$0xff] }
  0x55   :  { %6885 = vst [vmem:[#allocation90_spill] sm:$0xff] %v3968_v1  ;;  %v3993_v1 = vld [vmem:[%s6798_s8 + $0x3b8] sm:$0xff] }
  0x56   :  { %6886 = vst [vmem:[#allocation91_spill] sm:$0xff] %v3973_v41  ;;  %v3998_v41 = vld [vmem:[%s6798_s8 + $0x3c0] sm:$0xff] }
  0x57   :  { %6887 = vst [vmem:[#allocation92_spill] sm:$0xff] %v3978_v0  ;;  %v4003_v0 = vld [vmem:[%s6798_s8 + $0x3c8] sm:$0xff] }
  0x58   :  { %6888 = vst [vmem:[#allocation93_spill] sm:$0xff] %v3983_v48  ;;  %v4008_v48 = vld [vmem:[%s6798_s8 + $0x3d0] sm:$0xff] }
  0x59   :  { %6889 = vst [vmem:[#allocation94_spill] sm:$0xff] %v3988_v17  ;;  %v4013_v17 = vld [vmem:[%s6798_s8 + $0x3d8] sm:$0xff] }
  0x5a   :  { %6890 = vst [vmem:[#allocation95_spill] sm:$0xff] %v3993_v1  ;;  %v4018_v1 = vld [vmem:[%s6798_s8 + $0x3e0] sm:$0xff] }
  0x5b   :  { %6891 = vst [vmem:[#allocation96_spill] sm:$0xff] %v3998_v41  ;;  %v4023_v41 = vld [vmem:[%s6798_s8 + $0x3e8] sm:$0xff] }
  0x5c   :  { %6892 = vst [vmem:[#allocation97_spill] sm:$0xff] %v4003_v0  ;;  %v4028_v0 = vld [vmem:[%s6798_s8 + $0x3f0] sm:$0xff] }
  0x5d   :  { %6893 = vst [vmem:[#allocation98_spill] sm:$0xff] %v4008_v48  ;;  %v4033_v48 = vld [vmem:[%s6798_s8 + $0x3f8] sm:$0xff] }
  0x5e   :  { %6894 = vst [vmem:[#allocation99_spill] sm:$0xff] %v4013_v17  ;;  %v4038_v17 = vld [vmem:[%s6798_s8 + $0x400] sm:$0xff] }
  0x5f   :  { %6895 = vst [vmem:[#allocation100_spill] sm:$0xff] %v4018_v1  ;;  %v4043_v1 = vld [vmem:[%s6798_s8 + $0x408] sm:$0xff] }
  0x60   :  { %6896 = vst [vmem:[#allocation101_spill] sm:$0xff] %v4023_v41  ;;  %v4048_v41 = vld [vmem:[%s6798_s8 + $0x410] sm:$0xff] }
  0x61   :  { %6897 = vst [vmem:[#allocation102_spill] sm:$0xff] %v4028_v0  ;;  %v4053_v0 = vld [vmem:[%s6798_s8 + $0x418] sm:$0xff] }
  0x62   :  { %6898 = vst [vmem:[#allocation103_spill] sm:$0xff] %v4033_v48  ;;  %v4058_v48 = vld [vmem:[%s6798_s8 + $0x420] sm:$0xff] }
  0x63   :  { %6899 = vst [vmem:[#allocation104_spill] sm:$0xff] %v4038_v17  ;;  %v4063_v17 = vld [vmem:[%s6798_s8 + $0x428] sm:$0xff] }
  0x64   :  { %6900 = vst [vmem:[#allocation105_spill] sm:$0xff] %v4043_v1  ;;  %v4068_v1 = vld [vmem:[%s6798_s8 + $0x430] sm:$0xff] }
  0x65   :  { %6901 = vst [vmem:[#allocation106_spill] sm:$0xff] %v4048_v41  ;;  %v4073_v41 = vld [vmem:[%s6798_s8 + $0x438] sm:$0xff] }
  0x66   :  { %6902 = vst [vmem:[#allocation107_spill] sm:$0xff] %v4053_v0  ;;  %v4078_v0 = vld [vmem:[%s6798_s8 + $0x440] sm:$0xff] }
  0x67   :  { %6903 = vst [vmem:[#allocation108_spill] sm:$0xff] %v4058_v48  ;;  %v4083_v48 = vld [vmem:[%s6798_s8 + $0x448] sm:$0xff] }
  0x68   :  { %6904 = vst [vmem:[#allocation109_spill] sm:$0xff] %v4063_v17  ;;  %v4088_v17 = vld [vmem:[%s6798_s8 + $0x450] sm:$0xff] }
  0x69   :  { %6905 = vst [vmem:[#allocation110_spill] sm:$0xff] %v4068_v1  ;;  %v4093_v1 = vld [vmem:[%s6798_s8 + $0x458] sm:$0xff] }
  0x6a   :  { %6906 = vst [vmem:[#allocation111_spill] sm:$0xff] %v4073_v41  ;;  %v4098_v41 = vld [vmem:[%s6798_s8 + $0x460] sm:$0xff] }
  0x6b   :  { %6907 = vst [vmem:[#allocation112_spill] sm:$0xff] %v4078_v0  ;;  %v4103_v0 = vld [vmem:[%s6798_s8 + $0x468] sm:$0xff] }
  0x6c   :  { %6908 = vst [vmem:[#allocation113_spill] sm:$0xff] %v4083_v48  ;;  %v4108_v48 = vld [vmem:[%s6798_s8 + $0x470] sm:$0xff] }
  0x6d   :  { %6909 = vst [vmem:[#allocation114_spill] sm:$0xff] %v4088_v17  ;;  %v4113_v17 = vld [vmem:[%s6798_s8 + $0x478] sm:$0xff] }
  0x6e   :  { %6910 = vst [vmem:[#allocation115_spill] sm:$0xff] %v4093_v1  ;;  %v4118_v1 = vld [vmem:[%s6798_s8 + $0x480] sm:$0xff] }
  0x6f   :  { %6911 = vst [vmem:[#allocation116_spill] sm:$0xff] %v4098_v41  ;;  %v4123_v41 = vld [vmem:[%s6798_s8 + $0x488] sm:$0xff] }
  0x70   :  { %6912 = vst [vmem:[#allocation117_spill] sm:$0xff] %v4103_v0  ;;  %v4128_v0 = vld [vmem:[%s6798_s8 + $0x490] sm:$0xff] }
  0x71   :  { %6913 = vst [vmem:[#allocation118_spill] sm:$0xff] %v4108_v48  ;;  %v4133_v48 = vld [vmem:[%s6798_s8 + $0x498] sm:$0xff] }
  0x72   :  { %6914 = vst [vmem:[#allocation119_spill] sm:$0xff] %v4113_v17  ;;  %v4138_v17 = vld [vmem:[%s6798_s8 + $0x4a0] sm:$0xff] }
  0x73   :  { %6915 = vst [vmem:[#allocation120_spill] sm:$0xff] %v4118_v1  ;;  %v4143_v1 = vld [vmem:[%s6798_s8 + $0x4a8] sm:$0xff] }
  0x74   :  { %6916 = vst [vmem:[#allocation121_spill] sm:$0xff] %v4123_v41  ;;  %v4148_v41 = vld [vmem:[%s6798_s8 + $0x4b0] sm:$0xff] }
  0x75   :  { %6917 = vst [vmem:[#allocation122_spill] sm:$0xff] %v4128_v0  ;;  %v4153_v0 = vld [vmem:[%s6798_s8 + $0x4b8] sm:$0xff] }
  0x76   :  { %6918 = vst [vmem:[#allocation123_spill] sm:$0xff] %v4133_v48  ;;  %v4158_v48 = vld [vmem:[%s6798_s8 + $0x4c0] sm:$0xff] }
  0x77   :  { %6919 = vst [vmem:[#allocation124_spill] sm:$0xff] %v4138_v17  ;;  %v4163_v17 = vld [vmem:[%s6798_s8 + $0x4c8] sm:$0xff] }
  0x78   :  { %6920 = vst [vmem:[#allocation125_spill] sm:$0xff] %v4143_v1  ;;  %v4168_v1 = vld [vmem:[%s6798_s8 + $0x4d0] sm:$0xff] }
  0x79   :  { %6921 = vst [vmem:[#allocation126_spill] sm:$0xff] %v4148_v41  ;;  %v4173_v41 = vld [vmem:[%s6798_s8 + $0x4d8] sm:$0xff] }
  0x7a   :  { %6922 = vst [vmem:[#allocation127_spill] sm:$0xff] %v4153_v0  ;;  %v4178_v0 = vld [vmem:[%s6798_s8 + $0x4e0] sm:$0xff] }
  0x7b   :  { %6923 = vst [vmem:[#allocation128_spill] sm:$0xff] %v4158_v48  ;;  %v4183_v48 = vld [vmem:[%s6798_s8 + $0x4e8] sm:$0xff] }
  0x7c   :  { %6924 = vst [vmem:[#allocation129_spill] sm:$0xff] %v4163_v17  ;;  %v4188_v17 = vld [vmem:[%s6798_s8 + $0x4f0] sm:$0xff] }
  0x7d   :  { %6925 = vst [vmem:[#allocation130_spill] sm:$0xff] %v4168_v1  ;;  %v4193_v1 = vld [vmem:[%s6798_s8 + $0x4f8] sm:$0xff] }
  0x7e   :  { %6926 = vst [vmem:[#allocation131_spill] sm:$0xff] %v4173_v41  ;;  %v4198_v41 = vld [vmem:[%s6798_s8 + $0x500] sm:$0xff] }
  0x7f   :  { %6927 = vst [vmem:[#allocation132_spill] sm:$0xff] %v4178_v0  ;;  %v4203_v0 = vld [vmem:[%s6798_s8 + $0x508] sm:$0xff] }
  0x80   :  { %6928 = vst [vmem:[#allocation133_spill] sm:$0xff] %v4183_v48  ;;  %v4208_v48 = vld [vmem:[%s6798_s8 + $0x510] sm:$0xff] }
  0x81   :  { %6929 = vst [vmem:[#allocation134_spill] sm:$0xff] %v4188_v17  ;;  %v4213_v17 = vld [vmem:[%s6798_s8 + $0x518] sm:$0xff] }
  0x82   :  { %6930 = vst [vmem:[#allocation135_spill] sm:$0xff] %v4193_v1  ;;  %v4218_v1 = vld [vmem:[%s6798_s8 + $0x520] sm:$0xff] }
  0x83   :  { %6931 = vst [vmem:[#allocation136_spill] sm:$0xff] %v4198_v41  ;;  %v4223_v41 = vld [vmem:[%s6798_s8 + $0x528] sm:$0xff] }
  0x84   :  { %6932 = vst [vmem:[#allocation137_spill] sm:$0xff] %v4203_v0  ;;  %v4228_v0 = vld [vmem:[%s6798_s8 + $0x530] sm:$0xff] }
  0x85   :  { %6933 = vst [vmem:[#allocation138_spill] sm:$0xff] %v4208_v48  ;;  %v4233_v48 = vld [vmem:[%s6798_s8 + $0x538] sm:$0xff] }
  0x86   :  { %6934 = vst [vmem:[#allocation139_spill] sm:$0xff] %v4213_v17  ;;  %v4238_v17 = vld [vmem:[%s6798_s8 + $0x540] sm:$0xff] }
  0x87   :  { %6935 = vst [vmem:[#allocation140_spill] sm:$0xff] %v4218_v1  ;;  %v4243_v1 = vld [vmem:[%s6798_s8 + $0x548] sm:$0xff] }
  0x88   :  { %6936 = vst [vmem:[#allocation141_spill] sm:$0xff] %v4223_v41  ;;  %v4248_v41 = vld [vmem:[%s6798_s8 + $0x550] sm:$0xff] }
  0x89   :  { %6937 = vst [vmem:[#allocation142_spill] sm:$0xff] %v4228_v0  ;;  %v4253_v0 = vld [vmem:[%s6798_s8 + $0x558] sm:$0xff] }
  0x8a   :  { %6938 = vst [vmem:[#allocation143_spill] sm:$0xff] %v4233_v48  ;;  %v4258_v48 = vld [vmem:[%s6798_s8 + $0x560] sm:$0xff] }
  0x8b   :  { %6939 = vst [vmem:[#allocation144_spill] sm:$0xff] %v4238_v17  ;;  %v4263_v17 = vld [vmem:[%s6798_s8 + $0x568] sm:$0xff] }
  0x8c   :  { %6940 = vst [vmem:[#allocation145_spill] sm:$0xff] %v4243_v1  ;;  %v4268_v1 = vld [vmem:[%s6798_s8 + $0x570] sm:$0xff] }
  0x8d   :  { %6941 = vst [vmem:[#allocation146_spill] sm:$0xff] %v4248_v41  ;;  %v4273_v41 = vld [vmem:[%s6798_s8 + $0x578] sm:$0xff] }
  0x8e   :  { %6942 = vst [vmem:[#allocation147_spill] sm:$0xff] %v4253_v0  ;;  %v4278_v0 = vld [vmem:[%s6798_s8 + $0x580] sm:$0xff] }
  0x8f   :  { %6943 = vst [vmem:[#allocation148_spill] sm:$0xff] %v4258_v48  ;;  %v4283_v48 = vld [vmem:[%s6798_s8 + $0x588] sm:$0xff] }
  0x90   :  { %6944 = vst [vmem:[#allocation149_spill] sm:$0xff] %v4263_v17  ;;  %v4288_v17 = vld [vmem:[%s6798_s8 + $0x590] sm:$0xff] }
  0x91   :  { %6945 = vst [vmem:[#allocation150_spill] sm:$0xff] %v4268_v1  ;;  %v4293_v1 = vld [vmem:[%s6798_s8 + $0x598] sm:$0xff] }
  0x92   :  { %6946 = vst [vmem:[#allocation151_spill] sm:$0xff] %v4273_v41  ;;  %v4298_v41 = vld [vmem:[%s6798_s8 + $0x5a0] sm:$0xff] }
  0x93   :  { %6947 = vst [vmem:[#allocation152_spill] sm:$0xff] %v4278_v0  ;;  %v4303_v0 = vld [vmem:[%s6798_s8 + $0x5a8] sm:$0xff] }
  0x94   :  { %6948 = vst [vmem:[#allocation153_spill] sm:$0xff] %v4283_v48  ;;  %v4308_v48 = vld [vmem:[%s6798_s8 + $0x5b0] sm:$0xff] }
  0x95   :  { %6949 = vst [vmem:[#allocation154_spill] sm:$0xff] %v4288_v17  ;;  %v4313_v17 = vld [vmem:[%s6798_s8 + $0x5b8] sm:$0xff] }
  0x96   :  { %6950 = vst [vmem:[#allocation155_spill] sm:$0xff] %v4293_v1  ;;  %v4318_v1 = vld [vmem:[%s6798_s8 + $0x5c0] sm:$0xff] }
  0x97   :  { %6951 = vst [vmem:[#allocation156_spill] sm:$0xff] %v4298_v41  ;;  %v4323_v41 = vld [vmem:[%s6798_s8 + $0x5c8] sm:$0xff] }
  0x98   :  { %6952 = vst [vmem:[#allocation157_spill] sm:$0xff] %v4303_v0  ;;  %v4328_v0 = vld [vmem:[%s6798_s8 + $0x5d0] sm:$0xff] }
  0x99   :  { %6953 = vst [vmem:[#allocation158_spill] sm:$0xff] %v4308_v48  ;;  %v4333_v48 = vld [vmem:[%s6798_s8 + $0x5d8] sm:$0xff] }
  0x9a   :  { %6954 = vst [vmem:[#allocation159_spill] sm:$0xff] %v4313_v17  ;;  %v4338_v17 = vld [vmem:[%s6798_s8 + $0x5e0] sm:$0xff] }
  0x9b   :  { %6955 = vst [vmem:[#allocation160_spill] sm:$0xff] %v4318_v1  ;;  %v4343_v1 = vld [vmem:[%s6798_s8 + $0x5e8] sm:$0xff] }
  0x9c   :  { %6956 = vst [vmem:[#allocation161_spill] sm:$0xff] %v4323_v41  ;;  %v4348_v41 = vld [vmem:[%s6798_s8 + $0x5f0] sm:$0xff] }
  0x9d   :  { %6957 = vst [vmem:[#allocation162_spill] sm:$0xff] %v4328_v0  ;;  %v4353_v0 = vld [vmem:[%s6798_s8 + $0x5f8] sm:$0xff] }
  0x9e   :  { %6958 = vst [vmem:[#allocation163_spill] sm:$0xff] %v4333_v48  ;;  %v4358_v48 = vld [vmem:[%s6798_s8 + $0x600] sm:$0xff] }
  0x9f   :  { %6959 = vst [vmem:[#allocation164_spill] sm:$0xff] %v4338_v17  ;;  %v4363_v17 = vld [vmem:[%s6798_s8 + $0x608] sm:$0xff] }
  0xa0   :  { %6960 = vst [vmem:[#allocation165_spill] sm:$0xff] %v4343_v1  ;;  %v4368_v1 = vld [vmem:[%s6798_s8 + $0x610] sm:$0xff] }
  0xa1   :  { %6961 = vst [vmem:[#allocation166_spill] sm:$0xff] %v4348_v41  ;;  %v4373_v41 = vld [vmem:[%s6798_s8 + $0x618] sm:$0xff] }
  0xa2   :  { %6962 = vst [vmem:[#allocation167_spill] sm:$0xff] %v4353_v0  ;;  %v4378_v0 = vld [vmem:[%s6798_s8 + $0x620] sm:$0xff] }
  0xa3   :  { %6963 = vst [vmem:[#allocation168_spill] sm:$0xff] %v4358_v48  ;;  %v4383_v48 = vld [vmem:[%s6798_s8 + $0x628] sm:$0xff] }
  0xa4   :  { %6964 = vst [vmem:[#allocation169_spill] sm:$0xff] %v4363_v17  ;;  %v4388_v17 = vld [vmem:[%s6798_s8 + $0x630] sm:$0xff] }
  0xa5   :  { %6965 = vst [vmem:[#allocation170_spill] sm:$0xff] %v4368_v1  ;;  %v4393_v1 = vld [vmem:[%s6798_s8 + $0x638] sm:$0xff] }
  0xa6   :  { %6966 = vst [vmem:[#allocation171_spill] sm:$0xff] %v4373_v41  ;;  %v4398_v41 = vld [vmem:[%s6798_s8 + $0x640] sm:$0xff] }
  0xa7   :  { %6967 = vst [vmem:[#allocation172_spill] sm:$0xff] %v4378_v0  ;;  %v4403_v0 = vld [vmem:[%s6798_s8 + $0x648] sm:$0xff] }
  0xa8   :  { %6968 = vst [vmem:[#allocation173_spill] sm:$0xff] %v4383_v48  ;;  %v4408_v48 = vld [vmem:[%s6798_s8 + $0x650] sm:$0xff] }
  0xa9   :  { %6969 = vst [vmem:[#allocation174_spill] sm:$0xff] %v4388_v17  ;;  %v4413_v17 = vld [vmem:[%s6798_s8 + $0x658] sm:$0xff] }
  0xaa   :  { %6970 = vst [vmem:[#allocation175_spill] sm:$0xff] %v4393_v1  ;;  %v4418_v1 = vld [vmem:[%s6798_s8 + $0x660] sm:$0xff] }
  0xab   :  { %6971 = vst [vmem:[#allocation176_spill] sm:$0xff] %v4398_v41  ;;  %v4423_v41 = vld [vmem:[%s6798_s8 + $0x668] sm:$0xff] }
  0xac   :  { %6972 = vst [vmem:[#allocation177_spill] sm:$0xff] %v4403_v0  ;;  %v4428_v0 = vld [vmem:[%s6798_s8 + $0x670] sm:$0xff] }
  0xad   :  { %6973 = vst [vmem:[#allocation178_spill] sm:$0xff] %v4408_v48  ;;  %v4433_v48 = vld [vmem:[%s6798_s8 + $0x678] sm:$0xff] }
  0xae   :  { %6974 = vst [vmem:[#allocation179_spill] sm:$0xff] %v4413_v17  ;;  %v4438_v17 = vld [vmem:[%s6798_s8 + $0x680] sm:$0xff] }
  0xaf   :  { %6975 = vst [vmem:[#allocation180_spill] sm:$0xff] %v4418_v1  ;;  %v4443_v1 = vld [vmem:[%s6798_s8 + $0x688] sm:$0xff] }
  0xb0   :  { %6976 = vst [vmem:[#allocation181_spill] sm:$0xff] %v4423_v41  ;;  %v4448_v41 = vld [vmem:[%s6798_s8 + $0x690] sm:$0xff] }
  0xb1   :  { %6977 = vst [vmem:[#allocation182_spill] sm:$0xff] %v4428_v0  ;;  %v4453_v0 = vld [vmem:[%s6798_s8 + $0x698] sm:$0xff] }
  0xb2   :  { %6978 = vst [vmem:[#allocation183_spill] sm:$0xff] %v4433_v48  ;;  %v4458_v48 = vld [vmem:[%s6798_s8 + $0x6a0] sm:$0xff] }
  0xb3   :  { %6979 = vst [vmem:[#allocation184_spill] sm:$0xff] %v4438_v17  ;;  %v4463_v17 = vld [vmem:[%s6798_s8 + $0x6a8] sm:$0xff] }
  0xb4   :  { %6980 = vst [vmem:[#allocation185_spill] sm:$0xff] %v4443_v1  ;;  %v4468_v1 = vld [vmem:[%s6798_s8 + $0x6b0] sm:$0xff] }
  0xb5   :  { %6981 = vst [vmem:[#allocation186_spill] sm:$0xff] %v4448_v41  ;;  %v4473_v41 = vld [vmem:[%s6798_s8 + $0x6b8] sm:$0xff] }
  0xb6   :  { %6982 = vst [vmem:[#allocation187_spill] sm:$0xff] %v4453_v0  ;;  %v4478_v0 = vld [vmem:[%s6798_s8 + $0x6c0] sm:$0xff] }
  0xb7   :  { %6983 = vst [vmem:[#allocation188_spill] sm:$0xff] %v4458_v48  ;;  %v4483_v48 = vld [vmem:[%s6798_s8 + $0x6c8] sm:$0xff] }
  0xb8   :  { %6984 = vst [vmem:[#allocation189_spill] sm:$0xff] %v4463_v17  ;;  %v4488_v17 = vld [vmem:[%s6798_s8 + $0x6d0] sm:$0xff] }
  0xb9   :  { %6985 = vst [vmem:[#allocation190_spill] sm:$0xff] %v4468_v1  ;;  %v4493_v1 = vld [vmem:[%s6798_s8 + $0x6d8] sm:$0xff] }
  0xba   :  { %6986 = vst [vmem:[#allocation191_spill] sm:$0xff] %v4473_v41  ;;  %v4498_v41 = vld [vmem:[%s6798_s8 + $0x6e0] sm:$0xff] }
  0xbb   :  { %6987 = vst [vmem:[#allocation192_spill] sm:$0xff] %v4478_v0  ;;  %v4503_v0 = vld [vmem:[%s6798_s8 + $0x6e8] sm:$0xff] }
  0xbc   :  { %6988 = vst [vmem:[#allocation193_spill] sm:$0xff] %v4483_v48  ;;  %v4508_v48 = vld [vmem:[%s6798_s8 + $0x6f0] sm:$0xff] }
  0xbd   :  { %6989 = vst [vmem:[#allocation194_spill] sm:$0xff] %v4488_v17  ;;  %v4513_v17 = vld [vmem:[%s6798_s8 + $0x6f8] sm:$0xff] }
  0xbe   :  { %6990 = vst [vmem:[#allocation195_spill] sm:$0xff] %v4493_v1  ;;  %v4518_v1 = vld [vmem:[%s6798_s8 + $0x700] sm:$0xff] }
  0xbf   :  { %6991 = vst [vmem:[#allocation196_spill] sm:$0xff] %v4498_v41  ;;  %v4523_v41 = vld [vmem:[%s6798_s8 + $0x708] sm:$0xff] }
  0xc0   :  { %6992 = vst [vmem:[#allocation197_spill] sm:$0xff] %v4503_v0  ;;  %v4528_v0 = vld [vmem:[%s6798_s8 + $0x710] sm:$0xff] }
  0xc1   :  { %6993 = vst [vmem:[#allocation198_spill] sm:$0xff] %v4508_v48  ;;  %v4533_v48 = vld [vmem:[%s6798_s8 + $0x718] sm:$0xff] }
  0xc2   :  { %6994 = vst [vmem:[#allocation199_spill] sm:$0xff] %v4513_v17  ;;  %v4538_v17 = vld [vmem:[%s6798_s8 + $0x720] sm:$0xff] }
  0xc3   :  { %6995 = vst [vmem:[#allocation200_spill] sm:$0xff] %v4518_v1  ;;  %v4543_v1 = vld [vmem:[%s6798_s8 + $0x728] sm:$0xff] }
  0xc4   :  { %6996 = vst [vmem:[#allocation201_spill] sm:$0xff] %v4523_v41  ;;  %v4548_v41 = vld [vmem:[%s6798_s8 + $0x730] sm:$0xff] }
  0xc5   :  { %6997 = vst [vmem:[#allocation202_spill] sm:$0xff] %v4528_v0  ;;  %v4553_v0 = vld [vmem:[%s6798_s8 + $0x738] sm:$0xff] }
  0xc6   :  { %6998 = vst [vmem:[#allocation203_spill] sm:$0xff] %v4533_v48  ;;  %v4558_v48 = vld [vmem:[%s6798_s8 + $0x740] sm:$0xff] }
  0xc7   :  { %6999 = vst [vmem:[#allocation204_spill] sm:$0xff] %v4538_v17  ;;  %v4563_v17 = vld [vmem:[%s6798_s8 + $0x748] sm:$0xff] }
  0xc8   :  { %7000 = vst [vmem:[#allocation205_spill] sm:$0xff] %v4543_v1  ;;  %v4568_v1 = vld [vmem:[%s6798_s8 + $0x750] sm:$0xff] }
  0xc9   :  { %7001 = vst [vmem:[#allocation206_spill] sm:$0xff] %v4548_v41  ;;  %v4573_v41 = vld [vmem:[%s6798_s8 + $0x758] sm:$0xff] }
  0xca   :  { %7002 = vst [vmem:[#allocation207_spill] sm:$0xff] %v4553_v0  ;;  %v4578_v0 = vld [vmem:[%s6798_s8 + $0x760] sm:$0xff] }
  0xcb   :  { %7003 = vst [vmem:[#allocation208_spill] sm:$0xff] %v4558_v48  ;;  %v4583_v48 = vld [vmem:[%s6798_s8 + $0x768] sm:$0xff] }
  0xcc   :  { %7004 = vst [vmem:[#allocation209_spill] sm:$0xff] %v4563_v17  ;;  %v4588_v17 = vld [vmem:[%s6798_s8 + $0x770] sm:$0xff] }
  0xcd   :  { %7005 = vst [vmem:[#allocation210_spill] sm:$0xff] %v4568_v1  ;;  %v4593_v1 = vld [vmem:[%s6798_s8 + $0x778] sm:$0xff] }
  0xce   :  { %7006 = vst [vmem:[#allocation211_spill] sm:$0xff] %v4573_v41  ;;  %v4598_v41 = vld [vmem:[%s6798_s8 + $0x780] sm:$0xff] }
  0xcf   :  { %7007 = vst [vmem:[#allocation212_spill] sm:$0xff] %v4578_v0  ;;  %v4603_v0 = vld [vmem:[%s6798_s8 + $0x788] sm:$0xff] }
  0xd0   :  { %7008 = vst [vmem:[#allocation213_spill] sm:$0xff] %v4583_v48  ;;  %v4608_v48 = vld [vmem:[%s6798_s8 + $0x790] sm:$0xff] }
  0xd1   :  { %7009 = vst [vmem:[#allocation214_spill] sm:$0xff] %v4588_v17  ;;  %v4613_v17 = vld [vmem:[%s6798_s8 + $0x798] sm:$0xff] }
  0xd2   :  { %7010 = vst [vmem:[#allocation215_spill] sm:$0xff] %v4593_v1  ;;  %v4618_v1 = vld [vmem:[%s6798_s8 + $0x7a0] sm:$0xff] }
  0xd3   :  { %7011 = vst [vmem:[#allocation216_spill] sm:$0xff] %v4598_v41  ;;  %v4623_v41 = vld [vmem:[%s6798_s8 + $0x7a8] sm:$0xff] }
  0xd4   :  { %7012 = vst [vmem:[#allocation217_spill] sm:$0xff] %v4603_v0  ;;  %v4628_v0 = vld [vmem:[%s6798_s8 + $0x7b0] sm:$0xff] }
  0xd5   :  { %7013 = vst [vmem:[#allocation218_spill] sm:$0xff] %v4608_v48  ;;  %v4633_v48 = vld [vmem:[%s6798_s8 + $0x7b8] sm:$0xff] }
  0xd6   :  { %7014 = vst [vmem:[#allocation219_spill] sm:$0xff] %v4613_v17  ;;  %v4638_v17 = vld [vmem:[%s6798_s8 + $0x7c0] sm:$0xff] }
  0xd7   :  { %7015 = vst [vmem:[#allocation220_spill] sm:$0xff] %v4618_v1  ;;  %v4643_v1 = vld [vmem:[%s6798_s8 + $0x7c8] sm:$0xff] }
  0xd8   :  { %7016 = vst [vmem:[#allocation221_spill] sm:$0xff] %v4623_v41  ;;  %v4648_v41 = vld [vmem:[%s6798_s8 + $0x7d0] sm:$0xff] }
  0xd9   :  { %7017 = vst [vmem:[#allocation222_spill] sm:$0xff] %v4628_v0  ;;  %v4653_v0 = vld [vmem:[%s6798_s8 + $0x7d8] sm:$0xff] }
  0xda   :  { %7018 = vst [vmem:[#allocation223_spill] sm:$0xff] %v4633_v48  ;;  %v4658_v48 = vld [vmem:[%s6798_s8 + $0x7e0] sm:$0xff] }
  0xdb   :  { %7019 = vst [vmem:[#allocation224_spill] sm:$0xff] %v4638_v17  ;;  %v4663_v17 = vld [vmem:[%s6798_s8 + $0x7e8] sm:$0xff] }
  0xdc   :  { %7020 = vst [vmem:[#allocation225_spill] sm:$0xff] %v4643_v1  ;;  %v4668_v1 = vld [vmem:[%s6798_s8 + $0x7f0] sm:$0xff] }
  0xdd   :  { %7021 = vst [vmem:[#allocation226_spill] sm:$0xff] %v4648_v41  ;;  %v4673_v41 = vld [vmem:[%s6798_s8 + $0x7f8] sm:$0xff] }
  0xde   :  { %7022 = vst [vmem:[#allocation227_spill] sm:$0xff] %v4653_v0  ;;  %v4678_v0 = vld [vmem:[%s6798_s8 + $0x800] sm:$0xff] }
  0xdf   :  { %7023 = vst [vmem:[#allocation228_spill] sm:$0xff] %v4658_v48  ;;  %v4683_v48 = vld [vmem:[%s6798_s8 + $0x808] sm:$0xff] }
  0xe0   :  { %7024 = vst [vmem:[#allocation229_spill] sm:$0xff] %v4663_v17  ;;  %v4688_v17 = vld [vmem:[%s6798_s8 + $0x810] sm:$0xff] }
  0xe1   :  { %7025 = vst [vmem:[#allocation230_spill] sm:$0xff] %v4668_v1  ;;  %v4693_v1 = vld [vmem:[%s6798_s8 + $0x818] sm:$0xff] }
  0xe2   :  { %7026 = vst [vmem:[#allocation231_spill] sm:$0xff] %v4673_v41  ;;  %v4698_v41 = vld [vmem:[%s6798_s8 + $0x820] sm:$0xff] }
  0xe3   :  { %7027 = vst [vmem:[#allocation232_spill] sm:$0xff] %v4678_v0  ;;  %v4703_v0 = vld [vmem:[%s6798_s8 + $0x828] sm:$0xff] }
  0xe4   :  { %7028 = vst [vmem:[#allocation233_spill] sm:$0xff] %v4683_v48  ;;  %v4708_v48 = vld [vmem:[%s6798_s8 + $0x830] sm:$0xff] }
  0xe5   :  { %7029 = vst [vmem:[#allocation234_spill] sm:$0xff] %v4688_v17  ;;  %v4713_v17 = vld [vmem:[%s6798_s8 + $0x838] sm:$0xff] }
  0xe6   :  { %7030 = vst [vmem:[#allocation235_spill] sm:$0xff] %v4693_v1  ;;  %v4718_v1 = vld [vmem:[%s6798_s8 + $0x840] sm:$0xff] }
  0xe7   :  { %7031 = vst [vmem:[#allocation236_spill] sm:$0xff] %v4698_v41  ;;  %v4723_v41 = vld [vmem:[%s6798_s8 + $0x848] sm:$0xff] }
  0xe8   :  { %7032 = vst [vmem:[#allocation237_spill] sm:$0xff] %v4703_v0  ;;  %v4728_v0 = vld [vmem:[%s6798_s8 + $0x850] sm:$0xff] }
  0xe9   :  { %7033 = vst [vmem:[#allocation238_spill] sm:$0xff] %v4708_v48  ;;  %v4733_v48 = vld [vmem:[%s6798_s8 + $0x858] sm:$0xff] }
  0xea   :  { %7034 = vst [vmem:[#allocation239_spill] sm:$0xff] %v4713_v17  ;;  %v4738_v17 = vld [vmem:[%s6798_s8 + $0x860] sm:$0xff] }
  0xeb   :  { %7035 = vst [vmem:[#allocation240_spill] sm:$0xff] %v4718_v1  ;;  %v4743_v1 = vld [vmem:[%s6798_s8 + $0x868] sm:$0xff] }
  0xec   :  { %7036 = vst [vmem:[#allocation241_spill] sm:$0xff] %v4723_v41  ;;  %v4748_v41 = vld [vmem:[%s6798_s8 + $0x870] sm:$0xff] }
  0xed   :  { %7037 = vst [vmem:[#allocation242_spill] sm:$0xff] %v4728_v0  ;;  %v4753_v0 = vld [vmem:[%s6798_s8 + $0x878] sm:$0xff] }
  0xee   :  { %7038 = vst [vmem:[#allocation243_spill] sm:$0xff] %v4733_v48  ;;  %v4758_v48 = vld [vmem:[%s6798_s8 + $0x880] sm:$0xff] }
  0xef   :  { %7039 = vst [vmem:[#allocation244_spill] sm:$0xff] %v4738_v17  ;;  %v4763_v17 = vld [vmem:[%s6798_s8 + $0x888] sm:$0xff] }
  0xf0   :  { %7040 = vst [vmem:[#allocation245_spill] sm:$0xff] %v4743_v1  ;;  %v4768_v1 = vld [vmem:[%s6798_s8 + $0x890] sm:$0xff] }
  0xf1   :  { %7041 = vst [vmem:[#allocation246_spill] sm:$0xff] %v4748_v41  ;;  %v4773_v41 = vld [vmem:[%s6798_s8 + $0x898] sm:$0xff] }
  0xf2   :  { %7042 = vst [vmem:[#allocation247_spill] sm:$0xff] %v4753_v0  ;;  %v4778_v0 = vld [vmem:[%s6798_s8 + $0x8a0] sm:$0xff] }
  0xf3   :  { %7043 = vst [vmem:[#allocation248_spill] sm:$0xff] %v4758_v48  ;;  %v4783_v48 = vld [vmem:[%s6798_s8 + $0x8a8] sm:$0xff] }
  0xf4   :  { %7044 = vst [vmem:[#allocation249_spill] sm:$0xff] %v4763_v17  ;;  %v4788_v17 = vld [vmem:[%s6798_s8 + $0x8b0] sm:$0xff] }
  0xf5   :  { %7045 = vst [vmem:[#allocation250_spill] sm:$0xff] %v4768_v1  ;;  %v4793_v1 = vld [vmem:[%s6798_s8 + $0x8b8] sm:$0xff] }
  0xf6   :  { %7046 = vst [vmem:[#allocation251_spill] sm:$0xff] %v4773_v41  ;;  %v4798_v41 = vld [vmem:[%s6798_s8 + $0x8c0] sm:$0xff] }
  0xf7   :  { %7047 = vst [vmem:[#allocation252_spill] sm:$0xff] %v4778_v0  ;;  %v4803_v0 = vld [vmem:[%s6798_s8 + $0x8c8] sm:$0xff] }
  0xf8   :  { %7048 = vst [vmem:[#allocation253_spill] sm:$0xff] %v4783_v48  ;;  %v4808_v48 = vld [vmem:[%s6798_s8 + $0x8d0] sm:$0xff] }
  0xf9   :  { %7049 = vst [vmem:[#allocation254_spill] sm:$0xff] %v4788_v17  ;;  %v4813_v17 = vld [vmem:[%s6798_s8 + $0x8d8] sm:$0xff] }
  0xfa   :  { %7050 = vst [vmem:[#allocation255_spill] sm:$0xff] %v4793_v1  ;;  %v4818_v1 = vld [vmem:[%s6798_s8 + $0x8e0] sm:$0xff] }
  0xfb   :  { %7051 = vst [vmem:[#allocation256_spill] sm:$0xff] %v4798_v41  ;;  %v4823_v41 = vld [vmem:[%s6798_s8 + $0x8e8] sm:$0xff] }
  0xfc   :  { %7052 = vst [vmem:[#allocation257_spill] sm:$0xff] %v4803_v0  ;;  %v4828_v0 = vld [vmem:[%s6798_s8 + $0x8f0] sm:$0xff] }
  0xfd   :  { %7053 = vst [vmem:[#allocation258_spill] sm:$0xff] %v4808_v48  ;;  %v4833_v48 = vld [vmem:[%s6798_s8 + $0x8f8] sm:$0xff] }
  0xfe   :  { %7054 = vst [vmem:[#allocation259_spill] sm:$0xff] %v4813_v17  ;;  %v4838_v17 = vld [vmem:[%s6798_s8 + $0x900] sm:$0xff] }
  0xff   :  { %7055 = vst [vmem:[#allocation260_spill] sm:$0xff] %v4818_v1  ;;  %v4843_v1 = vld [vmem:[%s6798_s8 + $0x908] sm:$0xff] }
 0x100   :  { %7056 = vst [vmem:[#allocation261_spill] sm:$0xff] %v4823_v41  ;;  %v4848_v41 = vld [vmem:[%s6798_s8 + $0x910] sm:$0xff] }
 0x101   :  { %7057 = vst [vmem:[#allocation262_spill] sm:$0xff] %v4828_v0  ;;  %v4853_v0 = vld [vmem:[%s6798_s8 + $0x918] sm:$0xff] }
 0x102   :  { %7058 = vst [vmem:[#allocation263_spill] sm:$0xff] %v4833_v48  ;;  %v4858_v48 = vld [vmem:[%s6798_s8 + $0x920] sm:$0xff] }
 0x103   :  { %7059 = vst [vmem:[#allocation264_spill] sm:$0xff] %v4838_v17  ;;  %v4863_v17 = vld [vmem:[%s6798_s8 + $0x928] sm:$0xff] }
 0x104   :  { %7060 = vst [vmem:[#allocation265_spill] sm:$0xff] %v4843_v1  ;;  %v4868_v1 = vld [vmem:[%s6798_s8 + $0x930] sm:$0xff] }
 0x105   :  { %7061 = vst [vmem:[#allocation266_spill] sm:$0xff] %v4848_v41  ;;  %v4873_v41 = vld [vmem:[%s6798_s8 + $0x938] sm:$0xff] }
 0x106   :  { %7062 = vst [vmem:[#allocation267_spill] sm:$0xff] %v4853_v0  ;;  %v4878_v0 = vld [vmem:[%s6798_s8 + $0x940] sm:$0xff] }
 0x107   :  { %7063 = vst [vmem:[#allocation268_spill] sm:$0xff] %v4858_v48  ;;  %v4883_v48 = vld [vmem:[%s6798_s8 + $0x948] sm:$0xff] }
 0x108   :  { %7064 = vst [vmem:[#allocation269_spill] sm:$0xff] %v4863_v17  ;;  %v4888_v17 = vld [vmem:[%s6798_s8 + $0x950] sm:$0xff] }
 0x109   :  { %7065 = vst [vmem:[#allocation270_spill] sm:$0xff] %v4868_v1  ;;  %v4893_v1 = vld [vmem:[%s6798_s8 + $0x958] sm:$0xff] }
 0x10a   :  { %7066 = vst [vmem:[#allocation271_spill] sm:$0xff] %v4873_v41  ;;  %v4898_v41 = vld [vmem:[%s6798_s8 + $0x960] sm:$0xff] }
 0x10b   :  { %7067 = vst [vmem:[#allocation272_spill] sm:$0xff] %v4878_v0  ;;  %v4903_v0 = vld [vmem:[%s6798_s8 + $0x968] sm:$0xff] }
 0x10c   :  { %7068 = vst [vmem:[#allocation273_spill] sm:$0xff] %v4883_v48  ;;  %v4908_v48 = vld [vmem:[%s6798_s8 + $0x970] sm:$0xff] }
 0x10d   :  { %7069 = vst [vmem:[#allocation274_spill] sm:$0xff] %v4888_v17  ;;  %v4913_v17 = vld [vmem:[%s6798_s8 + $0x978] sm:$0xff] }
 0x10e   :  { %7070 = vst [vmem:[#allocation275_spill] sm:$0xff] %v4893_v1  ;;  %v4918_v1 = vld [vmem:[%s6798_s8 + $0x980] sm:$0xff] }
 0x10f   :  { %7071 = vst [vmem:[#allocation276_spill] sm:$0xff] %v4898_v41  ;;  %v4923_v41 = vld [vmem:[%s6798_s8 + $0x988] sm:$0xff] }
 0x110   :  { %7072 = vst [vmem:[#allocation277_spill] sm:$0xff] %v4903_v0  ;;  %v4928_v0 = vld [vmem:[%s6798_s8 + $0x990] sm:$0xff] }
 0x111   :  { %7073 = vst [vmem:[#allocation278_spill] sm:$0xff] %v4908_v48  ;;  %v4933_v48 = vld [vmem:[%s6798_s8 + $0x998] sm:$0xff] }
 0x112   :  { %7074 = vst [vmem:[#allocation279_spill] sm:$0xff] %v4913_v17  ;;  %v4938_v17 = vld [vmem:[%s6798_s8 + $0x9a0] sm:$0xff] }
 0x113   :  { %7075 = vst [vmem:[#allocation280_spill] sm:$0xff] %v4918_v1  ;;  %v4943_v1 = vld [vmem:[%s6798_s8 + $0x9a8] sm:$0xff] }
 0x114   :  { %7076 = vst [vmem:[#allocation281_spill] sm:$0xff] %v4923_v41  ;;  %v4948_v41 = vld [vmem:[%s6798_s8 + $0x9b0] sm:$0xff] }
 0x115   :  { %7077 = vst [vmem:[#allocation282_spill] sm:$0xff] %v4928_v0  ;;  %v4953_v0 = vld [vmem:[%s6798_s8 + $0x9b8] sm:$0xff] }
 0x116   :  { %7078 = vst [vmem:[#allocation283_spill] sm:$0xff] %v4933_v48  ;;  %v4958_v48 = vld [vmem:[%s6798_s8 + $0x9c0] sm:$0xff] }
 0x117   :  { %7079 = vst [vmem:[#allocation284_spill] sm:$0xff] %v4938_v17  ;;  %v4963_v17 = vld [vmem:[%s6798_s8 + $0x9c8] sm:$0xff] }
 0x118   :  { %7080 = vst [vmem:[#allocation285_spill] sm:$0xff] %v4943_v1  ;;  %v4968_v1 = vld [vmem:[%s6798_s8 + $0x9d0] sm:$0xff] }
 0x119   :  { %7081 = vst [vmem:[#allocation286_spill] sm:$0xff] %v4948_v41  ;;  %v4973_v41 = vld [vmem:[%s6798_s8 + $0x9d8] sm:$0xff] }
 0x11a   :  { %7082 = vst [vmem:[#allocation287_spill] sm:$0xff] %v4953_v0  ;;  %v4978_v0 = vld [vmem:[%s6798_s8 + $0x9e0] sm:$0xff] }
 0x11b   :  { %7083 = vst [vmem:[#allocation288_spill] sm:$0xff] %v4958_v48  ;;  %v4983_v48 = vld [vmem:[%s6798_s8 + $0x9e8] sm:$0xff] }
 0x11c   :  { %7084 = vst [vmem:[#allocation289_spill] sm:$0xff] %v4963_v17  ;;  %v4988_v17 = vld [vmem:[%s6798_s8 + $0x9f0] sm:$0xff] }
 0x11d   :  { %7085 = vst [vmem:[#allocation290_spill] sm:$0xff] %v4968_v1  ;;  %v4993_v1 = vld [vmem:[%s6798_s8 + $0x9f8] sm:$0xff] }
 0x11e   :  { %7086 = vst [vmem:[#allocation291_spill] sm:$0xff] %v4973_v41  ;;  %v4998_v41 = vld [vmem:[%s6798_s8 + $0xa00] sm:$0xff] }
 0x11f   :  { %7087 = vst [vmem:[#allocation292_spill] sm:$0xff] %v4978_v0  ;;  %v5003_v0 = vld [vmem:[%s6798_s8 + $0xa08] sm:$0xff] }
 0x120   :  { %7088 = vst [vmem:[#allocation293_spill] sm:$0xff] %v4983_v48  ;;  %v5008_v48 = vld [vmem:[%s6798_s8 + $0xa10] sm:$0xff] }
 0x121   :  { %7089 = vst [vmem:[#allocation294_spill] sm:$0xff] %v4988_v17  ;;  %v5013_v17 = vld [vmem:[%s6798_s8 + $0xa18] sm:$0xff] }
 0x122   :  { %7090 = vst [vmem:[#allocation295_spill] sm:$0xff] %v4993_v1  ;;  %v5018_v1 = vld [vmem:[%s6798_s8 + $0xa20] sm:$0xff] }
 0x123   :  { %7091 = vst [vmem:[#allocation296_spill] sm:$0xff] %v4998_v41  ;;  %v5023_v41 = vld [vmem:[%s6798_s8 + $0xa28] sm:$0xff] }
 0x124   :  { %7092 = vst [vmem:[#allocation297_spill] sm:$0xff] %v5003_v0  ;;  %v5028_v0 = vld [vmem:[%s6798_s8 + $0xa30] sm:$0xff] }
 0x125   :  { %7093 = vst [vmem:[#allocation298_spill] sm:$0xff] %v5008_v48  ;;  %v5033_v48 = vld [vmem:[%s6798_s8 + $0xa38] sm:$0xff] }
 0x126   :  { %7094 = vst [vmem:[#allocation299_spill] sm:$0xff] %v5013_v17  ;;  %v5038_v17 = vld [vmem:[%s6798_s8 + $0xa40] sm:$0xff] }
 0x127   :  { %7095 = vst [vmem:[#allocation300_spill] sm:$0xff] %v5018_v1  ;;  %v5043_v1 = vld [vmem:[%s6798_s8 + $0xa48] sm:$0xff] }
 0x128   :  { %7096 = vst [vmem:[#allocation301_spill] sm:$0xff] %v5023_v41  ;;  %v5048_v41 = vld [vmem:[%s6798_s8 + $0xa50] sm:$0xff] }
 0x129   :  { %7097 = vst [vmem:[#allocation302_spill] sm:$0xff] %v5028_v0  ;;  %v5053_v0 = vld [vmem:[%s6798_s8 + $0xa58] sm:$0xff] }
 0x12a   :  { %7098 = vst [vmem:[#allocation303_spill] sm:$0xff] %v5033_v48  ;;  %v5058_v48 = vld [vmem:[%s6798_s8 + $0xa60] sm:$0xff] }
 0x12b   :  { %7099 = vst [vmem:[#allocation304_spill] sm:$0xff] %v5038_v17  ;;  %v5063_v17 = vld [vmem:[%s6798_s8 + $0xa68] sm:$0xff] }
 0x12c   :  { %7100 = vst [vmem:[#allocation305_spill] sm:$0xff] %v5043_v1  ;;  %v5068_v1 = vld [vmem:[%s6798_s8 + $0xa70] sm:$0xff] }
 0x12d   :  { %7101 = vst [vmem:[#allocation306_spill] sm:$0xff] %v5048_v41  ;;  %v5073_v41 = vld [vmem:[%s6798_s8 + $0xa78] sm:$0xff] }
 0x12e   :  { %7102 = vst [vmem:[#allocation307_spill] sm:$0xff] %v5053_v0  ;;  %v5078_v0 = vld [vmem:[%s6798_s8 + $0xa80] sm:$0xff] }
 0x12f   :  { %7103 = vst [vmem:[#allocation308_spill] sm:$0xff] %v5058_v48  ;;  %v5083_v48 = vld [vmem:[%s6798_s8 + $0xa88] sm:$0xff] }
 0x130   :  { %7104 = vst [vmem:[#allocation309_spill] sm:$0xff] %v5063_v17  ;;  %v5088_v17 = vld [vmem:[%s6798_s8 + $0xa90] sm:$0xff] }
 0x131   :  { %7105 = vst [vmem:[#allocation310_spill] sm:$0xff] %v5068_v1  ;;  %v5093_v1 = vld [vmem:[%s6798_s8 + $0xa98] sm:$0xff] }
 0x132   :  { %7106 = vst [vmem:[#allocation311_spill] sm:$0xff] %v5073_v41  ;;  %v5098_v41 = vld [vmem:[%s6798_s8 + $0xaa0] sm:$0xff] }
 0x133   :  { %7107 = vst [vmem:[#allocation312_spill] sm:$0xff] %v5078_v0  ;;  %v5103_v0 = vld [vmem:[%s6798_s8 + $0xaa8] sm:$0xff] }
 0x134   :  { %7108 = vst [vmem:[#allocation313_spill] sm:$0xff] %v5083_v48  ;;  %v5108_v48 = vld [vmem:[%s6798_s8 + $0xab0] sm:$0xff] }
 0x135   :  { %7109 = vst [vmem:[#allocation314_spill] sm:$0xff] %v5088_v17  ;;  %v5113_v17 = vld [vmem:[%s6798_s8 + $0xab8] sm:$0xff] }
 0x136   :  { %7110 = vst [vmem:[#allocation315_spill] sm:$0xff] %v5093_v1  ;;  %v5118_v1 = vld [vmem:[%s6798_s8 + $0xac0] sm:$0xff] }
 0x137   :  { %7111 = vst [vmem:[#allocation316_spill] sm:$0xff] %v5098_v41  ;;  %v5123_v41 = vld [vmem:[%s6798_s8 + $0xac8] sm:$0xff] }
 0x138   :  { %7112 = vst [vmem:[#allocation317_spill] sm:$0xff] %v5103_v0  ;;  %v5128_v0 = vld [vmem:[%s6798_s8 + $0xad0] sm:$0xff] }
 0x139   :  { %7113 = vst [vmem:[#allocation318_spill] sm:$0xff] %v5108_v48  ;;  %v5133_v48 = vld [vmem:[%s6798_s8 + $0xad8] sm:$0xff] }
 0x13a   :  { %7114 = vst [vmem:[#allocation319_spill] sm:$0xff] %v5113_v17  ;;  %v5138_v17 = vld [vmem:[%s6798_s8 + $0xae0] sm:$0xff] }
 0x13b   :  { %7115 = vst [vmem:[#allocation320_spill] sm:$0xff] %v5118_v1  ;;  %v5143_v1 = vld [vmem:[%s6798_s8 + $0xae8] sm:$0xff] }
 0x13c   :  { %7116 = vst [vmem:[#allocation321_spill] sm:$0xff] %v5123_v41  ;;  %v5148_v41 = vld [vmem:[%s6798_s8 + $0xaf0] sm:$0xff] }
 0x13d   :  { %7117 = vst [vmem:[#allocation322_spill] sm:$0xff] %v5128_v0  ;;  %v5153_v0 = vld [vmem:[%s6798_s8 + $0xaf8] sm:$0xff] }
 0x13e   :  { %7118 = vst [vmem:[#allocation323_spill] sm:$0xff] %v5133_v48  ;;  %v5158_v48 = vld [vmem:[%s6798_s8 + $0xb00] sm:$0xff] }
 0x13f   :  { %7119 = vst [vmem:[#allocation324_spill] sm:$0xff] %v5138_v17  ;;  %v5163_v17 = vld [vmem:[%s6798_s8 + $0xb08] sm:$0xff] }
 0x140   :  { %7120 = vst [vmem:[#allocation325_spill] sm:$0xff] %v5143_v1  ;;  %v5168_v1 = vld [vmem:[%s6798_s8 + $0xb10] sm:$0xff] }
 0x141   :  { %7121 = vst [vmem:[#allocation326_spill] sm:$0xff] %v5148_v41  ;;  %v5173_v41 = vld [vmem:[%s6798_s8 + $0xb18] sm:$0xff] }
 0x142   :  { %7122 = vst [vmem:[#allocation327_spill] sm:$0xff] %v5153_v0  ;;  %v5178_v0 = vld [vmem:[%s6798_s8 + $0xb20] sm:$0xff] }
 0x143   :  { %7123 = vst [vmem:[#allocation328_spill] sm:$0xff] %v5158_v48  ;;  %v5183_v48 = vld [vmem:[%s6798_s8 + $0xb28] sm:$0xff] }
 0x144   :  { %7124 = vst [vmem:[#allocation329_spill] sm:$0xff] %v5163_v17  ;;  %v5188_v17 = vld [vmem:[%s6798_s8 + $0xb30] sm:$0xff] }
 0x145   :  { %7125 = vst [vmem:[#allocation330_spill] sm:$0xff] %v5168_v1  ;;  %v5193_v1 = vld [vmem:[%s6798_s8 + $0xb38] sm:$0xff] }
 0x146   :  { %7126 = vst [vmem:[#allocation331_spill] sm:$0xff] %v5173_v41  ;;  %v5198_v41 = vld [vmem:[%s6798_s8 + $0xb40] sm:$0xff] }
 0x147   :  { %7127 = vst [vmem:[#allocation332_spill] sm:$0xff] %v5178_v0  ;;  %v5203_v0 = vld [vmem:[%s6798_s8 + $0xb48] sm:$0xff] }
 0x148   :  { %7128 = vst [vmem:[#allocation333_spill] sm:$0xff] %v5183_v48  ;;  %v5208_v48 = vld [vmem:[%s6798_s8 + $0xb50] sm:$0xff] }
 0x149   :  { %7129 = vst [vmem:[#allocation334_spill] sm:$0xff] %v5188_v17  ;;  %v5213_v17 = vld [vmem:[%s6798_s8 + $0xb58] sm:$0xff] }
 0x14a   :  { %7130 = vst [vmem:[#allocation335_spill] sm:$0xff] %v5193_v1  ;;  %v5218_v1 = vld [vmem:[%s6798_s8 + $0xb60] sm:$0xff] }
 0x14b   :  { %7131 = vst [vmem:[#allocation336_spill] sm:$0xff] %v5198_v41  ;;  %v5223_v41 = vld [vmem:[%s6798_s8 + $0xb68] sm:$0xff] }
 0x14c   :  { %7132 = vst [vmem:[#allocation337_spill] sm:$0xff] %v5203_v0  ;;  %v5228_v0 = vld [vmem:[%s6798_s8 + $0xb70] sm:$0xff] }
 0x14d   :  { %7133 = vst [vmem:[#allocation338_spill] sm:$0xff] %v5208_v48  ;;  %v5233_v48 = vld [vmem:[%s6798_s8 + $0xb78] sm:$0xff] }
 0x14e   :  { %7134 = vst [vmem:[#allocation339_spill] sm:$0xff] %v5213_v17  ;;  %v5238_v17 = vld [vmem:[%s6798_s8 + $0xb80] sm:$0xff] }
 0x14f   :  { %7135 = vst [vmem:[#allocation340_spill] sm:$0xff] %v5218_v1  ;;  %v5243_v1 = vld [vmem:[%s6798_s8 + $0xb88] sm:$0xff] }
 0x150   :  { %7136 = vst [vmem:[#allocation341_spill] sm:$0xff] %v5223_v41  ;;  %v5248_v41 = vld [vmem:[%s6798_s8 + $0xb90] sm:$0xff] }
 0x151   :  { %7137 = vst [vmem:[#allocation342_spill] sm:$0xff] %v5228_v0  ;;  %v5253_v0 = vld [vmem:[%s6798_s8 + $0xb98] sm:$0xff] }
 0x152   :  { %7138 = vst [vmem:[#allocation343_spill] sm:$0xff] %v5233_v48  ;;  %v5258_v48 = vld [vmem:[%s6798_s8 + $0xba0] sm:$0xff] }
 0x153   :  { %7139 = vst [vmem:[#allocation344_spill] sm:$0xff] %v5238_v17  ;;  %v5263_v17 = vld [vmem:[%s6798_s8 + $0xba8] sm:$0xff] }
 0x154   :  { %7140 = vst [vmem:[#allocation345_spill] sm:$0xff] %v5243_v1  ;;  %v5268_v1 = vld [vmem:[%s6798_s8 + $0xbb0] sm:$0xff] }
 0x155   :  { %7141 = vst [vmem:[#allocation346_spill] sm:$0xff] %v5248_v41  ;;  %v5273_v41 = vld [vmem:[%s6798_s8 + $0xbb8] sm:$0xff] }
 0x156   :  { %7142 = vst [vmem:[#allocation347_spill] sm:$0xff] %v5253_v0  ;;  %v5278_v0 = vld [vmem:[%s6798_s8 + $0xbc0] sm:$0xff] }
 0x157   :  { %7143 = vst [vmem:[#allocation348_spill] sm:$0xff] %v5258_v48  ;;  %v5283_v48 = vld [vmem:[%s6798_s8 + $0xbc8] sm:$0xff] }
 0x158   :  { %7144 = vst [vmem:[#allocation349_spill] sm:$0xff] %v5263_v17  ;;  %v5288_v17 = vld [vmem:[%s6798_s8 + $0xbd0] sm:$0xff] }
 0x159   :  { %7145 = vst [vmem:[#allocation350_spill] sm:$0xff] %v5268_v1  ;;  %v5293_v1 = vld [vmem:[%s6798_s8 + $0xbd8] sm:$0xff] }
 0x15a   :  { %7146 = vst [vmem:[#allocation351_spill] sm:$0xff] %v5273_v41  ;;  %v5298_v41 = vld [vmem:[%s6798_s8 + $0xbe0] sm:$0xff] }
 0x15b   :  { %7147 = vst [vmem:[#allocation352_spill] sm:$0xff] %v5278_v0  ;;  %v5303_v0 = vld [vmem:[%s6798_s8 + $0xbe8] sm:$0xff] }
 0x15c   :  { %7148 = vst [vmem:[#allocation353_spill] sm:$0xff] %v5283_v48  ;;  %v5308_v48 = vld [vmem:[%s6798_s8 + $0xbf0] sm:$0xff] }
 0x15d   :  { %7149 = vst [vmem:[#allocation354_spill] sm:$0xff] %v5288_v17  ;;  %v5313_v17 = vld [vmem:[%s6798_s8 + $0xbf8] sm:$0xff] }
 0x15e   :  { %7150 = vst [vmem:[#allocation355_spill] sm:$0xff] %v5293_v1  ;;  %v5318_v1 = vld [vmem:[%s6798_s8 + $0xc00] sm:$0xff] }
 0x15f   :  { %7151 = vst [vmem:[#allocation356_spill] sm:$0xff] %v5298_v41  ;;  %v5323_v41 = vld [vmem:[%s6798_s8 + $0xc08] sm:$0xff] }
 0x160   :  { %7152 = vst [vmem:[#allocation357_spill] sm:$0xff] %v5303_v0  ;;  %v5328_v0 = vld [vmem:[%s6798_s8 + $0xc10] sm:$0xff] }
 0x161   :  { %7153 = vst [vmem:[#allocation358_spill] sm:$0xff] %v5308_v48  ;;  %v5333_v48 = vld [vmem:[%s6798_s8 + $0xc18] sm:$0xff] }
 0x162   :  { %7154 = vst [vmem:[#allocation359_spill] sm:$0xff] %v5313_v17  ;;  %v5338_v17 = vld [vmem:[%s6798_s8 + $0xc20] sm:$0xff] }
 0x163   :  { %7155 = vst [vmem:[#allocation360_spill] sm:$0xff] %v5318_v1  ;;  %v5343_v1 = vld [vmem:[%s6798_s8 + $0xc28] sm:$0xff] }
 0x164   :  { %7156 = vst [vmem:[#allocation361_spill] sm:$0xff] %v5323_v41  ;;  %v5348_v41 = vld [vmem:[%s6798_s8 + $0xc30] sm:$0xff] }
 0x165   :  { %7157 = vst [vmem:[#allocation362_spill] sm:$0xff] %v5328_v0  ;;  %v5353_v0 = vld [vmem:[%s6798_s8 + $0xc38] sm:$0xff] }
 0x166   :  { %7158 = vst [vmem:[#allocation363_spill] sm:$0xff] %v5333_v48  ;;  %v5358_v48 = vld [vmem:[%s6798_s8 + $0xc40] sm:$0xff] }
 0x167   :  { %7159 = vst [vmem:[#allocation364_spill] sm:$0xff] %v5338_v17  ;;  %v5363_v17 = vld [vmem:[%s6798_s8 + $0xc48] sm:$0xff] }
 0x168   :  { %7160 = vst [vmem:[#allocation365_spill] sm:$0xff] %v5343_v1  ;;  %v5368_v1 = vld [vmem:[%s6798_s8 + $0xc50] sm:$0xff] }
 0x169   :  { %7161 = vst [vmem:[#allocation366_spill] sm:$0xff] %v5348_v41  ;;  %v5373_v41 = vld [vmem:[%s6798_s8 + $0xc58] sm:$0xff] }
 0x16a   :  { %7162 = vst [vmem:[#allocation367_spill] sm:$0xff] %v5353_v0  ;;  %v5378_v0 = vld [vmem:[%s6798_s8 + $0xc60] sm:$0xff] }
 0x16b   :  { %7163 = vst [vmem:[#allocation368_spill] sm:$0xff] %v5358_v48  ;;  %v5383_v48 = vld [vmem:[%s6798_s8 + $0xc68] sm:$0xff] }
 0x16c   :  { %7164 = vst [vmem:[#allocation369_spill] sm:$0xff] %v5363_v17  ;;  %v5388_v17 = vld [vmem:[%s6798_s8 + $0xc70] sm:$0xff] }
 0x16d   :  { %7165 = vst [vmem:[#allocation370_spill] sm:$0xff] %v5368_v1  ;;  %v5393_v1 = vld [vmem:[%s6798_s8 + $0xc78] sm:$0xff] }
 0x16e   :  { %7166 = vst [vmem:[#allocation371_spill] sm:$0xff] %v5373_v41  ;;  %v5398_v41 = vld [vmem:[%s6798_s8 + $0xc80] sm:$0xff] }
 0x16f   :  { %7167 = vst [vmem:[#allocation372_spill] sm:$0xff] %v5378_v0  ;;  %v5403_v0 = vld [vmem:[%s6798_s8 + $0xc88] sm:$0xff] }
 0x170   :  { %7168 = vst [vmem:[#allocation373_spill] sm:$0xff] %v5383_v48  ;;  %v5408_v48 = vld [vmem:[%s6798_s8 + $0xc90] sm:$0xff] }
 0x171   :  { %7169 = vst [vmem:[#allocation374_spill] sm:$0xff] %v5388_v17  ;;  %v5413_v17 = vld [vmem:[%s6798_s8 + $0xc98] sm:$0xff] }
 0x172   :  { %7170 = vst [vmem:[#allocation375_spill] sm:$0xff] %v5393_v1  ;;  %v5418_v1 = vld [vmem:[%s6798_s8 + $0xca0] sm:$0xff] }
 0x173   :  { %7171 = vst [vmem:[#allocation376_spill] sm:$0xff] %v5398_v41  ;;  %v5423_v41 = vld [vmem:[%s6798_s8 + $0xca8] sm:$0xff] }
 0x174   :  { %7172 = vst [vmem:[#allocation377_spill] sm:$0xff] %v5403_v0  ;;  %v5428_v0 = vld [vmem:[%s6798_s8 + $0xcb0] sm:$0xff] }
 0x175   :  { %7173 = vst [vmem:[#allocation378_spill] sm:$0xff] %v5408_v48  ;;  %v5433_v48 = vld [vmem:[%s6798_s8 + $0xcb8] sm:$0xff] }
 0x176   :  { %7174 = vst [vmem:[#allocation379_spill] sm:$0xff] %v5413_v17  ;;  %v5438_v17 = vld [vmem:[%s6798_s8 + $0xcc0] sm:$0xff] }
 0x177   :  { %7175 = vst [vmem:[#allocation380_spill] sm:$0xff] %v5418_v1  ;;  %v5443_v1 = vld [vmem:[%s6798_s8 + $0xcc8] sm:$0xff] }
 0x178   :  { %7176 = vst [vmem:[#allocation381_spill] sm:$0xff] %v5423_v41  ;;  %v5448_v41 = vld [vmem:[%s6798_s8 + $0xcd0] sm:$0xff] }
 0x179   :  { %7177 = vst [vmem:[#allocation382_spill] sm:$0xff] %v5428_v0  ;;  %v5453_v0 = vld [vmem:[%s6798_s8 + $0xcd8] sm:$0xff] }
 0x17a   :  { %7178 = vst [vmem:[#allocation383_spill] sm:$0xff] %v5433_v48  ;;  %v5458_v48 = vld [vmem:[%s6798_s8 + $0xce0] sm:$0xff] }
 0x17b   :  { %7179 = vst [vmem:[#allocation384_spill] sm:$0xff] %v5438_v17  ;;  %v5463_v17 = vld [vmem:[%s6798_s8 + $0xce8] sm:$0xff] }
 0x17c   :  { %7180 = vst [vmem:[#allocation385_spill] sm:$0xff] %v5443_v1  ;;  %v5468_v1 = vld [vmem:[%s6798_s8 + $0xcf0] sm:$0xff] }
 0x17d   :  { %7181 = vst [vmem:[#allocation386_spill] sm:$0xff] %v5448_v41  ;;  %v5473_v41 = vld [vmem:[%s6798_s8 + $0xcf8] sm:$0xff] }
 0x17e   :  { %7182 = vst [vmem:[#allocation387_spill] sm:$0xff] %v5453_v0  ;;  %v5478_v0 = vld [vmem:[%s6798_s8 + $0xd00] sm:$0xff] }
 0x17f   :  { %7183 = vst [vmem:[#allocation388_spill] sm:$0xff] %v5458_v48  ;;  %v5483_v48 = vld [vmem:[%s6798_s8 + $0xd08] sm:$0xff] }
 0x180   :  { %7184 = vst [vmem:[#allocation389_spill] sm:$0xff] %v5463_v17  ;;  %v5488_v17 = vld [vmem:[%s6798_s8 + $0xd10] sm:$0xff] }
 0x181   :  { %7185 = vst [vmem:[#allocation390_spill] sm:$0xff] %v5468_v1  ;;  %v5493_v1 = vld [vmem:[%s6798_s8 + $0xd18] sm:$0xff] }
 0x182   :  { %7186 = vst [vmem:[#allocation391_spill] sm:$0xff] %v5473_v41  ;;  %v5498_v41 = vld [vmem:[%s6798_s8 + $0xd20] sm:$0xff] }
 0x183   :  { %7187 = vst [vmem:[#allocation392_spill] sm:$0xff] %v5478_v0  ;;  %v5503_v0 = vld [vmem:[%s6798_s8 + $0xd28] sm:$0xff] }
 0x184   :  { %7188 = vst [vmem:[#allocation393_spill] sm:$0xff] %v5483_v48  ;;  %v5508_v48 = vld [vmem:[%s6798_s8 + $0xd30] sm:$0xff] }
 0x185   :  { %7189 = vst [vmem:[#allocation394_spill] sm:$0xff] %v5488_v17  ;;  %v5513_v17 = vld [vmem:[%s6798_s8 + $0xd38] sm:$0xff] }
 0x186   :  { %7190 = vst [vmem:[#allocation395_spill] sm:$0xff] %v5493_v1  ;;  %v5518_v1 = vld [vmem:[%s6798_s8 + $0xd40] sm:$0xff] }
 0x187   :  { %7191 = vst [vmem:[#allocation396_spill] sm:$0xff] %v5498_v41  ;;  %v5523_v41 = vld [vmem:[%s6798_s8 + $0xd48] sm:$0xff] }
 0x188   :  { %7192 = vst [vmem:[#allocation397_spill] sm:$0xff] %v5503_v0  ;;  %v5528_v0 = vld [vmem:[%s6798_s8 + $0xd50] sm:$0xff] }
 0x189   :  { %7193 = vst [vmem:[#allocation398_spill] sm:$0xff] %v5508_v48  ;;  %v5533_v48 = vld [vmem:[%s6798_s8 + $0xd58] sm:$0xff] }
 0x18a   :  { %7194 = vst [vmem:[#allocation399_spill] sm:$0xff] %v5513_v17  ;;  %v5538_v17 = vld [vmem:[%s6798_s8 + $0xd60] sm:$0xff] }
 0x18b   :  { %7195 = vst [vmem:[#allocation400_spill] sm:$0xff] %v5518_v1  ;;  %v5543_v1 = vld [vmem:[%s6798_s8 + $0xd68] sm:$0xff] }
 0x18c   :  { %7196 = vst [vmem:[#allocation401_spill] sm:$0xff] %v5523_v41  ;;  %v5548_v41 = vld [vmem:[%s6798_s8 + $0xd70] sm:$0xff] }
 0x18d   :  { %7197 = vst [vmem:[#allocation402_spill] sm:$0xff] %v5528_v0  ;;  %v5553_v0 = vld [vmem:[%s6798_s8 + $0xd78] sm:$0xff] }
 0x18e   :  { %7198 = vst [vmem:[#allocation403_spill] sm:$0xff] %v5533_v48  ;;  %v5558_v48 = vld [vmem:[%s6798_s8 + $0xd80] sm:$0xff] }
 0x18f   :  { %7199 = vst [vmem:[#allocation404_spill] sm:$0xff] %v5538_v17  ;;  %v5563_v17 = vld [vmem:[%s6798_s8 + $0xd88] sm:$0xff] }
 0x190   :  { %7200 = vst [vmem:[#allocation405_spill] sm:$0xff] %v5543_v1  ;;  %v5568_v1 = vld [vmem:[%s6798_s8 + $0xd90] sm:$0xff] }
 0x191   :  { %7201 = vst [vmem:[#allocation406_spill] sm:$0xff] %v5548_v41  ;;  %v5573_v41 = vld [vmem:[%s6798_s8 + $0xd98] sm:$0xff] }
 0x192   :  { %7202 = vst [vmem:[#allocation407_spill] sm:$0xff] %v5553_v0  ;;  %v5578_v0 = vld [vmem:[%s6798_s8 + $0xda0] sm:$0xff] }
 0x193   :  { %7203 = vst [vmem:[#allocation408_spill] sm:$0xff] %v5558_v48  ;;  %v5583_v48 = vld [vmem:[%s6798_s8 + $0xda8] sm:$0xff] }
 0x194   :  { %7204 = vst [vmem:[#allocation409_spill] sm:$0xff] %v5563_v17  ;;  %v5588_v17 = vld [vmem:[%s6798_s8 + $0xdb0] sm:$0xff] }
 0x195   :  { %7205 = vst [vmem:[#allocation410_spill] sm:$0xff] %v5568_v1  ;;  %v5593_v1 = vld [vmem:[%s6798_s8 + $0xdb8] sm:$0xff] }
 0x196   :  { %7206 = vst [vmem:[#allocation411_spill] sm:$0xff] %v5573_v41  ;;  %v5598_v41 = vld [vmem:[%s6798_s8 + $0xdc0] sm:$0xff] }
 0x197   :  { %7207 = vst [vmem:[#allocation412_spill] sm:$0xff] %v5578_v0  ;;  %v5603_v0 = vld [vmem:[%s6798_s8 + $0xdc8] sm:$0xff] }
 0x198   :  { %7208 = vst [vmem:[#allocation413_spill] sm:$0xff] %v5583_v48  ;;  %v5608_v48 = vld [vmem:[%s6798_s8 + $0xdd0] sm:$0xff] }
 0x199   :  { %7209 = vst [vmem:[#allocation414_spill] sm:$0xff] %v5588_v17  ;;  %v5613_v17 = vld [vmem:[%s6798_s8 + $0xdd8] sm:$0xff] }
 0x19a   :  { %7210 = vst [vmem:[#allocation415_spill] sm:$0xff] %v5593_v1  ;;  %v5618_v1 = vld [vmem:[%s6798_s8 + $0xde0] sm:$0xff] }
 0x19b   :  { %7211 = vst [vmem:[#allocation416_spill] sm:$0xff] %v5598_v41  ;;  %v5623_v41 = vld [vmem:[%s6798_s8 + $0xde8] sm:$0xff] }
 0x19c   :  { %7212 = vst [vmem:[#allocation417_spill] sm:$0xff] %v5603_v0  ;;  %v5628_v0 = vld [vmem:[%s6798_s8 + $0xdf0] sm:$0xff] }
 0x19d   :  { %7213 = vst [vmem:[#allocation418_spill] sm:$0xff] %v5608_v48  ;;  %v5633_v48 = vld [vmem:[%s6798_s8 + $0xdf8] sm:$0xff] }
 0x19e   :  { %7214 = vst [vmem:[#allocation419_spill] sm:$0xff] %v5613_v17  ;;  %v5638_v17 = vld [vmem:[%s6798_s8 + $0xe00] sm:$0xff] }
 0x19f   :  { %7215 = vst [vmem:[#allocation420_spill] sm:$0xff] %v5618_v1  ;;  %v5643_v1 = vld [vmem:[%s6798_s8 + $0xe08] sm:$0xff] }
 0x1a0   :  { %7216 = vst [vmem:[#allocation421_spill] sm:$0xff] %v5623_v41  ;;  %v5648_v41 = vld [vmem:[%s6798_s8 + $0xe10] sm:$0xff] }
 0x1a1   :  { %7217 = vst [vmem:[#allocation422_spill] sm:$0xff] %v5628_v0  ;;  %v5653_v0 = vld [vmem:[%s6798_s8 + $0xe18] sm:$0xff] }
 0x1a2   :  { %7218 = vst [vmem:[#allocation423_spill] sm:$0xff] %v5633_v48  ;;  %v5658_v48 = vld [vmem:[%s6798_s8 + $0xe20] sm:$0xff] }
 0x1a3   :  { %7219 = vst [vmem:[#allocation424_spill] sm:$0xff] %v5638_v17  ;;  %v5663_v17 = vld [vmem:[%s6798_s8 + $0xe28] sm:$0xff] }
 0x1a4   :  { %7220 = vst [vmem:[#allocation425_spill] sm:$0xff] %v5643_v1  ;;  %v5668_v1 = vld [vmem:[%s6798_s8 + $0xe30] sm:$0xff] }
 0x1a5   :  { %7221 = vst [vmem:[#allocation426_spill] sm:$0xff] %v5648_v41  ;;  %v5673_v41 = vld [vmem:[%s6798_s8 + $0xe38] sm:$0xff] }
 0x1a6   :  { %7222 = vst [vmem:[#allocation427_spill] sm:$0xff] %v5653_v0  ;;  %v5678_v0 = vld [vmem:[%s6798_s8 + $0xe40] sm:$0xff] }
 0x1a7   :  { %7223 = vst [vmem:[#allocation428_spill] sm:$0xff] %v5658_v48  ;;  %v5683_v48 = vld [vmem:[%s6798_s8 + $0xe48] sm:$0xff] }
 0x1a8   :  { %7224 = vst [vmem:[#allocation429_spill] sm:$0xff] %v5663_v17  ;;  %v5688_v17 = vld [vmem:[%s6798_s8 + $0xe50] sm:$0xff] }
 0x1a9   :  { %7225 = vst [vmem:[#allocation430_spill] sm:$0xff] %v5668_v1  ;;  %v5693_v1 = vld [vmem:[%s6798_s8 + $0xe58] sm:$0xff] }
 0x1aa   :  { %7226 = vst [vmem:[#allocation431_spill] sm:$0xff] %v5673_v41  ;;  %v5698_v41 = vld [vmem:[%s6798_s8 + $0xe60] sm:$0xff] }
 0x1ab   :  { %7227 = vst [vmem:[#allocation432_spill] sm:$0xff] %v5678_v0  ;;  %v5703_v0 = vld [vmem:[%s6798_s8 + $0xe68] sm:$0xff] }
 0x1ac   :  { %7228 = vst [vmem:[#allocation433_spill] sm:$0xff] %v5683_v48  ;;  %v5708_v48 = vld [vmem:[%s6798_s8 + $0xe70] sm:$0xff] }
 0x1ad   :  { %7229 = vst [vmem:[#allocation434_spill] sm:$0xff] %v5688_v17  ;;  %v5713_v17 = vld [vmem:[%s6798_s8 + $0xe78] sm:$0xff] }
 0x1ae   :  { %7230 = vst [vmem:[#allocation435_spill] sm:$0xff] %v5693_v1  ;;  %v5718_v1 = vld [vmem:[%s6798_s8 + $0xe80] sm:$0xff] }
 0x1af   :  { %7231 = vst [vmem:[#allocation436_spill] sm:$0xff] %v5698_v41  ;;  %v5723_v41 = vld [vmem:[%s6798_s8 + $0xe88] sm:$0xff] }
 0x1b0   :  { %7232 = vst [vmem:[#allocation437_spill] sm:$0xff] %v5703_v0  ;;  %v5728_v0 = vld [vmem:[%s6798_s8 + $0xe90] sm:$0xff] }
 0x1b1   :  { %7233 = vst [vmem:[#allocation438_spill] sm:$0xff] %v5708_v48  ;;  %v5733_v48 = vld [vmem:[%s6798_s8 + $0xe98] sm:$0xff] }
 0x1b2   :  { %7234 = vst [vmem:[#allocation439_spill] sm:$0xff] %v5713_v17  ;;  %v5738_v17 = vld [vmem:[%s6798_s8 + $0xea0] sm:$0xff] }
 0x1b3   :  { %7235 = vst [vmem:[#allocation440_spill] sm:$0xff] %v5718_v1  ;;  %v5743_v1 = vld [vmem:[%s6798_s8 + $0xea8] sm:$0xff] }
 0x1b4   :  { %7236 = vst [vmem:[#allocation441_spill] sm:$0xff] %v5723_v41  ;;  %v5748_v41 = vld [vmem:[%s6798_s8 + $0xeb0] sm:$0xff] }
 0x1b5   :  { %7237 = vst [vmem:[#allocation442_spill] sm:$0xff] %v5728_v0  ;;  %v5753_v0 = vld [vmem:[%s6798_s8 + $0xeb8] sm:$0xff] }
 0x1b6   :  { %7238 = vst [vmem:[#allocation443_spill] sm:$0xff] %v5733_v48  ;;  %v5758_v48 = vld [vmem:[%s6798_s8 + $0xec0] sm:$0xff] }
 0x1b7   :  { %7239 = vst [vmem:[#allocation444_spill] sm:$0xff] %v5738_v17  ;;  %v5763_v17 = vld [vmem:[%s6798_s8 + $0xec8] sm:$0xff] }
 0x1b8   :  { %7240 = vst [vmem:[#allocation445_spill] sm:$0xff] %v5743_v1  ;;  %v5768_v1 = vld [vmem:[%s6798_s8 + $0xed0] sm:$0xff] }
 0x1b9   :  { %7241 = vst [vmem:[#allocation446_spill] sm:$0xff] %v5748_v41  ;;  %v5773_v41 = vld [vmem:[%s6798_s8 + $0xed8] sm:$0xff] }
 0x1ba   :  { %7242 = vst [vmem:[#allocation447_spill] sm:$0xff] %v5753_v0  ;;  %v5778_v0 = vld [vmem:[%s6798_s8 + $0xee0] sm:$0xff] }
 0x1bb   :  { %7243 = vst [vmem:[#allocation448_spill] sm:$0xff] %v5758_v48  ;;  %v5783_v48 = vld [vmem:[%s6798_s8 + $0xee8] sm:$0xff] }
 0x1bc   :  { %7244 = vst [vmem:[#allocation449_spill] sm:$0xff] %v5763_v17  ;;  %v5788_v17 = vld [vmem:[%s6798_s8 + $0xef0] sm:$0xff] }
 0x1bd   :  { %7245 = vst [vmem:[#allocation450_spill] sm:$0xff] %v5768_v1  ;;  %v5793_v1 = vld [vmem:[%s6798_s8 + $0xef8] sm:$0xff] }
 0x1be   :  { %7246 = vst [vmem:[#allocation451_spill] sm:$0xff] %v5773_v41 }
 0x1bf   :  { %7247 = vst [vmem:[#allocation452_spill] sm:$0xff] %v5778_v0 }
 0x1c0   :  { %7248 = vst [vmem:[#allocation453_spill] sm:$0xff] %v5783_v48 }
 0x1c1   :  { %7249 = vst [vmem:[#allocation454_spill] sm:$0xff] %v5788_v17 }
 0x1c2   :  { %7250 = vst [vmem:[#allocation455_spill] sm:$0xff] %v5793_v1 }
 0x1c3   :  { %1016 = vsyncadd [#allocation4], 61440  ;;  %v1036_v41 = vld [vmem:[%s6790_s0] sm:$0xff]  ;;  %v1037_v0 = vld [vmem:[%s6790_s0 + $0x8] sm:$0xff]  ;;  %v3323_v48 = vmov 0   ;;  %vm1052_vm0 = vcmask 64512  }
 0x1c4   :  { %3315 = vset.pattern.permute.xlu0 %v3323_v48  ;;  %1074 = vmatpush.msra.mxu0 %v1036_v41  ;;  %v1038_v17 = vld [vmem:[%s6790_s0 + $0x10] sm:$0xff]  ;;  %v1039_v1 = vld [vmem:[%s6790_s0 + $0x18] sm:$0xff]  ;;  %v1041_v33 = vld [vmem:[%s6792_s2 + $0x8] sm:$0xff]  ;;  %vm1187_vm1 = vcmask 261120   ;;  %s3326_s14 = smov 127   ;;  %vm1531_vm5 = vcmask 1040384  }
 0x1c5   :  { %1097 = vmatpush.msra.mxu1 %v1037_v0  ;;  %1120 = vmatpush.msra.mxu2 %v1038_v17  ;;  %v1034_v18 = vld [vmem:[%s6791_s1] sm:$0xff]  ;;  %v1035_v41 = vld [vmem:[%s6791_s1 + $0x8] sm:$0xff]  ;;  %v1165_v0 = vld [vmem:[%s6794_s4 + $0x10] sm:$0xff] }
 0x1c6   :  { %1143 = vmatpush.msra.mxu3 %v1039_v1  ;;  %1049 = vperm.xlu0 %3315, %v1041_v33   ;;  %v1040_v17 = vld [vmem:[%s6792_s2] sm:$0xff]  ;;  %v1299_v33 = vld [vmem:[%s6796_s6 + $0x8] sm:$0xff]  ;;  %v1269_v20 = vld [vmem:[%s6795_s5 + $0x18] sm:$0xff] }
 0x1c7   :  { %3260 = vmatmul.msk.f32.vlgmr.msra.gmra.mxu0 %vm1052_vm0, %v1034_v18  ;;  %3262 = vmatmul.msk.f32.vlgmr.msra.gmra.mxu1 %vm1052_vm0, %v1034_v18  ;;  %v1163_v1 = vld [vmem:[%s6794_s4] sm:$0xff] }
 0x1c8   :  { %3264 = vmatmul.msk.f32.vlgmr.msra.gmra.mxu2 %vm1052_vm0, %v1034_v18  ;;  %3266 = vmatmul.msk.f32.vlgmr.msra.gmra.mxu3 %vm1052_vm0, %v1034_v18  ;;  %v1267_v18 = vld [vmem:[%s6795_s5 + $0x8] sm:$0xff] }
 0x1c9   :  { %3316 = vset.pattern.permute.xlu1 %v3323_v48  ;;  %3317 = vset.pattern.permute.xlu2 %v3323_v48  ;;  %v1166_v48 = vld [vmem:[%s6794_s4 + $0x18] sm:$0xff] }
 0x1ca   :  { %1184 = vperm.xlu1 %3316, %v1166_v48   ;;  %v1164_v48 = vld [vmem:[%s6794_s4 + $0x8] sm:$0xff] }
 0x1cb   :  { %1174 = vperm.xlu2 %3317, %v1164_v48  }
 0x1ce   :  { %1044 = vperm.xlu0 %3315, %v1040_v17   ;;  %v1268_v17 = vld [vmem:[%s6795_s5 + $0x10] sm:$0xff] }
 0x1cf   :  { %3261 = vmatmul.msk.f32.gmra.mxu0 %vm1052_vm0, %v1035_v41  ;;  %3263 = vmatmul.msk.f32.gmra.mxu1 %vm1052_vm0, %v1035_v41 }
 0x1d0   :  { %3265 = vmatmul.msk.f32.gmra.mxu2 %vm1052_vm0, %v1035_v41  ;;  %3267 = vmatmul.msk.f32.gmra.mxu3 %vm1052_vm0, %v1035_v41  ;;  %v1300_v41 = vld [vmem:[%s6796_s6 + $0x10] sm:$0xff] }
 0x1d2   :  { %1179 = vperm.xlu1 %3316, %v1165_v0   ;;  %v1298_v0 = vld [vmem:[%s6796_s6] sm:$0xff] }
 0x1d3   :  { %1287 = vperm.xlu2 %3317, %v1269_v20  }
 0x1d6   :  { %1169 = vperm.xlu0 %3315, %v1163_v1  }
 0x1da   :  { %1282 = vperm.xlu1 %3316, %v1268_v17  }
 0x1de   :  { %1277 = vperm.xlu0 %3315, %v1267_v18  }
 0x1e2   :  { %1314 = vperm.xlu1 %3316, %v1300_v41  }
 0x1e6   :  { %1309 = vperm.xlu0 %3315, %v1299_v33  }
 0x1ea   :  { %1304 = vperm.xlu1 %3316, %v1298_v0  }
 0x238   :  { %v1050_v1 = vpop.permute.xlu0 %1049 }
 0x240   :  { %v1045_v2 = vpop.permute.xlu0 %1044 }
 0x244   :  { %v1076_v18 = vpop.f32.mrf.mxu0  ;;  %v1099_v33 = vpop.f32.mrf.mxu1 }
 0x245   :  { %v1100_v3 = vadd.f32 %v1099_v33, %v1045_v2  ;;  %v1077_v4 = vadd.f32 %v1076_v18, %v1045_v2  ;;  %v1175_v18 = vpop.permute.xlu2 %1174 }
 0x247   :  { %v1152_v59 = vmax.f32 %v1100_v3, 0.0  ;;  %v1151_v43 = vmax.f32 %v1077_v4, 0.0  ;;  %v1301_v3 = vld [vmem:[%s6796_s6 + $0x18] sm:$0xff] }
 0x248   :  { %1319 = vperm.xlu2 %3317, %v1301_v3  }
 0x24b   :  { %v1122_v17 = vpop.f32.mrf.mxu2  ;;  %v1145_v58 = vpop.f32.mrf.mxu3 }
 0x24c   :  { %v1079_v50 = vpop.f32.mrf.mxu0  ;;  %v1102_v19 = vpop.f32.mrf.mxu1  ;;  %v1146_v21 = vadd.f32 %v1145_v58, %v1045_v2  ;;  %v1123_v20 = vadd.f32 %v1122_v17, %v1045_v2  ;;  %v1160_v58 = vld [vmem:[%s6793_s3 + $0x8] sm:$0xff]  ;;  %v1161_v2 = vld [vmem:[%s6793_s3 + $0x10] sm:$0xff] }
 0x24d   :  { %v1103_v42 = vadd.f32 %v1102_v19, %v1050_v1  ;;  %v1080_v41 = vadd.f32 %v1079_v50, %v1050_v1  ;;  %v1159_v19 = vld [vmem:[%s6793_s3] sm:$0xff] }
 0x24f   :  { %v1156_v34 = vmax.f32 %v1103_v42, 0.0  ;;  %v1155_v51 = vmax.f32 %v1080_v41, 0.0 }
 0x251   :  { %1212 = vmatpush.msrb.mxu0 %v1156_v34  ;;  %v1154_v34 = vmax.f32 %v1146_v21, 0.0  ;;  %v1162_v21 = vld [vmem:[%s6793_s3 + $0x18] sm:$0xff]  ;;  %s3324_s3 = smov 64  }
 0x253   :  { %v1125_v48 = vpop.f32.mrf.mxu2  ;;  %v1148_v0 = vpop.f32.mrf.mxu3  ;;  %1213 = vmatpush.msrb.mxu0 %v1152_v59 }
 0x254   :  { %v1149_v5 = vadd.f32 %v1148_v0, %v1050_v1  ;;  %v1126_v42 = vadd.f32 %v1125_v48, %v1050_v1  ;;  %v1170_v59 = vpop.permute.xlu0 %1169 }
 0x255   :  { %1214 = vmatpush.msrb.mxu0 %v1155_v51  ;;  %v1153_v51 = vmax.f32 %v1123_v20, 0.0 }
 0x256   :  { %v1158_v50 = vmax.f32 %v1149_v5, 0.0  ;;  %v1157_v4 = vmax.f32 %v1126_v42, 0.0  ;;  %v1266_v5 = vld [vmem:[%s6795_s5] sm:$0xff]  ;;  %v1288_v42 = vpop.permute.xlu2 %1287  ;;  %s3325_s5 = smov 1  }
 0x257   :  { %1215 = vmatpush.msrb.mxu0 %v1151_v43  ;;  %1272 = vperm.xlu2 %3317, %v1266_v5   ;;  %v1185_v43 = vpop.permute.xlu1 %1184 }
 0x258   :  { %1241 = vmatpush.msrb.mxu1 %v1158_v50  ;;  %3268 = vmatmul.msk.f32.vlgmr.msrb.gmra.mxu0 %vm1187_vm1, %v1159_v19 }
 0x259   :  { %2629 = vmatpush.msra.mxu0 %v3473_v16 }
 0x25a   :  { %1242 = vmatpush.msrb.mxu1 %v1154_v34 }
 0x25c   :  { %1243 = vmatpush.msrb.mxu1 %v1157_v4  ;;  %v1278_v17 = vpop.permute.xlu0 %1277 }
 0x25e   :  { %1244 = vmatpush.msrb.mxu1 %v1153_v51 }
 0x25f   :  { %3272 = vmatmul.msk.f32.vlgmr.msrb.gmra.mxu1 %vm1187_vm1, %v1159_v19  ;;  %v1180_v33 = vpop.permute.xlu1 %1179 }
 0x260   :  { %3269 = vmatmul.msk.f32.gmra.mxu0 %vm1187_vm1, %v1160_v58  ;;  %2649 = vmatpush.msra.mxu1 %v3553_v32 }
 0x264   :  { %v1310_v20 = vpop.permute.xlu0 %1309 }
 0x267   :  { %3273 = vmatmul.msk.f32.gmra.mxu1 %vm1187_vm1, %v1160_v58  ;;  %v1283_v50 = vpop.permute.xlu1 %1282 }
 0x268   :  { %3270 = vmatmul.msk.f32.gmra.mxu0 %vm1187_vm1, %v1161_v2 }
 0x26f   :  { %3274 = vmatmul.msk.f32.gmra.mxu1 %vm1187_vm1, %v1161_v2  ;;  %v1315_v35 = vpop.permute.xlu1 %1314 }
 0x270   :  { %3271 = vmatmul.msk.f32.gmra.mxu0 %vm1187_vm1, %v1162_v21 }
 0x277   :  { %3275 = vmatmul.msk.f32.gmra.mxu1 %vm1187_vm1, %v1162_v21 }
 0x2a2   :  { %v1320_v21 = vpop.permute.xlu2 %1319 }
 0x2d5   :  { %v1217_v1 = vpop.f32.mrf.mxu0 }
 0x2dc   :  { %v1246_v41 = vpop.f32.mrf.mxu1 }
 0x2dd   :  { %v1220_v48 = vpop.f32.mrf.mxu0 }
 0x2de   :  { %v1221_v0 = vadd.f32 %v1220_v48, %v1175_v18 }
 0x2e0   :  { %v1260_v19 = vmax.f32 %v1221_v0, 0.0 }
 0x2e2   :  { %v1292_v3 = vmul.f32 %v1278_v17, %v1260_v19 }
 0x2e4   :  { %v1249_v34 = vpop.f32.mrf.mxu1  ;;  %v5883_v4 = vadd.f32 %v1310_v20, %v1292_v3  ;;  %v1218_v3 = vadd.f32 %v1217_v1, %v1170_v59 }
 0x2e5   :  { %v1223_v51 = vpop.f32.mrf.mxu0 }
 0x2e6   :  { %v1224_v58 = vadd.f32 %v1223_v51, %v1180_v33  ;;  %1332 = vrot.lane.b32.xlu1 %v5883_v4, %s3324_s3  ;;  %v1258_v44 = vmax.f32 %v1218_v3, 0.0 }
 0x2e8   :  { %v1262_v5 = vmax.f32 %v1224_v58, 0.0  ;;  %v1273_v58 = vpop.permute.xlu2 %1272 }
 0x2ea   :  { %v1294_v2 = vmul.f32 %v1283_v50, %v1262_v5 }
 0x2ec   :  { %v1252_v22 = vpop.f32.mrf.mxu1  ;;  %v1326_v48 = vadd.f32 %v1315_v35, %v1294_v2  ;;  %v1250_v2 = vadd.f32 %v1249_v34, %v1175_v18 }
 0x2ed   :  { %v1253_v0 = vadd.f32 %v1252_v22, %v1180_v33  ;;  %v1226_v6 = vpop.f32.mrf.mxu0  ;;  %v1247_v22 = vadd.f32 %v1246_v41, %v1170_v59 }
 0x2ee   :  { %v1227_v60 = vadd.f32 %v1226_v6, %v1185_v43  ;;  %1334 = vrot.lane.b32.xlu0 %v1326_v48, %s3324_s3  ;;  %v1290_v6 = vmul.f32 %v1273_v58, %v1258_v44  ;;  %v1017_v44 = vlaneseq }
 0x2ef   :  { %v1263_v19 = vmax.f32 %v1253_v0, 0.0  ;;  %v1305_v0 = vpop.permute.xlu1 %1304  ;;  %v1259_v1 = vmax.f32 %v1247_v22, 0.0 }
 0x2f0   :  { %v1264_v52 = vmax.f32 %v1227_v60, 0.0  ;;  %v5894_v59 = vand.u32 127, %v1017_v44  ;;  %v1397_v44 = vld [vmem:[%s6797_s7 + $0x8] sm:$0xff] }
 0x2f1   :  { %v1295_v23 = vmul.f32 %v1283_v50, %v1263_v19  ;;  %v1322_v50 = vadd.f32 %v1305_v0, %v1290_v6 }
 0x2f2   :  { %v1296_v51 = vmul.f32 %v1288_v42, %v1264_v52  ;;  %v1261_v52 = vmax.f32 %v1250_v2, 0.0  ;;  %vm1019_vm2 = vcmp.lt.s32.totalorder %v5894_v59, 64  ;;  %v1024_v2 = vand.u32 63, %v5894_v59 }
 0x2f3   :  { %v1327_v7 = vadd.f32 %v1315_v35, %v1295_v23  ;;  %v1291_v23 = vmul.f32 %v1273_v58, %v1259_v1 }
 0x2f4   :  { %v1255_v36 = vpop.f32.mrf.mxu1  ;;  %v1328_v24 = vadd.f32 %v1320_v21, %v1296_v51  ;;  %v1293_v35 = vmul.f32 %v1278_v17, %v1261_v52  ;;  %vm5915_vm3 = vcmp.ne.s32.totalorder %v1024_v2, 0  ;;  %vm3310_vm4 = vcmp.ne.s32.totalorder %v1024_v2, 63 }
 0x2f5   :  { %v1256_v5 = vadd.f32 %v1255_v36, %v1185_v43  ;;  %1342 = vrot.lane.b32.xlu1 %v1327_v7, %s3324_s3  ;;  %v1323_v36 = vadd.f32 %v1305_v0, %v1291_v23  ;;  %v1396_v23 = vld [vmem:[%s6797_s7] sm:$0xff] }
 0x2f6   :  { %1336 = vrot.lane.b32.xlu2 %v1328_v24, %s3324_s3  ;;  %v1325_v43 = vadd.f32 %v1310_v20, %v1293_v35 }
 0x2f7   :  { %v1265_v33 = vmax.f32 %v1256_v5, 0.0 }
 0x2f9   :  { %v1297_v8 = vmul.f32 %v1288_v42, %v1265_v33 }
 0x2fb   :  { %v1329_v60 = vadd.f32 %v1320_v21, %v1297_v8 }
 0x2fd   :  { %1344 = vrot.lane.b32.xlu0 %v1329_v60, %s3324_s3 }
 0x2fe   :  { %1330 = vrot.lane.b32.xlu2 %v1322_v50, %s3324_s3 }
 0x305   :  { %1338 = vrot.lane.b32.xlu0 %v1323_v36, %s3324_s3 }
 0x306   :  { %1340 = vrot.lane.b32.xlu2 %v1325_v43, %s3324_s3 }
 0x350   :  { %v1337_v8 = vpop.permute.xlu2 %1336 }
 0x351   :  { %v1355_v18 = vsel %vm1019_vm2, %v1337_v8, %v1329_v60  ;;  %v1398_v8 = vld [vmem:[%s6797_s7 + $0x10] sm:$0xff] }
 0x352   :  { %1436 = vmatpush.msrb.mxu2 %v1355_v18 }
 0x358   :  { %v1333_v41 = vpop.permute.xlu1 %1332  ;;  %v1331_v42 = vpop.permute.xlu2 %1330 }
 0x359   :  { %v1353_v17 = vsel %vm1019_vm2, %v1333_v41, %v1325_v43  ;;  %v1352_v20 = vsel %vm1019_vm2, %v1331_v42, %v1323_v36  ;;  %v1399_v41 = vld [vmem:[%s6797_s7 + $0x18] sm:$0xff]  ;;  %v1400_v42 = vld [vmem:[%s6797_s7 + $0x20] sm:$0xff] }
 0x35a   :  { %1372 = vrot.lane.b32.xlu0 %v1353_v17, %s3325_s5  ;;  %1370 = vrot.lane.b32.xlu1 %v1352_v20, %s3325_s5 }
 0x360   :  { %v1335_v34 = vpop.permute.xlu0 %1334  ;;  %v1341_v21 = vpop.permute.xlu2 %1340 }
 0x361   :  { %v1354_v19 = vsel %vm1019_vm2, %v1335_v34, %v1327_v7  ;;  %v1349_v3 = vsel %vm1019_vm2, %v5883_v4, %v1341_v21  ;;  %v1403_v34 = vld [vmem:[%s6797_s7 + $0x38] sm:$0xff]  ;;  %v1404_v21 = vld [vmem:[%s6797_s7 + $0x40] sm:$0xff] }
 0x362   :  { %1374 = vrot.lane.b32.xlu2 %v1354_v19, %s3325_s5  ;;  %1437 = vmatpush.msrb.mxu2 %v1354_v19  ;;  %v1405_v19 = vld [vmem:[%s6797_s7 + $0x48] sm:$0xff] }
 0x363   :  { %1376 = vrot.lane.b32.xlu1 %v1355_v18, %s3325_s5  ;;  %1358 = vrot.lane.b32.xlu0 %v1349_v3, %s3325_s5 }
 0x364   :  { %1438 = vmatpush.msrb.mxu2 %v1353_v17  ;;  %v1401_v17 = vld [vmem:[%s6797_s7 + $0x28] sm:$0xff] }
 0x366   :  { %1439 = vmatpush.msrb.mxu2 %v1352_v20  ;;  %v1402_v20 = vld [vmem:[%s6797_s7 + $0x30] sm:$0xff] }
 0x367   :  { %v1343_v51 = vpop.permute.xlu1 %1342 }
 0x368   :  { %v1350_v58 = vsel %vm1019_vm2, %v1326_v48, %v1343_v51  ;;  %v1407_v51 = vld [vmem:[%s6797_s7 + $0x58] sm:$0xff] }
 0x36a   :  { %1386 = vrot.lane.b32.xlu2 %v1350_v58, %s3326_s14 }
 0x36b   :  { %1360 = vrot.lane.b32.xlu1 %v1350_v58, %s3325_s5 }
 0x36f   :  { %v1345_v5 = vpop.permute.xlu0 %1344 }
 0x370   :  { %v1351_v7 = vsel %vm1019_vm2, %v1328_v24, %v1345_v5  ;;  %v1409_v5 = vld [vmem:[%s6797_s7 + $0x68] sm:$0xff] }
 0x371   :  { %1440 = vmatpush.msrb.mxu2 %v1351_v7  ;;  %1388 = vrot.lane.b32.xlu0 %v1351_v7, %s3326_s14 }
 0x372   :  { %1362 = vrot.lane.b32.xlu2 %v1351_v7, %s3325_s5  ;;  %v1410_v7 = vld [vmem:[%s6797_s7 + $0x70] sm:$0xf] }
 0x373   :  { %1441 = vmatpush.msrb.mxu2 %v1350_v58  ;;  %1384 = vrot.lane.b32.xlu1 %v1349_v3, %s3326_s14  ;;  %v1408_v58 = vld [vmem:[%s6797_s7 + $0x60] sm:$0xff] }
 0x375   :  { %1442 = vmatpush.msrb.mxu2 %v1349_v3  ;;  %v1406_v3 = vld [vmem:[%s6797_s7 + $0x50] sm:$0xff] }
 0x377   :  { %v1339_v4 = vpop.permute.xlu0 %1338 }
 0x378   :  { %v1348_v22 = vsel %vm1019_vm2, %v1322_v50, %v1339_v4  ;;  %v1411_v4 = vld [vmem:[%s6797_s7 + $0x78] sm:$0xf] }
 0x379   :  { %1382 = vrot.lane.b32.xlu0 %v1348_v22, %s3326_s14  ;;  %1443 = vmatpush.msrb.mxu2 %v1348_v22 }
 0x37a   :  { %1356 = vrot.lane.b32.xlu2 %v1348_v22, %s3325_s5 }
 0x3bc   :  { %v1375_v48 = vpop.permute.xlu2 %1374 }
 0x3c4   :  { %v1387_v6 = vpop.permute.xlu2 %1386 }
 0x3cc   :  { %v1371_v33 = vpop.permute.xlu1 %1370  ;;  %v1373_v0 = vpop.permute.xlu0 %1372 }
 0x3cd   :  { %v1363_v60 = vpop.permute.xlu2 %1362 }
 0x3d5   :  { %v1377_v1 = vpop.permute.xlu1 %1376  ;;  %v1359_v50 = vpop.permute.xlu0 %1358 }
 0x3d6   :  { %3277 = vmatpush.msk.msrb.mxu2 %vm5915_vm3, %v1377_v1  ;;  %v1357_v35 = vpop.permute.xlu2 %1356 }
 0x3d8   :  { %3279 = vmatpush.msk.msrb.mxu2 %vm5915_vm3, %v1375_v48 }
 0x3da   :  { %3281 = vmatpush.msk.msrb.mxu2 %vm5915_vm3, %v1373_v0 }
 0x3dc   :  { %3283 = vmatpush.msk.msrb.mxu2 %vm5915_vm3, %v1371_v33 }
 0x3dd   :  { %v1361_v52 = vpop.permute.xlu1 %1360 }
 0x3de   :  { %3285 = vmatpush.msk.msrb.mxu2 %vm5915_vm3, %v1363_v60 }
 0x3e0   :  { %3287 = vmatpush.msk.msrb.mxu2 %vm5915_vm3, %v1361_v52 }
 0x3e2   :  { %3289 = vmatpush.msk.msrb.mxu2 %vm5915_vm3, %v1359_v50 }
 0x3e3   :  { %v1389_v36 = vpop.permute.xlu0 %1388 }
 0x3e4   :  { %3291 = vmatpush.msk.msrb.mxu2 %vm5915_vm3, %v1357_v35  ;;  %3293 = vmatpush.msk.msrb.mxu3 %vm3310_vm4, %v1389_v36 }
 0x3e5   :  { %1452 = vmatmul.f32.vlgmr.msrb.gmra.mxu2 %v1396_v23  ;;  %v1385_v43 = vpop.permute.xlu1 %1384 }
 0x3e6   :  { %3295 = vmatpush.msk.msrb.mxu3 %vm3310_vm4, %v1387_v6 }
 0x3e8   :  { %3297 = vmatpush.msk.msrb.mxu3 %vm3310_vm4, %v1385_v43 }
 0x3eb   :  { %v1383_v18 = vpop.permute.xlu0 %1382 }
 0x3ec   :  { %3299 = vmatpush.msk.msrb.mxu3 %vm3310_vm4, %v1383_v18 }
 0x3ed   :  { %3300 = vmatmul.msk.f32.vlgmr.msrb.gmra.mxu3 %vm1187_vm1, %v1397_v44  ;;  %1455 = vmatmul.f32.gmra.mxu2 %v1398_v8 }
 0x3f5   :  { %3301 = vmatmul.msk.f32.gmra.mxu3 %vm1187_vm1, %v1399_v41  ;;  %1458 = vmatmul.f32.gmra.mxu2 %v1400_v42 }
 0x3fd   :  { %3302 = vmatmul.msk.f32.gmra.mxu3 %vm1187_vm1, %v1401_v17  ;;  %1461 = vmatmul.f32.gmra.mxu2 %v1402_v20 }
 0x405   :  { %3303 = vmatmul.msk.f32.gmra.mxu3 %vm1187_vm1, %v1403_v34  ;;  %1464 = vmatmul.f32.gmra.mxu2 %v1404_v21 }
 0x40d   :  { %3304 = vmatmul.msk.f32.gmra.mxu3 %vm1187_vm1, %v1405_v19  ;;  %1467 = vmatmul.f32.gmra.mxu2 %v1406_v3 }
 0x415   :  { %3305 = vmatmul.msk.f32.gmra.mxu3 %vm1187_vm1, %v1407_v51  ;;  %1470 = vmatmul.f32.gmra.mxu2 %v1408_v58 }
 0x41d   :  { %3306 = vmatmul.msk.f32.gmra.mxu3 %vm1187_vm1, %v1409_v5  ;;  %1473 = vmatmul.f32.gmra.mxu2 %v1410_v7 }
 0x425   :  { %3307 = vmatmul.msk.f32.gmra.mxu3 %vm1187_vm1, %v1411_v4 }
 0x468   :  { %v1453_v22 = vpop.f32.mrf.mxu2 }
 0x470   :  { %v1494_v48 = vpop.f32.mrf.mxu3  ;;  %v1456_v6 = vpop.f32.mrf.mxu2 }
 0x471   :  { %v5991_v33 = vadd.f32 %v1494_v48, %v1453_v22 }
 0x473   :  { %1518 = vrot.lane.b32.xlu1 %v5991_v33, %s3324_s3  ;;  %v1553_v2 = vrot.slane %v5991_v33, 4  ;;  %v1534_v0 = vrot.slane %v5991_v33, 2  ;;  %v1572_v60 = vrot.slane %v5991_v33, 6 }
 0x475   :  { %1555 = vrot.lane.b32.xlu0 %v1553_v2, %s3324_s3  ;;  %1536 = vrot.lane.b32.xlu2 %v1534_v0, %s3324_s3 }
 0x478   :  { %v1497_v24 = vpop.f32.mrf.mxu3  ;;  %v1459_v50 = vpop.f32.mrf.mxu2 }
 0x479   :  { %v5999_v1 = vadd.f32 %v1497_v24, %v1456_v6 }
 0x47b   :  { %1574 = vrot.lane.b32.xlu1 %v1572_v60, %s3324_s3  ;;  %v1606_v52 = vrot.slane %v5999_v1, 2  ;;  %v1625_v36 = vrot.slane %v5999_v1, 4  ;;  %v1644_v44 = vrot.slane %v5999_v1, 6 }
 0x47d   :  { %1591 = vrot.lane.b32.xlu2 %v5999_v1, %s3324_s3  ;;  %1608 = vrot.lane.b32.xlu0 %v1606_v52, %s3324_s3 }
 0x480   :  { %v1500_v23 = vpop.f32.mrf.mxu3  ;;  %v1462_v43 = vpop.f32.mrf.mxu2 }
 0x481   :  { %v6007_v35 = vadd.f32 %v1500_v23, %v1459_v50 }
 0x483   :  { %1627 = vrot.lane.b32.xlu1 %v1625_v36, %s3324_s3  ;;  %v1678_v18 = vrot.slane %v6007_v35, 2  ;;  %v1716_v41 = vrot.slane %v6007_v35, 6  ;;  %v1697_v42 = vrot.slane %v6007_v35, 4 }
 0x485   :  { %1646 = vrot.lane.b32.xlu2 %v1644_v44, %s3324_s3  ;;  %1663 = vrot.lane.b32.xlu0 %v6007_v35, %s3324_s3 }
 0x488   :  { %v1503_v8 = vpop.f32.mrf.mxu3  ;;  %v1465_v17 = vpop.f32.mrf.mxu2 }
 0x489   :  { %v6021_v20 = vadd.f32 %v1503_v8, %v1462_v43 }
 0x48b   :  { %1680 = vrot.lane.b32.xlu1 %v1678_v18, %s3324_s3  ;;  %v1769_v21 = vrot.slane %v6021_v20, 4  ;;  %v1750_v19 = vrot.slane %v6021_v20, 2  ;;  %v1788_v5 = vrot.slane %v6021_v20, 6 }
 0x48d   :  { %1718 = vrot.lane.b32.xlu0 %v1716_v41, %s3324_s3  ;;  %1699 = vrot.lane.b32.xlu2 %v1697_v42, %s3324_s3  ;;  %v1542_v41 = vrot.slane %v5991_v33, 3 }
 0x490   :  { %v1506_v34 = vpop.f32.mrf.mxu3  ;;  %v1468_v51 = vpop.f32.mrf.mxu2 }
 0x491   :  { %v6029_v3 = vadd.f32 %v1506_v34, %v1465_v17 }
 0x493   :  { %1735 = vrot.lane.b32.xlu1 %v6021_v20, %s3324_s3  ;;  %v1822_v7 = vrot.slane %v6029_v3, 2  ;;  %v1860_v6 = vrot.slane %v6029_v3, 6  ;;  %v1841_v0 = vrot.slane %v6029_v3, 4 }
 0x495   :  { %1771 = vrot.lane.b32.xlu0 %v1769_v21, %s3324_s3  ;;  %1752 = vrot.lane.b32.xlu2 %v1750_v19, %s3324_s3 }
 0x498   :  { %v1509_v58 = vpop.f32.mrf.mxu3  ;;  %v1471_v22 = vpop.f32.mrf.mxu2 }
 0x499   :  { %v6037_v4 = vadd.f32 %v1509_v58, %v1468_v51 }
 0x49b   :  { %1790 = vrot.lane.b32.xlu1 %v1788_v5, %s3324_s3  ;;  %v1894_v2 = vrot.slane %v6037_v4, 2  ;;  %v1932_v60 = vrot.slane %v6037_v4, 6  ;;  %v1913_v50 = vrot.slane %v6037_v4, 4  ;;  %v1598_v5 = vrot.slane %v5999_v1, 1 }
 0x49d   :  { %1807 = vrot.lane.b32.xlu0 %v6029_v3, %s3324_s3  ;;  %1824 = vrot.lane.b32.xlu2 %v1822_v7, %s3324_s3 }
 0x4a0   :  { %v1512_v48 = vpop.f32.mrf.mxu3  ;;  %v1474_v23 = vpop.f32.mrf.mxu2 }
 0x4a1   :  { %v6045_v24 = vadd.f32 %v1512_v48, %v1471_v22 }
 0x4a3   :  { %1862 = vrot.lane.b32.xlu1 %v1860_v6, %s3324_s3  ;;  %v1966_v52 = vrot.slane %v6045_v24, 2  ;;  %v2004_v44 = vrot.slane %v6045_v24, 6  ;;  %v1985_v8 = vrot.slane %v6045_v24, 4 }
 0x4a5   :  { %1843 = vrot.lane.b32.xlu0 %v1841_v0, %s3324_s3  ;;  %1896 = vrot.lane.b32.xlu2 %v1894_v2, %s3324_s3 }
 0x4a8   :  { %v1515_v36 = vpop.f32.mrf.mxu3 }
 0x4a9   :  { %v6053_v43 = vadd.f32 %v1515_v36, %v1474_v23 }
 0x4ab   :  { %1934 = vrot.lane.b32.xlu1 %v1932_v60, %s3324_s3  ;;  %v2038_v18 = vrot.slane %v6053_v43, 2  ;;  %v1652_v60 = vrot.slane %v5999_v1, 7 }
 0x4ad   :  { %1915 = vrot.lane.b32.xlu0 %v1913_v50, %s3324_s3  ;;  %1968 = vrot.lane.b32.xlu2 %v1966_v52, %s3324_s3 }
 0x4b3   :  { %2006 = vrot.lane.b32.xlu1 %v2004_v44, %s3324_s3 }
 0x4b5   :  { %1987 = vrot.lane.b32.xlu0 %v1985_v8, %s3324_s3  ;;  %2040 = vrot.lane.b32.xlu2 %v2038_v18, %s3324_s3  ;;  %v1525_v18 = vrot.slane %v5991_v33, 1 }
 0x4bb   :  { %1879 = vrot.lane.b32.xlu1 %v6037_v4, %s3324_s3 }
 0x4bd   :  { %2023 = vrot.lane.b32.xlu0 %v6053_v43, %s3324_s3  ;;  %1951 = vrot.lane.b32.xlu2 %v6045_v24, %s3324_s3 }
 0x4cf   :  { %v1537_v42 = vpop.permute.xlu2 %1536 }
 0x4d0   :  { %v1539_v17 = vrot.slane %v1537_v42, 7  ;;  %v1544_v34 = vsel %vm1019_vm2, %v1537_v42, %v1542_v41 }
 0x4d1   :  { %v1549_v51 = vrot.slane %v1544_v34, 7 }
 0x4d2   :  { %v1541_v21 = vsel %vm1019_vm2, %v5991_v33, %v1539_v17 }
 0x4d3   :  { %v1546_v19 = vrot.slane %v1541_v21, 2  ;;  %v1561_v21 = vrot.slane %v5991_v33, 5 }
 0x4d5   :  { %v1551_v58 = vsel %vm1531_vm5, %v1546_v19, %v1549_v51 }
 0x4d6   :  { %1552 = vst [vmem:[#allocation2 + $0x2] sm:$0x3] %v1551_v58  ;;  %v1705_v58 = vrot.slane %v6007_v35, 5 }
 0x4d7   :  { %v1592_v7 = vpop.permute.xlu2 %1591 }
 0x4d8   :  { %v1594_v22 = vrot.slane %v1592_v7, 1  ;;  %v1600_v48 = vsel %vm1019_vm2, %v1592_v7, %v1598_v5 }
 0x4d9   :  { %v1602_v6 = vrot.slane %v1600_v48, 7 }
 0x4da   :  { %v1596_v2 = vsel %vm1019_vm2, %v5999_v1, %v1594_v22 }
 0x4db   :  { %v1604_v0 = vsel %vm1531_vm5, %v1596_v2, %v1602_v6 }
 0x4dc   :  { %1605 = vst [vmem:[#allocation2 + $0x8] sm:$0x3] %v1604_v0 }
 0x4df   :  { %v1647_v50 = vpop.permute.xlu2 %1646 }
 0x4e0   :  { %v1649_v52 = vrot.slane %v1647_v50, 3  ;;  %v1654_v23 = vsel %vm1019_vm2, %v1647_v50, %v1652_v60 }
 0x4e1   :  { %v1659_v8 = vrot.slane %v1654_v23, 7 }
 0x4e2   :  { %v1651_v36 = vsel %vm1019_vm2, %v5999_v1, %v1649_v52 }
 0x4e3   :  { %v1656_v44 = vrot.slane %v1651_v36, 6 }
 0x4e5   :  { %v1661_v41 = vsel %vm1531_vm5, %v1656_v44, %v1659_v8  ;;  %v1519_v42 = vpop.permute.xlu1 %1518  ;;  %v1580_v8 = vrot.slane %v5991_v33, 7 }
 0x4e6   :  { %1662 = vst [vmem:[#allocation2 + $0xe] sm:$0x3] %v1661_v41  ;;  %v1521_v17 = vrot.slane %v1519_v42, 1  ;;  %v1527_v34 = vsel %vm1019_vm2, %v1519_v42, %v1525_v18 }
 0x4e7   :  { %v1529_v19 = vrot.slane %v1527_v34, 7  ;;  %v1556_v51 = vpop.permute.xlu0 %1555  ;;  %v1700_v5 = vpop.permute.xlu2 %1699 }
 0x4e8   :  { %v1523_v7 = vsel %vm1019_vm2, %v5991_v33, %v1521_v17  ;;  %v1558_v22 = vrot.slane %v1556_v51, 5  ;;  %v1563_v48 = vsel %vm1019_vm2, %v1556_v51, %v1561_v21  ;;  %v1702_v6 = vrot.slane %v1700_v5, 5 }
 0x4e9   :  { %v1532_v2 = vsel %vm1531_vm5, %v1523_v7, %v1529_v19  ;;  %v1707_v0 = vsel %vm1019_vm2, %v1700_v5, %v1705_v58  ;;  %v1568_v23 = vrot.slane %v1563_v48, 7  ;;  %v1614_v21 = vrot.slane %v5999_v1, 3 }
 0x4ea   :  { %1533 = vst [vmem:[#allocation2] sm:$0x3] %v1532_v2  ;;  %v1560_v60 = vsel %vm1019_vm2, %v5991_v33, %v1558_v22  ;;  %v1704_v50 = vsel %vm1019_vm2, %v6007_v35, %v1702_v6  ;;  %v1712_v44 = vrot.slane %v1707_v0, 7  ;;  %v1758_v51 = vrot.slane %v6021_v20, 3 }
 0x4eb   :  { %v1565_v52 = vrot.slane %v1560_v60, 4  ;;  %v1709_v36 = vrot.slane %v1704_v50, 4 }
 0x4ed   :  { %v1570_v18 = vsel %vm1531_vm5, %v1565_v52, %v1568_v23  ;;  %v1714_v41 = vsel %vm1531_vm5, %v1709_v36, %v1712_v44  ;;  %v1575_v42 = vpop.permute.xlu1 %1574 }
 0x4ee   :  { %1571 = vst [vmem:[#allocation2 + $0x4] sm:$0x3] %v1570_v18  ;;  %v1577_v17 = vrot.slane %v1575_v42, 3  ;;  %v1582_v34 = vsel %vm1019_vm2, %v1575_v42, %v1580_v8  ;;  %v1633_v8 = vrot.slane %v5999_v1, 5 }
 0x4ef   :  { %1715 = vst [vmem:[#allocation2 + $0x14] sm:$0x3] %v1714_v41  ;;  %v1609_v19 = vpop.permute.xlu0 %1608  ;;  %v1753_v58 = vpop.permute.xlu2 %1752  ;;  %v1587_v2 = vrot.slane %v1582_v34, 7 }
 0x4f0   :  { %v1579_v5 = vsel %vm1019_vm2, %v5991_v33, %v1577_v17  ;;  %v1611_v7 = vrot.slane %v1609_v19, 7  ;;  %v1616_v22 = vsel %vm1019_vm2, %v1609_v19, %v1614_v21  ;;  %v1755_v48 = vrot.slane %v1753_v58, 7 }
 0x4f1   :  { %v1584_v6 = vrot.slane %v1579_v5, 6  ;;  %v1760_v0 = vsel %vm1019_vm2, %v1753_v58, %v1758_v51  ;;  %v1621_v50 = vrot.slane %v1616_v22, 7  ;;  %v1670_v21 = vrot.slane %v6007_v35, 1 }
 0x4f2   :  { %v1613_v60 = vsel %vm1019_vm2, %v5999_v1, %v1611_v7  ;;  %v1757_v52 = vsel %vm1019_vm2, %v6021_v20, %v1755_v48  ;;  %v1765_v44 = vrot.slane %v1760_v0, 7  ;;  %v1830_v51 = vrot.slane %v6029_v3, 3 }
 0x4f3   :  { %v1589_v33 = vsel %vm1531_vm5, %v1584_v6, %v1587_v2  ;;  %v1618_v23 = vrot.slane %v1613_v60, 2  ;;  %v1762_v36 = vrot.slane %v1757_v52, 2 }
 0x4f4   :  { %1590 = vst [vmem:[#allocation2 + $0x6] sm:$0x3] %v1589_v33 }
 0x4f5   :  { %v1623_v18 = vsel %vm1531_vm5, %v1618_v23, %v1621_v50  ;;  %v1767_v41 = vsel %vm1531_vm5, %v1762_v36, %v1765_v44  ;;  %v1628_v42 = vpop.permute.xlu1 %1627  ;;  %v1686_v44 = vrot.slane %v6007_v35, 3 }
 0x4f6   :  { %1624 = vst [vmem:[#allocation2 + $0xa] sm:$0x3] %v1623_v18  ;;  %v1630_v17 = vrot.slane %v1628_v42, 5  ;;  %v1635_v34 = vsel %vm1019_vm2, %v1628_v42, %v1633_v8 }
 0x4f7   :  { %1768 = vst [vmem:[#allocation2 + $0x1a] sm:$0x3] %v1767_v41  ;;  %v1664_v19 = vpop.permute.xlu0 %1663  ;;  %v1825_v58 = vpop.permute.xlu2 %1824  ;;  %v1640_v2 = vrot.slane %v1635_v34, 7 }
 0x4f8   :  { %v1632_v5 = vsel %vm1019_vm2, %v5999_v1, %v1630_v17  ;;  %v1666_v7 = vrot.slane %v1664_v19, 1  ;;  %v1672_v22 = vsel %vm1019_vm2, %v1664_v19, %v1670_v21  ;;  %v1827_v48 = vrot.slane %v1825_v58, 7 }
 0x4f9   :  { %v1637_v6 = vrot.slane %v1632_v5, 4  ;;  %v1674_v0 = vrot.slane %v1672_v22, 7  ;;  %v1832_v60 = vsel %vm1019_vm2, %v1825_v58, %v1830_v51  ;;  %v1724_v17 = vrot.slane %v6007_v35, 7 }
 0x4fa   :  { %v1668_v50 = vsel %vm1019_vm2, %v6007_v35, %v1666_v7  ;;  %v1829_v52 = vsel %vm1019_vm2, %v6029_v3, %v1827_v48  ;;  %v1837_v36 = vrot.slane %v1832_v60, 7  ;;  %v1902_v21 = vrot.slane %v6037_v4, 3 }
 0x4fb   :  { %v1642_v1 = vsel %vm1531_vm5, %v1637_v6, %v1640_v2  ;;  %v1676_v33 = vsel %vm1531_vm5, %v1668_v50, %v1674_v0  ;;  %v1834_v23 = vrot.slane %v1829_v52, 2 }
 0x4fc   :  { %1643 = vst [vmem:[#allocation2 + $0xc] sm:$0x3] %v1642_v1 }
 0x4fd   :  { %1677 = vst [vmem:[#allocation2 + $0x10] sm:$0x3] %v1676_v33  ;;  %v1839_v8 = vsel %vm1531_vm5, %v1834_v23, %v1837_v36  ;;  %v1681_v18 = vpop.permute.xlu1 %1680  ;;  %v1742_v23 = vrot.slane %v6021_v20, 1 }
 0x4fe   :  { %1840 = vst [vmem:[#allocation2 + $0x22] sm:$0x3] %v1839_v8  ;;  %v1683_v41 = vrot.slane %v1681_v18, 7  ;;  %v1688_v42 = vsel %vm1019_vm2, %v1681_v18, %v1686_v44 }
 0x4ff   :  { %v1719_v34 = vpop.permute.xlu0 %1718  ;;  %v1897_v19 = vpop.permute.xlu2 %1896  ;;  %v1693_v48 = vrot.slane %v1688_v42, 7 }
 0x500   :  { %v1685_v51 = vsel %vm1019_vm2, %v6007_v35, %v1683_v41  ;;  %v1721_v58 = vrot.slane %v1719_v34, 3  ;;  %v1726_v5 = vsel %vm1019_vm2, %v1719_v34, %v1724_v17  ;;  %v1899_v7 = vrot.slane %v1897_v19, 7 }
 0x501   :  { %v1690_v22 = vrot.slane %v1685_v51, 2  ;;  %v1904_v6 = vsel %vm1019_vm2, %v1897_v19, %v1902_v21  ;;  %v1731_v0 = vrot.slane %v1726_v5, 7  ;;  %v1777_v41 = vrot.slane %v6021_v20, 5 }
 0x502   :  { %v1723_v2 = vsel %vm1019_vm2, %v6007_v35, %v1721_v58  ;;  %v1901_v60 = vsel %vm1019_vm2, %v6037_v4, %v1899_v7  ;;  %v1909_v33 = vrot.slane %v1904_v6, 7  ;;  %v1974_v34 = vrot.slane %v6045_v24, 3 }
 0x503   :  { %v1695_v50 = vsel %vm1531_vm5, %v1690_v22, %v1693_v48  ;;  %v1728_v52 = vrot.slane %v1723_v2, 6  ;;  %v1906_v1 = vrot.slane %v1901_v60, 2 }
 0x504   :  { %1696 = vst [vmem:[#allocation2 + $0x12] sm:$0x3] %v1695_v50 }
 0x505   :  { %v1733_v36 = vsel %vm1531_vm5, %v1728_v52, %v1731_v0  ;;  %v1911_v44 = vsel %vm1531_vm5, %v1906_v1, %v1909_v33  ;;  %v1736_v8 = vpop.permute.xlu1 %1735  ;;  %v1796_v52 = vrot.slane %v6021_v20, 7 }
 0x506   :  { %1734 = vst [vmem:[#allocation2 + $0x16] sm:$0x3] %v1733_v36  ;;  %v1738_v35 = vrot.slane %v1736_v8, 1  ;;  %v1744_v18 = vsel %vm1019_vm2, %v1736_v8, %v1742_v23  ;;  %v1814_v8 = vrot.slane %v6029_v3, 1 }
 0x507   :  { %1912 = vst [vmem:[#allocation2 + $0x2a] sm:$0x3] %v1911_v44  ;;  %v1746_v42 = vrot.slane %v1744_v18, 7  ;;  %v1772_v17 = vpop.permute.xlu0 %1771  ;;  %v1969_v21 = vpop.permute.xlu2 %1968  ;;  %v2046_v18 = vrot.slane %v6053_v43, 3 }
 0x508   :  { %v1740_v19 = vsel %vm1019_vm2, %v6021_v20, %v1738_v35  ;;  %v1774_v51 = vrot.slane %v1772_v17, 5  ;;  %v1779_v58 = vsel %vm1019_vm2, %v1772_v17, %v1777_v41  ;;  %v1971_v5 = vrot.slane %v1969_v21, 7 }
 0x509   :  { %v1748_v7 = vsel %vm1531_vm5, %v1740_v19, %v1746_v42  ;;  %v1976_v22 = vsel %vm1019_vm2, %v1969_v21, %v1974_v34  ;;  %v1784_v0 = vrot.slane %v1779_v58, 7 }
 0x50a   :  { %1749 = vst [vmem:[#allocation2 + $0x18] sm:$0x3] %v1748_v7  ;;  %v1776_v48 = vsel %vm1019_vm2, %v6021_v20, %v1774_v51  ;;  %v1973_v6 = vsel %vm1019_vm2, %v6045_v24, %v1971_v5  ;;  %v1981_v50 = vrot.slane %v1976_v22, 7 }
 0x50b   :  { %v1781_v2 = vrot.slane %v1776_v48, 4  ;;  %v1978_v60 = vrot.slane %v1973_v6, 2 }
 0x50d   :  { %v1786_v1 = vsel %vm1531_vm5, %v1781_v2, %v1784_v0  ;;  %v1983_v33 = vsel %vm1531_vm5, %v1978_v60, %v1981_v50  ;;  %v1791_v23 = vpop.permute.xlu1 %1790  ;;  %v1868_v0 = vrot.slane %v6029_v3, 7 }
 0x50e   :  { %1787 = vst [vmem:[#allocation2 + $0x1c] sm:$0x3] %v1786_v1  ;;  %v1793_v36 = vrot.slane %v1791_v23, 3  ;;  %v1798_v44 = vsel %vm1019_vm2, %v1791_v23, %v1796_v52 }
 0x50f   :  { %1984 = vst [vmem:[#allocation2 + $0x32] sm:$0x3] %v1983_v33  ;;  %v1808_v35 = vpop.permute.xlu0 %1807  ;;  %v2041_v41 = vpop.permute.xlu2 %2040  ;;  %v1803_v51 = vrot.slane %v1798_v44, 7  ;;  %v1849_v33 = vrot.slane %v6029_v3, 5 }
 0x510   :  { %v1795_v42 = vsel %vm1019_vm2, %v6021_v20, %v1793_v36  ;;  %v1810_v17 = vrot.slane %v1808_v35, 1  ;;  %v1816_v34 = vsel %vm1019_vm2, %v1808_v35, %v1814_v8  ;;  %v2043_v21 = vrot.slane %v2041_v41, 7 }
 0x511   :  { %v1800_v19 = vrot.slane %v1795_v42, 6  ;;  %v1818_v58 = vrot.slane %v1816_v34, 7  ;;  %v2048_v5 = vsel %vm1019_vm2, %v2041_v41, %v2046_v18  ;;  %v1958_v36 = vrot.slane %v6045_v24, 1 }
 0x512   :  { %v1812_v7 = vsel %vm1019_vm2, %v6029_v3, %v1810_v17  ;;  %v2045_v22 = vsel %vm1019_vm2, %v6053_v43, %v2043_v21  ;;  %v2053_v2 = vrot.slane %v2048_v5, 7 }
 0x513   :  { %v1805_v20 = vsel %vm1531_vm5, %v1800_v19, %v1803_v51  ;;  %v1820_v48 = vsel %vm1531_vm5, %v1812_v7, %v1818_v58  ;;  %v2050_v6 = vrot.slane %v2045_v22, 2 }
 0x514   :  { %1806 = vst [vmem:[#allocation2 + $0x1e] sm:$0x3] %v1805_v20  ;;  %v1940_v20 = vrot.slane %v6037_v4, 7 }
 0x515   :  { %1821 = vst [vmem:[#allocation2 + $0x20] sm:$0x3] %v1820_v48  ;;  %v2055_v60 = vsel %vm1531_vm5, %v2050_v6, %v2053_v2  ;;  %v1863_v50 = vpop.permute.xlu1 %1862 }
 0x516   :  { %2056 = vst [vmem:[#allocation2 + $0x3a] sm:$0x3] %v2055_v60  ;;  %v1865_v52 = vrot.slane %v1863_v50, 3  ;;  %v1870_v1 = vsel %vm1019_vm2, %v1863_v50, %v1868_v0  ;;  %v1921_v0 = vrot.slane %v6037_v4, 5 }
 0x517   :  { %v1844_v23 = vpop.permute.xlu0 %1843  ;;  %v1952_v44 = vpop.permute.xlu2 %1951  ;;  %v1875_v17 = vrot.slane %v1870_v1, 7 }
 0x518   :  { %v1867_v8 = vsel %vm1019_vm2, %v6029_v3, %v1865_v52  ;;  %v1846_v35 = vrot.slane %v1844_v23, 5  ;;  %v1851_v18 = vsel %vm1019_vm2, %v1844_v23, %v1849_v33  ;;  %v1954_v41 = vrot.slane %v1952_v44, 1 }
 0x519   :  { %v1872_v42 = vrot.slane %v1867_v8, 6  ;;  %v1960_v34 = vsel %vm1019_vm2, %v1952_v44, %v1958_v36  ;;  %v1856_v7 = vrot.slane %v1851_v18, 7  ;;  %v2012_v18 = vrot.slane %v6045_v24, 7 }
 0x51a   :  { %v1848_v21 = vsel %vm1019_vm2, %v6029_v3, %v1846_v35  ;;  %v1956_v19 = vsel %vm1019_vm2, %v6045_v24, %v1954_v41  ;;  %v1962_v51 = vrot.slane %v1960_v34, 7 }
 0x51b   :  { %v1877_v58 = vsel %vm1531_vm5, %v1872_v42, %v1875_v17  ;;  %v1853_v5 = vrot.slane %v1848_v21, 4  ;;  %v1993_v21 = vrot.slane %v6045_v24, 5 }
 0x51c   :  { %1878 = vst [vmem:[#allocation2 + $0x26] sm:$0x3] %v1877_v58  ;;  %v1964_v22 = vsel %vm1531_vm5, %v1956_v19, %v1962_v51 }
 0x51d   :  { %v1858_v48 = vsel %vm1531_vm5, %v1853_v5, %v1856_v7  ;;  %1965 = vst [vmem:[#allocation2 + $0x30] sm:$0x3] %v1964_v22  ;;  %v1935_v6 = vpop.permute.xlu1 %1934 }
 0x51e   :  { %1859 = vst [vmem:[#allocation2 + $0x24] sm:$0x3] %v1858_v48  ;;  %v1937_v3 = vrot.slane %v1935_v6, 3  ;;  %v1942_v2 = vsel %vm1019_vm2, %v1935_v6, %v1940_v20 }
 0x51f   :  { %v1916_v60 = vpop.permute.xlu0 %1915  ;;  %v1947_v23 = vrot.slane %v1942_v2, 7  ;;  %v1886_v2 = vrot.slane %v6037_v4, 1 }
 0x520   :  { %v1939_v50 = vsel %vm1019_vm2, %v6037_v4, %v1937_v3  ;;  %v1918_v52 = vrot.slane %v1916_v60, 5  ;;  %v1923_v1 = vsel %vm1019_vm2, %v1916_v60, %v1921_v0 }
 0x521   :  { %v1944_v33 = vrot.slane %v1939_v50, 6  ;;  %v1928_v35 = vrot.slane %v1923_v1, 7  ;;  %v2030_v1 = vrot.slane %v6053_v43, 1 }
 0x522   :  { %v1920_v36 = vsel %vm1019_vm2, %v6037_v4, %v1918_v52 }
 0x523   :  { %v1949_v44 = vsel %vm1531_vm5, %v1944_v33, %v1947_v23  ;;  %v1925_v8 = vrot.slane %v1920_v36, 4 }
 0x524   :  { %1950 = vst [vmem:[#allocation2 + $0x2e] sm:$0x3] %v1949_v44 }
 0x525   :  { %v1930_v41 = vsel %vm1531_vm5, %v1925_v8, %v1928_v35  ;;  %v2007_v42 = vpop.permute.xlu1 %2006 }
 0x526   :  { %1931 = vst [vmem:[#allocation2 + $0x2c] sm:$0x3] %v1930_v41  ;;  %v2009_v17 = vrot.slane %v2007_v42, 3  ;;  %v2014_v34 = vsel %vm1019_vm2, %v2007_v42, %v2012_v18 }
 0x527   :  { %v1988_v19 = vpop.permute.xlu0 %1987  ;;  %v2019_v22 = vrot.slane %v2014_v34, 7 }
 0x528   :  { %v2011_v51 = vsel %vm1019_vm2, %v6045_v24, %v2009_v17  ;;  %v1990_v58 = vrot.slane %v1988_v19, 5  ;;  %v1995_v5 = vsel %vm1019_vm2, %v1988_v19, %v1993_v21 }
 0x529   :  { %v2016_v7 = vrot.slane %v2011_v51, 6  ;;  %v2000_v3 = vrot.slane %v1995_v5, 7 }
 0x52a   :  { %v1992_v20 = vsel %vm1019_vm2, %v6045_v24, %v1990_v58 }
 0x52b   :  { %v2021_v48 = vsel %vm1531_vm5, %v2016_v7, %v2019_v22  ;;  %v1997_v6 = vrot.slane %v1992_v20, 4 }
 0x52c   :  { %2022 = vst [vmem:[#allocation2 + $0x36] sm:$0x3] %v2021_v48 }
 0x52d   :  { %v2002_v0 = vsel %vm1531_vm5, %v1997_v6, %v2000_v3  ;;  %v1880_v60 = vpop.permute.xlu1 %1879 }
 0x52e   :  { %2003 = vst [vmem:[#allocation2 + $0x34] sm:$0x3] %v2002_v0  ;;  %v1882_v50 = vrot.slane %v1880_v60, 1  ;;  %v1888_v52 = vsel %vm1019_vm2, %v1880_v60, %v1886_v2 }
 0x52f   :  { %v1890_v33 = vrot.slane %v1888_v52, 7  ;;  %v2024_v23 = vpop.permute.xlu0 %2023 }
 0x530   :  { %v1884_v24 = vsel %vm1019_vm2, %v6037_v4, %v1882_v50  ;;  %v2026_v36 = vrot.slane %v2024_v23, 1  ;;  %v2032_v44 = vsel %vm1019_vm2, %v2024_v23, %v2030_v1 }
 0x531   :  { %v1892_v8 = vsel %vm1531_vm5, %v1884_v24, %v1890_v33  ;;  %v2034_v35 = vrot.slane %v2032_v44, 7 }
 0x532   :  { %1893 = vst [vmem:[#allocation2 + $0x28] sm:$0x3] %v1892_v8  ;;  %v2028_v18 = vsel %vm1019_vm2, %v6053_v43, %v2026_v36 }
 0x533   :  { %v2036_v41 = vsel %vm1531_vm5, %v2028_v18, %v2034_v35 }
 0x534   :  { %2037 = vst [vmem:[#allocation2 + $0x38] sm:$0x3] %v2036_v41 }
 0x535   :  { %3321 = dma.done.wait [#allocation4], 61440 }
 0x536   :  { %3322 = vsyncadd [#allocation4], 4294905856  ;;  %2709 = vmatpush.msra.mxu3 %v3793_v40  ;;  %2729 = vmatpush.msra.mxu2 %v3873_v49  ;;  %v7258_v16 = vld [vmem:[#allocation22_spill] sm:$0xff]  ;;  %v7267_v32 = vld [vmem:[#allocation60_spill] sm:$0xff]  ;;  %vm3235_vm6 = vcmask 320512   ;;  %vm3244_vm7 = vcmask 1024  }
 0x537   :  { %2630 = vmatpush.msra.mxu0 %v3468_v15  ;;  %2650 = vmatpush.msra.mxu1 %v3548_v31  ;;  %v7257_v15 = vld [vmem:[#allocation14_spill] sm:$0xff]  ;;  %v7266_v31 = vld [vmem:[#allocation20_spill] sm:$0xff]  ;;  %v7270_v40 = vld [vmem:[#allocation19_spill] sm:$0xff] }
 0x538   :  { %2710 = vmatpush.msra.mxu3 %v3788_v56  ;;  %2730 = vmatpush.msra.mxu2 %v3868_v47  ;;  %v7273_v47 = vld [vmem:[#allocation10_spill] sm:$0xff]  ;;  %v7278_v56 = vld [vmem:[#allocation17_spill] sm:$0xff]  ;;  %v7282_v59 = vld [vmem:[#allocation16_spill] sm:$0xff] }
 0x539   :  { %2631 = vmatpush.msra.mxu0 %v3463_v14  ;;  %2651 = vmatpush.msra.mxu1 %v3543_v30  ;;  %v2060_v14 = vld [vmem:[#allocation2] sm:$0xff]  ;;  %v7274_v49 = vld [vmem:[#allocation18_spill] sm:$0xff]  ;;  %v7283_v4 = vld [vmem:[#allocation39_spill] sm:$0xff] }
 0x53a   :  { %2711 = vmatpush.msra.mxu3 %v3783_v39  ;;  %2731 = vmatpush.msra.mxu2 %v3863_v63  ;;  %2560 = vst [vmem:[#allocation1] ss:$4 sm:$0xff] %v2060_v14  ;;  %v7265_v30 = vld [vmem:[#allocation12_spill] sm:$0xff]  ;;  %v7269_v39 = vld [vmem:[#allocation11_spill] sm:$0xff]  ;;  %v7286_v34 = vld [vmem:[#allocation38_spill] sm:$0xff] }
 0x53b   :  { %2632 = vmatpush.msra.mxu0 %v3458_v13  ;;  %2652 = vmatpush.msra.mxu1 %v3538_v29  ;;  %v7255_v13 = vld [vmem:[#allocation63_spill] sm:$0xff]  ;;  %v7264_v29 = vld [vmem:[#allocation69_spill] sm:$0xff]  ;;  %v7281_v63 = vld [vmem:[#allocation8_spill] sm:$0xff] }
 0x53c   :  { %2712 = vmatpush.msra.mxu3 %v3778_v55  ;;  %2732 = vmatpush.msra.mxu2 %v3858_v46  ;;  %v7272_v46 = vld [vmem:[#allocation67_spill] sm:$0xff]  ;;  %v7277_v55 = vld [vmem:[#allocation9_spill] sm:$0xff]  ;;  %v7285_v17 = vld [vmem:[#allocation56_spill] sm:$0xff] }
 0x53d   :  { %2633 = vmatpush.msra.mxu0 %v3453_v12  ;;  %2653 = vmatpush.msra.mxu1 %v3533_v28  ;;  %v7254_v12 = vld [vmem:[#allocation23_spill] sm:$0xff]  ;;  %v7263_v28 = vld [vmem:[#allocation61_spill] sm:$0xff]  ;;  %v7287_v21 = vld [vmem:[#allocation54_spill] sm:$0xff] }
 0x53e   :  { %2713 = vmatpush.msra.mxu3 %v3773_v38  ;;  %2733 = vmatpush.msra.mxu2 %v3853_v62  ;;  %v2061_v38 = vld [vmem:[#allocation2 + $0x8] sm:$0xff]  ;;  %v7284_v43 = vld [vmem:[#allocation55_spill] sm:$0xff]  ;;  %v7291_v48 = vld [vmem:[#allocation64_spill] sm:$0xff] }
 0x53f   :  { %2634 = vmatpush.msra.mxu0 %v3448_v11  ;;  %2654 = vmatpush.msra.mxu1 %v3528_v27  ;;  %v7253_v11 = vld [vmem:[#allocation15_spill] sm:$0xff]  ;;  %v7262_v27 = vld [vmem:[#allocation21_spill] sm:$0xff]  ;;  %2562 = vst [vmem:[#allocation1 + $0x20] ss:$4 sm:$0xff] %v2061_v38  ;;  %v7292_v6 = vld [vmem:[#allocation118_spill] sm:$0xff] }
 0x540   :  { %2714 = vmatpush.msra.mxu3 %v3768_v54  ;;  %2734 = vmatpush.msra.mxu2 %v3848_v57  ;;  %v7276_v54 = vld [vmem:[#allocation66_spill] sm:$0xff]  ;;  %v7279_v57 = vld [vmem:[#allocation57_spill] sm:$0xff]  ;;  %v7288_v51 = vld [vmem:[#allocation119_spill] sm:$0xff] }
 0x541   :  { %2635 = vmatpush.msra.mxu0 %v3443_v10  ;;  %2655 = vmatpush.msra.mxu1 %v3523_v26  ;;  %v7256_v10 = vld [vmem:[#allocation71_spill] sm:$0xff]  ;;  %v7261_v26 = vld [vmem:[#allocation13_spill] sm:$0xff]  ;;  %v7293_v3 = vld [vmem:[#allocation36_spill] sm:$0xff] }
 0x542   :  { %2715 = vmatpush.msra.mxu3 %v3763_v37  ;;  %2735 = vmatpush.msra.mxu2 %v3843_v45  ;;  %v7268_v37 = vld [vmem:[#allocation68_spill] sm:$0xff]  ;;  %v7271_v45 = vld [vmem:[#allocation59_spill] sm:$0xff]  ;;  %v7280_v62 = vld [vmem:[#allocation65_spill] sm:$0xff] }
 0x543   :  { %2636 = vmatpush.msra.mxu0 %v3438_v9  ;;  %2656 = vmatpush.msra.mxu1 %v3518_v25  ;;  %v7259_v9 = vld [vmem:[#allocation62_spill] sm:$0xff]  ;;  %v2564_v42 = vld.sshfl [vmem:[#allocation1 + $0x8] sm:$0xff pattern:$0x73625140]  ;;  %v7295_v0 = vld [vmem:[#allocation135_spill] sm:$0xff] }
 0x544   :  { %2716 = vmatpush.msra.mxu3 %v3758_v53  ;;  %2736 = vmatpush.msra.mxu2 %v3838_v61  ;;  %v7260_v25 = vld [vmem:[#allocation70_spill] sm:$0xff]  ;;  %v2563_v61 = vld.sshfl [vmem:[#allocation1] sm:$0xff pattern:$0x73625140]  ;;  %v7289_v7 = vld [vmem:[#allocation37_spill] sm:$0xff] }
 0x545   :  { %2637 = vmatpush.msra.mxu0 %v7253_v11  ;;  %2657 = vmatpush.msra.mxu1 %v7254_v12  ;;  %v7275_v53 = vld [vmem:[#allocation58_spill] sm:$0xff]  ;;  %v7290_v22 = vld [vmem:[#allocation53_spill] sm:$0xff]  ;;  %v7294_v2 = vld [vmem:[#allocation52_spill] sm:$0xff] }
 0x546   :  { %2717 = vmatpush.msra.mxu3 %v7255_v13  ;;  %2737 = vmatpush.msra.mxu2 %v7256_v10  ;;  %v6344_v19 = vld.sshfl [vmem:[#allocation1 + $0x10] sm:$0xff pattern:$0x73625140]  ;;  %v2062_v58 = vld [vmem:[#allocation2 + $0x10] sm:$0xff]  ;;  %v7302_v36 = vld [vmem:[#allocation116_spill] sm:$0xff] }
 0x547   :  { %2638 = vmatpush.msra.mxu0 %v7257_v15  ;;  %2658 = vmatpush.msra.mxu1 %v7258_v16  ;;  %v6347_v5 = vld.sshfl [vmem:[#allocation1 + $0x18] sm:$0xff pattern:$0x73625140]  ;;  %v2567_v20 = vld.sshfl [vmem:[#allocation1 + $0x20] sm:$0xff pattern:$0x73625140] }
 0x548   :  { %2718 = vmatpush.msra.mxu3 %v7259_v9  ;;  %2738 = vmatpush.msra.mxu2 %v7260_v25  ;;  %2571 = vst [vmem:[#allocation1] ss:$4 sm:$0xff] %v2062_v58  ;;  %v7296_v60 = vld [vmem:[#allocation35_spill] sm:$0xff]  ;;  %v2568_v52 = vld.sshfl [vmem:[#allocation1 + $0x28] sm:$0xff pattern:$0x73625140] }
 0x549   :  { %2639 = vmatpush.msra.mxu0 %v7261_v26  ;;  %2659 = vmatpush.msra.mxu1 %v7262_v27  ;;  %v7297_v50 = vld [vmem:[#allocation51_spill] sm:$0xff]  ;;  %v7298_v1 = vld [vmem:[#allocation117_spill] sm:$0xff]  ;;  %v7299_v33 = vld [vmem:[#allocation134_spill] sm:$0xff] }
 0x54a   :  { %2719 = vmatpush.msra.mxu3 %v7263_v28  ;;  %2739 = vmatpush.msra.mxu2 %v7264_v29  ;;  %v7300_v23 = vld [vmem:[#allocation34_spill] sm:$0xff]  ;;  %v7303_v44 = vld [vmem:[#allocation33_spill] sm:$0xff]  ;;  %v7306_v18 = vld [vmem:[#allocation115_spill] sm:$0xff] }
 0x54b   :  { %2640 = vmatpush.msra.mxu0 %v7265_v30  ;;  %2660 = vmatpush.msra.mxu1 %v7266_v31  ;;  %v7301_v24 = vld [vmem:[#allocation50_spill] sm:$0xff]  ;;  %v7304_v8 = vld [vmem:[#allocation49_spill] sm:$0xff]  ;;  %v7307_v41 = vld [vmem:[#allocation32_spill] sm:$0xff] }
 0x54c   :  { %2720 = vmatpush.msra.mxu3 %v7267_v32  ;;  %2740 = vmatpush.msra.mxu2 %v7268_v37  ;;  %v7305_v35 = vld [vmem:[#allocation133_spill] sm:$0xff]  ;;  %v7308_v11 = vld [vmem:[#allocation48_spill] sm:$0xff]  ;;  %v7310_v13 = vld [vmem:[#allocation114_spill] sm:$0xff] }
 0x54d   :  { %2641 = vmatpush.msra.mxu0 %v7269_v39  ;;  %2661 = vmatpush.msra.mxu1 %v7270_v40  ;;  %v7309_v12 = vld [vmem:[#allocation132_spill] sm:$0xff]  ;;  %v7311_v10 = vld [vmem:[#allocation31_spill] sm:$0xff]  ;;  %v7314_v16 = vld [vmem:[#allocation113_spill] sm:$0xff] }
 0x54e   :  { %2721 = vmatpush.msra.mxu3 %v7271_v45  ;;  %2741 = vmatpush.msra.mxu2 %v7272_v46  ;;  %v7312_v14 = vld [vmem:[#allocation47_spill] sm:$0xff]  ;;  %v7315_v9 = vld [vmem:[#allocation30_spill] sm:$0xff]  ;;  %v7318_v27 = vld [vmem:[#allocation112_spill] sm:$0xff] }
 0x54f   :  { %2642 = vmatpush.msra.mxu0 %v7273_v47  ;;  %2662 = vmatpush.msra.mxu1 %v7274_v49  ;;  %v7313_v15 = vld [vmem:[#allocation131_spill] sm:$0xff]  ;;  %v7316_v25 = vld [vmem:[#allocation46_spill] sm:$0xff]  ;;  %v7319_v28 = vld [vmem:[#allocation29_spill] sm:$0xff] }
 0x550   :  { %2722 = vmatpush.msra.mxu3 %v7275_v53  ;;  %2742 = vmatpush.msra.mxu2 %v7276_v54  ;;  %v7317_v26 = vld [vmem:[#allocation130_spill] sm:$0xff]  ;;  %v7320_v29 = vld [vmem:[#allocation45_spill] sm:$0xff]  ;;  %v7322_v31 = vld [vmem:[#allocation111_spill] sm:$0xff] }
 0x551   :  { %2643 = vmatpush.msra.mxu0 %v7277_v55  ;;  %2663 = vmatpush.msra.mxu1 %v7278_v56  ;;  %v7321_v30 = vld [vmem:[#allocation129_spill] sm:$0xff]  ;;  %v7323_v32 = vld [vmem:[#allocation28_spill] sm:$0xff]  ;;  %v7326_v39 = vld [vmem:[#allocation110_spill] sm:$0xff] }
 0x552   :  { %2723 = vmatpush.msra.mxu3 %v7279_v57  ;;  %2743 = vmatpush.msra.mxu2 %v7280_v62  ;;  %v7324_v37 = vld [vmem:[#allocation44_spill] sm:$0xff]  ;;  %v7327_v40 = vld [vmem:[#allocation27_spill] sm:$0xff]  ;;  %v7330_v47 = vld [vmem:[#allocation109_spill] sm:$0xff] }
 0x553   :  { %2644 = vmatpush.msra.mxu0 %v7281_v63  ;;  %2664 = vmatpush.msra.mxu1 %v7282_v59  ;;  %v7325_v38 = vld [vmem:[#allocation128_spill] sm:$0xff]  ;;  %v7328_v45 = vld [vmem:[#allocation43_spill] sm:$0xff]  ;;  %v7331_v49 = vld [vmem:[#allocation26_spill] sm:$0xff] }
 0x554   :  { %2645 = vmatmul.f32.vlgmr.msra.gmra.mxu0 %v2563_v61  ;;  %2724 = vmatpush.msra.mxu3 %v7285_v17  ;;  %v7329_v46 = vld [vmem:[#allocation127_spill] sm:$0xff]  ;;  %v7332_v53 = vld [vmem:[#allocation42_spill] sm:$0xff]  ;;  %v7334_v55 = vld [vmem:[#allocation108_spill] sm:$0xff] }
 0x555   :  { %2669 = vmatpush.msrb.mxu0 %v7283_v4  ;;  %2689 = vmatpush.msrb.mxu1 %v7284_v43  ;;  %v7333_v54 = vld [vmem:[#allocation126_spill] sm:$0xff]  ;;  %v7335_v56 = vld [vmem:[#allocation25_spill] sm:$0xff]  ;;  %v7338_v62 = vld [vmem:[#allocation107_spill] sm:$0xff] }
 0x556   :  { %2665 = vmatmul.f32.vlgmr.msra.gmra.mxu1 %v2564_v42  ;;  %2789 = vmatpush.msrb.mxu3 %v7288_v51  ;;  %v7336_v57 = vld [vmem:[#allocation41_spill] sm:$0xff]  ;;  %v7339_v63 = vld [vmem:[#allocation24_spill] sm:$0xff]  ;;  %v7341_v43 = vld [vmem:[#allocation87_spill] sm:$0xff] }
 0x557   :  { %2670 = vmatpush.msrb.mxu0 %v7286_v34  ;;  %2690 = vmatpush.msrb.mxu1 %v7287_v21  ;;  %v7337_v61 = vld [vmem:[#allocation125_spill] sm:$0xff]  ;;  %v7340_v59 = vld [vmem:[#allocation40_spill] sm:$0xff]  ;;  %v7342_v42 = vld [vmem:[#allocation103_spill] sm:$0xff] }
 0x558   :  { %2744 = vmatpush.msra.mxu2 %v7291_v48  ;;  %2790 = vmatpush.msrb.mxu3 %v7292_v6  ;;  %v6401_v4 = vld.sshfl [vmem:[#allocation1 + $0x30] sm:$0xff pattern:$0x73625140]  ;;  %v2063_v17 = vld [vmem:[#allocation2 + $0x18] sm:$0xff] }
 0x559   :  { %2671 = vmatpush.msrb.mxu0 %v7289_v7  ;;  %2691 = vmatpush.msrb.mxu1 %v7290_v22  ;;  %v6405_v34 = vld.sshfl [vmem:[#allocation1 + $0x38] sm:$0xff pattern:$0x73625140]  ;;  %v7345_v58 = vld [vmem:[#allocation124_spill] sm:$0xff]  ;;  %v7347_v22 = vld [vmem:[#allocation85_spill] sm:$0xff] }
 0x55a   :  { %2809 = vmatpush.msrb.mxu2 %v7295_v0  ;;  %2725 = vmatmul.f32.vlgmr.msra.gmra.mxu3 %v2567_v20  ;;  %2572 = vst [vmem:[#allocation1 + $0x20] ss:$4 sm:$0xff] %v2063_v17  ;;  %v7343_v21 = vld [vmem:[#allocation86_spill] sm:$0xff]  ;;  %v7348_v20 = vld [vmem:[#allocation101_spill] sm:$0xff]  ;;  %v7349_v48 = vld [vmem:[#allocation123_spill] sm:$0xff] }
 0x55b   :  { %2672 = vmatpush.msrb.mxu0 %v7293_v3  ;;  %2692 = vmatpush.msrb.mxu1 %v7294_v2  ;;  %v7344_v51 = vld [vmem:[#allocation102_spill] sm:$0xff]  ;;  %v7350_v6 = vld [vmem:[#allocation105_spill] sm:$0xff]  ;;  %v2573_v3 = vld.sshfl [vmem:[#allocation1] sm:$0xff pattern:$0x73625140] }
 0x55c   :  { %2791 = vmatpush.msrb.mxu3 %v7298_v1  ;;  %2810 = vmatpush.msrb.mxu2 %v7299_v33  ;;  %v7346_v7 = vld [vmem:[#allocation106_spill] sm:$0xff]  ;;  %v7354_v0 = vld [vmem:[#allocation104_spill] sm:$0xff] }
 0x55d   :  { %2673 = vmatpush.msrb.mxu0 %v7296_v60  ;;  %2693 = vmatpush.msrb.mxu1 %v7297_v50  ;;  %v7353_v2 = vld [vmem:[#allocation122_spill] sm:$0xff]  ;;  %v7355_v60 = vld [vmem:[#allocation83_spill] sm:$0xff]  ;;  %v2064_v17 = vld [vmem:[#allocation2 + $0x20] sm:$0xff] }
 0x55e   :  { %2745 = vmatmul.f32.vlgmr.msra.gmra.mxu2 %v2568_v52  ;;  %2792 = vmatpush.msrb.mxu3 %v7302_v36  ;;  %v7356_v50 = vld [vmem:[#allocation99_spill] sm:$0xff]  ;;  %v7357_v52 = vld [vmem:[#allocation121_spill] sm:$0xff]  ;;  %v7358_v1 = vld [vmem:[#allocation82_spill] sm:$0xff] }
 0x55f   :  { %2674 = vmatpush.msrb.mxu0 %v7300_v23  ;;  %2694 = vmatpush.msrb.mxu1 %v7301_v24  ;;  %v7359_v33 = vld [vmem:[#allocation98_spill] sm:$0xff]  ;;  %v2574_v23 = vld.sshfl [vmem:[#allocation1 + $0x8] sm:$0xff pattern:$0x73625140]  ;;  %v7360_v24 = vld [vmem:[#allocation183_spill] sm:$0xff] }
 0x560   :  { %2811 = vmatpush.msrb.mxu2 %v7305_v35  ;;  %2793 = vmatpush.msrb.mxu3 %v7306_v18  ;;  %v7361_v36 = vld [vmem:[#allocation120_spill] sm:$0xff]  ;;  %v7364_v35 = vld [vmem:[#allocation182_spill] sm:$0xff] }
 0x561   :  { %2675 = vmatpush.msrb.mxu0 %v7303_v44  ;;  %2695 = vmatpush.msrb.mxu1 %v7304_v8  ;;  %v7362_v44 = vld [vmem:[#allocation81_spill] sm:$0xff]  ;;  %v7365_v18 = vld [vmem:[#allocation80_spill] sm:$0xff] }
 0x562   :  { %2812 = vmatpush.msrb.mxu2 %v7309_v12  ;;  %2794 = vmatpush.msrb.mxu3 %v7310_v13  ;;  %v7363_v8 = vld [vmem:[#allocation97_spill] sm:$0xff]  ;;  %v7369_v13 = vld [vmem:[#allocation79_spill] sm:$0xff] }
 0x563   :  { %2676 = vmatpush.msrb.mxu0 %v7307_v41  ;;  %2696 = vmatpush.msrb.mxu1 %v7308_v11  ;;  %v7366_v41 = vld [vmem:[#allocation96_spill] sm:$0xff]  ;;  %v7367_v11 = vld [vmem:[#allocation199_spill] sm:$0xff]  ;;  %v7368_v12 = vld [vmem:[#allocation181_spill] sm:$0xff] }
 0x564   :  { %2813 = vmatpush.msrb.mxu2 %v7313_v15  ;;  %2795 = vmatpush.msrb.mxu3 %v7314_v16  ;;  %v7372_v15 = vld [vmem:[#allocation180_spill] sm:$0xff]  ;;  %v7373_v16 = vld [vmem:[#allocation78_spill] sm:$0xff] }
 0x565   :  { %2677 = vmatpush.msrb.mxu0 %v7311_v10  ;;  %2697 = vmatpush.msrb.mxu1 %v7312_v14  ;;  %v7370_v10 = vld [vmem:[#allocation95_spill] sm:$0xff]  ;;  %v7371_v14 = vld [vmem:[#allocation198_spill] sm:$0xff] }
 0x566   :  { %2814 = vmatpush.msrb.mxu2 %v7317_v26  ;;  %2796 = vmatpush.msrb.mxu3 %v7318_v27  ;;  %v7376_v26 = vld [vmem:[#allocation179_spill] sm:$0xff]  ;;  %v7377_v27 = vld [vmem:[#allocation77_spill] sm:$0xff] }
 0x567   :  { %2678 = vmatpush.msrb.mxu0 %v7315_v9  ;;  %2698 = vmatpush.msrb.mxu1 %v7316_v25  ;;  %v7374_v9 = vld [vmem:[#allocation94_spill] sm:$0xff]  ;;  %v7375_v25 = vld [vmem:[#allocation197_spill] sm:$0xff] }
 0x568   :  { %2815 = vmatpush.msrb.mxu2 %v7321_v30  ;;  %2797 = vmatpush.msrb.mxu3 %v7322_v31  ;;  %v7380_v30 = vld [vmem:[#allocation178_spill] sm:$0xff]  ;;  %v7381_v31 = vld [vmem:[#allocation76_spill] sm:$0xff] }
 0x569   :  { %2679 = vmatpush.msrb.mxu0 %v7319_v28  ;;  %2699 = vmatpush.msrb.mxu1 %v7320_v29  ;;  %v7378_v28 = vld [vmem:[#allocation93_spill] sm:$0xff]  ;;  %v7379_v29 = vld [vmem:[#allocation196_spill] sm:$0xff] }
 0x56a   :  { %2816 = vmatpush.msrb.mxu2 %v7325_v38  ;;  %2798 = vmatpush.msrb.mxu3 %v7326_v39  ;;  %v7384_v38 = vld [vmem:[#allocation177_spill] sm:$0xff]  ;;  %v7385_v39 = vld [vmem:[#allocation75_spill] sm:$0xff] }
 0x56b   :  { %2680 = vmatpush.msrb.mxu0 %v7323_v32  ;;  %2700 = vmatpush.msrb.mxu1 %v7324_v37  ;;  %v7382_v32 = vld [vmem:[#allocation92_spill] sm:$0xff]  ;;  %v7383_v37 = vld [vmem:[#allocation195_spill] sm:$0xff] }
 0x56c   :  { %2817 = vmatpush.msrb.mxu2 %v7329_v46  ;;  %2799 = vmatpush.msrb.mxu3 %v7330_v47  ;;  %v7388_v46 = vld [vmem:[#allocation176_spill] sm:$0xff]  ;;  %v7389_v47 = vld [vmem:[#allocation74_spill] sm:$0xff] }
 0x56d   :  { %2681 = vmatpush.msrb.mxu0 %v7327_v40  ;;  %2701 = vmatpush.msrb.mxu1 %v7328_v45  ;;  %v7386_v40 = vld [vmem:[#allocation91_spill] sm:$0xff]  ;;  %v7387_v45 = vld [vmem:[#allocation194_spill] sm:$0xff] }
 0x56e   :  { %2818 = vmatpush.msrb.mxu2 %v7333_v54  ;;  %2800 = vmatpush.msrb.mxu3 %v7334_v55  ;;  %v7392_v54 = vld [vmem:[#allocation175_spill] sm:$0xff]  ;;  %v7393_v55 = vld [vmem:[#allocation73_spill] sm:$0xff] }
 0x56f   :  { %2682 = vmatpush.msrb.mxu0 %v7331_v49  ;;  %2702 = vmatpush.msrb.mxu1 %v7332_v53  ;;  %v7390_v49 = vld [vmem:[#allocation90_spill] sm:$0xff]  ;;  %v7391_v53 = vld [vmem:[#allocation193_spill] sm:$0xff] }
 0x570   :  { %2819 = vmatpush.msrb.mxu2 %v7337_v61  ;;  %2801 = vmatpush.msrb.mxu3 %v7338_v62  ;;  %v7396_v61 = vld [vmem:[#allocation174_spill] sm:$0xff]  ;;  %v7397_v62 = vld [vmem:[#allocation72_spill] sm:$0xff] }
 0x571   :  { %2683 = vmatpush.msrb.mxu0 %v7335_v56  ;;  %2703 = vmatpush.msrb.mxu1 %v7336_v57  ;;  %v7394_v56 = vld [vmem:[#allocation89_spill] sm:$0xff]  ;;  %v7395_v57 = vld [vmem:[#allocation192_spill] sm:$0xff] }
 0x572   :  { %2820 = vmatpush.msrb.mxu2 %v7345_v58  ;;  %2802 = vmatpush.msrb.mxu3 %v7346_v7  ;;  %v7402_v58 = vld [vmem:[#allocation173_spill] sm:$0xff]  ;;  %v7403_v7 = vld [vmem:[#allocation150_spill] sm:$0xff] }
 0x573   :  { %2684 = vmatpush.msrb.mxu0 %v7339_v63  ;;  %2704 = vmatpush.msrb.mxu1 %v7340_v59  ;;  %v7398_v63 = vld [vmem:[#allocation88_spill] sm:$0xff]  ;;  %v6467_v59 = vld.sshfl [vmem:[#allocation1 + $0x10] sm:$0xff pattern:$0x73625140] }
 0x574   :  { %2685 = vmatmul.f32.vlgmr.msrb.gmra.mxu0 %v6344_v19  ;;  %2705 = vmatmul.f32.vlgmr.msrb.gmra.mxu1 %v6347_v5  ;;  %v7351_v19 = vld [vmem:[#allocation84_spill] sm:$0xff] }
 0x575   :  { %2749 = vmatpush.msra.mxu0 %v7341_v43  ;;  %2769 = vmatpush.msra.mxu1 %v7342_v42  ;;  %v7352_v5 = vld [vmem:[#allocation100_spill] sm:$0xff]  ;;  %v7399_v43 = vld [vmem:[#allocation151_spill] sm:$0xff] }
 0x576   :  { %2821 = vmatpush.msrb.mxu2 %v7349_v48  ;;  %2803 = vmatpush.msrb.mxu3 %v7350_v6  ;;  %v7400_v42 = vld [vmem:[#allocation167_spill] sm:$0xff]  ;;  %v7408_v48 = vld [vmem:[#allocation165_spill] sm:$0xff] }
 0x577   :  { %2750 = vmatpush.msra.mxu0 %v7343_v21  ;;  %2770 = vmatpush.msra.mxu1 %v7344_v51  ;;  %v6471_v21 = vld.sshfl [vmem:[#allocation1 + $0x18] sm:$0xff pattern:$0x73625140]  ;;  %v7409_v6 = vld [vmem:[#allocation189_spill] sm:$0xff] }
 0x578   :  { %2822 = vmatpush.msrb.mxu2 %v7353_v2  ;;  %2804 = vmatpush.msrb.mxu3 %v7354_v0  ;;  %v7401_v51 = vld [vmem:[#allocation191_spill] sm:$0xff]  ;;  %2581 = vst [vmem:[#allocation1] ss:$4 sm:$0xff] %v2064_v17  ;;  %v7413_v2 = vld [vmem:[#allocation188_spill] sm:$0xff]  ;;  %v7414_v0 = vld [vmem:[#allocation170_spill] sm:$0xff] }
 0x579   :  { %2751 = vmatpush.msra.mxu0 %v7347_v22  ;;  %2771 = vmatpush.msra.mxu1 %v7348_v20  ;;  %v7404_v22 = vld [vmem:[#allocation166_spill] sm:$0xff]  ;;  %v7407_v20 = vld [vmem:[#allocation149_spill] sm:$0xff]  ;;  %v7459_v17 = vld [vmem:[#allocation215_spill] sm:$0xff] }
 0x57a   :  { %2823 = vmatpush.msrb.mxu2 %v7357_v52  ;;  %2805 = vmatmul.f32.vlgmr.msrb.gmra.mxu3 %v2573_v3  ;;  %v7412_v3 = vld [vmem:[#allocation164_spill] sm:$0xff]  ;;  %v7417_v52 = vld [vmem:[#allocation187_spill] sm:$0xff] }
 0x57b   :  { %2752 = vmatpush.msra.mxu0 %v7351_v19  ;;  %2772 = vmatpush.msra.mxu1 %v7352_v5  ;;  %v7410_v19 = vld [vmem:[#allocation171_spill] sm:$0xff]  ;;  %v7411_v5 = vld [vmem:[#allocation148_spill] sm:$0xff] }
 0x57c   :  { %2869 = vmatpush.msra.mxu3 %v7360_v24  ;;  %2824 = vmatpush.msrb.mxu2 %v7361_v36  ;;  %v2577_v24 = vld.sshfl [vmem:[#allocation1 + $0x20] sm:$0xff pattern:$0x73625140]  ;;  %v7421_v36 = vld [vmem:[#allocation186_spill] sm:$0xff] }
 0x57d   :  { %2753 = vmatpush.msra.mxu0 %v7355_v60  ;;  %2773 = vmatpush.msra.mxu1 %v7356_v50  ;;  %v7415_v60 = vld [vmem:[#allocation147_spill] sm:$0xff] }
 0x57e   :  { %2825 = vmatmul.f32.vlgmr.msrb.gmra.mxu2 %v2574_v23  ;;  %2870 = vmatpush.msra.mxu3 %v7364_v35  ;;  %v7416_v50 = vld [vmem:[#allocation163_spill] sm:$0xff]  ;;  %v7420_v23 = vld [vmem:[#allocation162_spill] sm:$0xff]  ;;  %v7424_v35 = vld [vmem:[#allocation161_spill] sm:$0xff] }
 0x57f   :  { %2754 = vmatpush.msra.mxu0 %v7358_v1  ;;  %2774 = vmatpush.msra.mxu1 %v7359_v33  ;;  %v7418_v1 = vld [vmem:[#allocation169_spill] sm:$0xff]  ;;  %v7419_v33 = vld [vmem:[#allocation146_spill] sm:$0xff] }
 0x580   :  { %2889 = vmatpush.msra.mxu2 %v7367_v11  ;;  %2871 = vmatpush.msra.mxu3 %v7368_v12  ;;  %v7427_v11 = vld [vmem:[#allocation160_spill] sm:$0xff] }
 0x581   :  { %2755 = vmatpush.msra.mxu0 %v7362_v44  ;;  %2775 = vmatpush.msra.mxu1 %v7363_v8  ;;  %v7422_v44 = vld [vmem:[#allocation168_spill] sm:$0xff]  ;;  %v7423_v8 = vld [vmem:[#allocation145_spill] sm:$0xff] }
 0x582   :  { %2890 = vmatpush.msra.mxu2 %v7371_v14  ;;  %2872 = vmatpush.msra.mxu3 %v7372_v15  ;;  %v2578_v12 = vld.sshfl [vmem:[#allocation1 + $0x28] sm:$0xff pattern:$0x73625140]  ;;  %v7430_v14 = vld [vmem:[#allocation143_spill] sm:$0xff] }
 0x583   :  { %2756 = vmatpush.msra.mxu0 %v7365_v18  ;;  %2776 = vmatpush.msra.mxu1 %v7366_v41  ;;  %v7425_v18 = vld [vmem:[#allocation185_spill] sm:$0xff]  ;;  %v7426_v41 = vld [vmem:[#allocation144_spill] sm:$0xff]  ;;  %v7431_v15 = vld [vmem:[#allocation159_spill] sm:$0xff] }
 0x584   :  { %2891 = vmatpush.msra.mxu2 %v7375_v25  ;;  %2873 = vmatpush.msra.mxu3 %v7376_v26  ;;  %v7434_v25 = vld [vmem:[#allocation158_spill] sm:$0xff]  ;;  %v7435_v26 = vld [vmem:[#allocation263_spill] sm:$0xff] }
 0x585   :  { %2757 = vmatpush.msra.mxu0 %v7369_v13  ;;  %2777 = vmatpush.msra.mxu1 %v7370_v10  ;;  %v7428_v13 = vld [vmem:[#allocation247_spill] sm:$0xff]  ;;  %v7429_v10 = vld [vmem:[#allocation184_spill] sm:$0xff] }
 0x586   :  { %2892 = vmatpush.msra.mxu2 %v7379_v29  ;;  %2874 = vmatpush.msra.mxu3 %v7380_v30  ;;  %v7438_v29 = vld [vmem:[#allocation157_spill] sm:$0xff]  ;;  %v7439_v30 = vld [vmem:[#allocation262_spill] sm:$0xff] }
 0x587   :  { %2758 = vmatpush.msra.mxu0 %v7373_v16  ;;  %2778 = vmatpush.msra.mxu1 %v7374_v9  ;;  %v7432_v16 = vld [vmem:[#allocation246_spill] sm:$0xff] }
 0x588   :  { %2893 = vmatpush.msra.mxu2 %v7383_v37  ;;  %2875 = vmatpush.msra.mxu3 %v7384_v38  ;;  %v7433_v9 = vld [vmem:[#allocation142_spill] sm:$0xff]  ;;  %v7442_v37 = vld [vmem:[#allocation156_spill] sm:$0xff]  ;;  %v7443_v38 = vld [vmem:[#allocation261_spill] sm:$0xff] }
 0x589   :  { %2759 = vmatpush.msra.mxu0 %v7377_v27  ;;  %2779 = vmatpush.msra.mxu1 %v7378_v28  ;;  %v7436_v27 = vld [vmem:[#allocation245_spill] sm:$0xff] }
 0x58a   :  { %2894 = vmatpush.msra.mxu2 %v7387_v45  ;;  %2876 = vmatpush.msra.mxu3 %v7388_v46  ;;  %v7437_v28 = vld [vmem:[#allocation141_spill] sm:$0xff]  ;;  %v7446_v45 = vld [vmem:[#allocation155_spill] sm:$0xff]  ;;  %v7447_v46 = vld [vmem:[#allocation260_spill] sm:$0xff] }
 0x58b   :  { %2760 = vmatpush.msra.mxu0 %v7381_v31  ;;  %2780 = vmatpush.msra.mxu1 %v7382_v32  ;;  %v7440_v31 = vld [vmem:[#allocation244_spill] sm:$0xff] }
 0x58c   :  { %2895 = vmatpush.msra.mxu2 %v7391_v53  ;;  %2877 = vmatpush.msra.mxu3 %v7392_v54  ;;  %v7441_v32 = vld [vmem:[#allocation140_spill] sm:$0xff]  ;;  %v7450_v53 = vld [vmem:[#allocation154_spill] sm:$0xff]  ;;  %v7451_v54 = vld [vmem:[#allocation259_spill] sm:$0xff] }
 0x58d   :  { %2761 = vmatpush.msra.mxu0 %v7385_v39  ;;  %2781 = vmatpush.msra.mxu1 %v7386_v40  ;;  %v7444_v39 = vld [vmem:[#allocation243_spill] sm:$0xff] }
 0x58e   :  { %2896 = vmatpush.msra.mxu2 %v7395_v57  ;;  %2878 = vmatpush.msra.mxu3 %v7396_v61  ;;  %v7445_v40 = vld [vmem:[#allocation139_spill] sm:$0xff]  ;;  %v7454_v57 = vld [vmem:[#allocation153_spill] sm:$0xff]  ;;  %v7455_v61 = vld [vmem:[#allocation258_spill] sm:$0xff] }
 0x58f   :  { %2762 = vmatpush.msra.mxu0 %v7389_v47  ;;  %2782 = vmatpush.msra.mxu1 %v7390_v49  ;;  %v7448_v47 = vld [vmem:[#allocation242_spill] sm:$0xff] }
 0x590   :  { %2897 = vmatpush.msra.mxu2 %v7401_v51  ;;  %2879 = vmatpush.msra.mxu3 %v7402_v58  ;;  %v7449_v49 = vld [vmem:[#allocation138_spill] sm:$0xff]  ;;  %v7460_v51 = vld [vmem:[#allocation231_spill] sm:$0xff] }
 0x591   :  { %2763 = vmatpush.msra.mxu0 %v7393_v55  ;;  %2783 = vmatpush.msra.mxu1 %v7394_v56  ;;  %v7452_v55 = vld [vmem:[#allocation241_spill] sm:$0xff] }
 0x592   :  { %v7453_v56 = vld [vmem:[#allocation137_spill] sm:$0xff] }
 0x593   :  { %2764 = vmatpush.msra.mxu0 %v7397_v62  ;;  %2784 = vmatpush.msra.mxu1 %v7398_v63  ;;  %v7456_v62 = vld [vmem:[#allocation240_spill] sm:$0xff]  ;;  %v2065_v58 = vld [vmem:[#allocation2 + $0x28] sm:$0xff] }
 0x594   :  { %2765 = vmatmul.f32.vlgmr.msra.gmra.mxu0 %v6401_v4  ;;  %2785 = vmatmul.f32.vlgmr.msra.gmra.mxu1 %v6405_v34  ;;  %v7405_v4 = vld [vmem:[#allocation190_spill] sm:$0xff]  ;;  %v7406_v34 = vld [vmem:[#allocation172_spill] sm:$0xff] }
 0x595   :  { %2829 = vmatpush.msrb.mxu0 %v7399_v43  ;;  %2849 = vmatpush.msrb.mxu1 %v7400_v42  ;;  %v7457_v63 = vld [vmem:[#allocation136_spill] sm:$0xff]  ;;  %v6533_v42 = vld.sshfl [vmem:[#allocation1 + $0x30] sm:$0xff pattern:$0x73625140] }
 0x596   :  { %2898 = vmatpush.msra.mxu2 %v7405_v4  ;;  %2880 = vmatpush.msra.mxu3 %v7406_v34  ;;  %v7458_v43 = vld [vmem:[#allocation152_spill] sm:$0xff]  ;;  %v7462_v4 = vld [vmem:[#allocation239_spill] sm:$0xff]  ;;  %v7463_v34 = vld [vmem:[#allocation214_spill] sm:$0xff] }
 0x597   :  { %2830 = vmatpush.msrb.mxu0 %v7403_v7  ;;  %2850 = vmatpush.msrb.mxu1 %v7404_v22  ;;  %v6537_v7 = vld.sshfl [vmem:[#allocation1 + $0x38] sm:$0xff pattern:$0x73625140]  ;;  %v7461_v22 = vld [vmem:[#allocation257_spill] sm:$0xff] }
 0x598   :  { %2899 = vmatpush.msra.mxu2 %v7409_v6  ;;  %2881 = vmatpush.msra.mxu3 %v7410_v19  ;;  %2582 = vst [vmem:[#allocation1 + $0x20] ss:$4 sm:$0xff] %v2065_v58  ;;  %v7468_v6 = vld [vmem:[#allocation229_spill] sm:$0xff]  ;;  %v7469_v19 = vld [vmem:[#allocation255_spill] sm:$0xff] }
 0x599   :  { %2831 = vmatpush.msrb.mxu0 %v7407_v20  ;;  %2851 = vmatpush.msrb.mxu1 %v7408_v48  ;;  %v7464_v20 = vld [vmem:[#allocation230_spill] sm:$0xff]  ;;  %v7467_v48 = vld [vmem:[#allocation213_spill] sm:$0xff]  ;;  %v7520_v58 = vld [vmem:[#allocation295_spill] sm:$0xff] }
 0x59a   :  { %2900 = vmatpush.msra.mxu2 %v7413_v2  ;;  %2882 = vmatpush.msra.mxu3 %v7414_v0  ;;  %v7472_v2 = vld [vmem:[#allocation228_spill] sm:$0xff]  ;;  %v7473_v0 = vld [vmem:[#allocation254_spill] sm:$0xff] }
 0x59b   :  { %2832 = vmatpush.msrb.mxu0 %v7411_v5  ;;  %2852 = vmatpush.msrb.mxu1 %v7412_v3  ;;  %v7470_v5 = vld [vmem:[#allocation237_spill] sm:$0xff]  ;;  %v7471_v3 = vld [vmem:[#allocation212_spill] sm:$0xff] }
 0x59c   :  { %2901 = vmatpush.msra.mxu2 %v7417_v52  ;;  %2883 = vmatpush.msra.mxu3 %v7418_v1  ;;  %v7476_v52 = vld [vmem:[#allocation227_spill] sm:$0xff]  ;;  %v7477_v1 = vld [vmem:[#allocation253_spill] sm:$0xff] }
 0x59d   :  { %2833 = vmatpush.msrb.mxu0 %v7415_v60  ;;  %2853 = vmatpush.msrb.mxu1 %v7416_v50  ;;  %v7474_v60 = vld [vmem:[#allocation236_spill] sm:$0xff]  ;;  %v7475_v50 = vld [vmem:[#allocation211_spill] sm:$0xff] }
 0x59e   :  { %2902 = vmatpush.msra.mxu2 %v7421_v36  ;;  %2884 = vmatpush.msra.mxu3 %v7422_v44  ;;  %v7481_v36 = vld [vmem:[#allocation252_spill] sm:$0xff]  ;;  %v7482_v44 = vld [vmem:[#allocation234_spill] sm:$0xff] }
 0x59f   :  { %2834 = vmatpush.msrb.mxu0 %v7419_v33  ;;  %2854 = vmatpush.msrb.mxu1 %v7420_v23  ;;  %v7478_v33 = vld [vmem:[#allocation235_spill] sm:$0xff]  ;;  %v7479_v23 = vld [vmem:[#allocation210_spill] sm:$0xff] }
 0x5a0   :  { %2903 = vmatpush.msra.mxu2 %v7425_v18  ;;  %2885 = vmatmul.f32.vlgmr.msra.gmra.mxu3 %v2577_v24  ;;  %v7480_v24 = vld [vmem:[#allocation226_spill] sm:$0xff]  ;;  %v7485_v18 = vld [vmem:[#allocation251_spill] sm:$0xff] }
 0x5a1   :  { %2835 = vmatpush.msrb.mxu0 %v7423_v8  ;;  %2855 = vmatpush.msrb.mxu1 %v7424_v35  ;;  %v7483_v8 = vld [vmem:[#allocation209_spill] sm:$0xff] }
 0x5a2   :  { %2949 = vmatpush.msrb.mxu3 %v7428_v13  ;;  %2904 = vmatpush.msra.mxu2 %v7429_v10  ;;  %v7484_v35 = vld [vmem:[#allocation225_spill] sm:$0xff]  ;;  %v2583_v13 = vld.sshfl [vmem:[#allocation1] sm:$0xff pattern:$0x73625140]  ;;  %v7489_v10 = vld [vmem:[#allocation250_spill] sm:$0xff] }
 0x5a3   :  { %2836 = vmatpush.msrb.mxu0 %v7426_v41  ;;  %2856 = vmatpush.msrb.mxu1 %v7427_v11  ;;  %v7486_v41 = vld [vmem:[#allocation233_spill] sm:$0xff]  ;;  %v7487_v11 = vld [vmem:[#allocation208_spill] sm:$0xff] }
 0x5a4   :  { %2905 = vmatmul.f32.vlgmr.msra.gmra.mxu2 %v2578_v12  ;;  %2950 = vmatpush.msrb.mxu3 %v7432_v16  ;;  %v7488_v12 = vld [vmem:[#allocation224_spill] sm:$0xff]  ;;  %v7492_v16 = vld [vmem:[#allocation223_spill] sm:$0xff] }
 0x5a5   :  { %2837 = vmatpush.msrb.mxu0 %v7430_v14  ;;  %2857 = vmatpush.msrb.mxu1 %v7431_v15  ;;  %v7490_v14 = vld [vmem:[#allocation232_spill] sm:$0xff]  ;;  %v7491_v15 = vld [vmem:[#allocation207_spill] sm:$0xff] }
 0x5a6   :  { %2969 = vmatpush.msrb.mxu2 %v7435_v26  ;;  %2951 = vmatpush.msrb.mxu3 %v7436_v27  ;;  %v7495_v26 = vld [vmem:[#allocation222_spill] sm:$0xff]  ;;  %v2584_v27 = vld.sshfl [vmem:[#allocation1 + $0x8] sm:$0xff pattern:$0x73625140] }
 0x5a7   :  { %2838 = vmatpush.msrb.mxu0 %v7433_v9  ;;  %2858 = vmatpush.msrb.mxu1 %v7434_v25  ;;  %v7493_v9 = vld [vmem:[#allocation249_spill] sm:$0xff]  ;;  %v7494_v25 = vld [vmem:[#allocation206_spill] sm:$0xff] }
 0x5a8   :  { %2970 = vmatpush.msrb.mxu2 %v7439_v30  ;;  %2952 = vmatpush.msrb.mxu3 %v7440_v31  ;;  %v7498_v30 = vld [vmem:[#allocation205_spill] sm:$0xff] }
 0x5a9   :  { %2839 = vmatpush.msrb.mxu0 %v7437_v28  ;;  %2859 = vmatpush.msrb.mxu1 %v7438_v29  ;;  %v7496_v28 = vld [vmem:[#allocation311_spill] sm:$0xff]  ;;  %v7497_v29 = vld [vmem:[#allocation248_spill] sm:$0xff]  ;;  %v7499_v31 = vld [vmem:[#allocation221_spill] sm:$0xff] }
 0x5aa   :  { %2971 = vmatpush.msrb.mxu2 %v7443_v38  ;;  %2953 = vmatpush.msrb.mxu3 %v7444_v39  ;;  %v7502_v38 = vld [vmem:[#allocation220_spill] sm:$0xff]  ;;  %v7503_v39 = vld [vmem:[#allocation327_spill] sm:$0xff] }
 0x5ab   :  { %2840 = vmatpush.msrb.mxu0 %v7441_v32  ;;  %2860 = vmatpush.msrb.mxu1 %v7442_v37  ;;  %v7500_v32 = vld [vmem:[#allocation310_spill] sm:$0xff]  ;;  %v7501_v37 = vld [vmem:[#allocation204_spill] sm:$0xff] }
 0x5ac   :  { %2972 = vmatpush.msrb.mxu2 %v7447_v46  ;;  %2954 = vmatpush.msrb.mxu3 %v7448_v47  ;;  %v7506_v46 = vld [vmem:[#allocation219_spill] sm:$0xff]  ;;  %v7507_v47 = vld [vmem:[#allocation326_spill] sm:$0xff] }
 0x5ad   :  { %2841 = vmatpush.msrb.mxu0 %v7445_v40  ;;  %2861 = vmatpush.msrb.mxu1 %v7446_v45  ;;  %v7504_v40 = vld [vmem:[#allocation309_spill] sm:$0xff]  ;;  %v7505_v45 = vld [vmem:[#allocation203_spill] sm:$0xff] }
 0x5ae   :  { %2973 = vmatpush.msrb.mxu2 %v7451_v54  ;;  %2955 = vmatpush.msrb.mxu3 %v7452_v55  ;;  %v7510_v54 = vld [vmem:[#allocation218_spill] sm:$0xff]  ;;  %v7511_v55 = vld [vmem:[#allocation325_spill] sm:$0xff] }
 0x5af   :  { %2842 = vmatpush.msrb.mxu0 %v7449_v49  ;;  %2862 = vmatpush.msrb.mxu1 %v7450_v53  ;;  %v7508_v49 = vld [vmem:[#allocation308_spill] sm:$0xff]  ;;  %v7509_v53 = vld [vmem:[#allocation202_spill] sm:$0xff] }
 0x5b0   :  { %2974 = vmatpush.msrb.mxu2 %v7455_v61  ;;  %2956 = vmatpush.msrb.mxu3 %v7456_v62  ;;  %v7514_v61 = vld [vmem:[#allocation217_spill] sm:$0xff]  ;;  %v7515_v62 = vld [vmem:[#allocation324_spill] sm:$0xff] }
 0x5b1   :  { %2843 = vmatpush.msrb.mxu0 %v7453_v56  ;;  %2863 = vmatpush.msrb.mxu1 %v7454_v57  ;;  %v7512_v56 = vld [vmem:[#allocation307_spill] sm:$0xff]  ;;  %v7513_v57 = vld [vmem:[#allocation201_spill] sm:$0xff] }
 0x5b2   :  { %2975 = vmatpush.msrb.mxu2 %v7461_v22  ;;  %2957 = vmatpush.msrb.mxu3 %v7462_v4  ;;  %v7521_v22 = vld [vmem:[#allocation323_spill] sm:$0xff]  ;;  %v7522_v4 = vld [vmem:[#allocation305_spill] sm:$0xff] }
 0x5b3   :  { %2844 = vmatpush.msrb.mxu0 %v7457_v63  ;;  %2864 = vmatpush.msrb.mxu1 %v7458_v43  ;;  %v7516_v63 = vld [vmem:[#allocation306_spill] sm:$0xff]  ;;  %v7517_v43 = vld [vmem:[#allocation200_spill] sm:$0xff] }
 0x5b4   :  { %2845 = vmatmul.f32.vlgmr.msrb.gmra.mxu0 %v6467_v59  ;;  %2865 = vmatmul.f32.vlgmr.msrb.gmra.mxu1 %v6471_v21  ;;  %v7465_v59 = vld [vmem:[#allocation256_spill] sm:$0xff]  ;;  %v7466_v21 = vld [vmem:[#allocation238_spill] sm:$0xff] }
 0x5b5   :  { %2909 = vmatpush.msra.mxu0 %v7459_v17  ;;  %2929 = vmatpush.msra.mxu1 %v7460_v51  ;;  %v7518_v17 = vld [vmem:[#allocation216_spill] sm:$0xff]  ;;  %v7519_v51 = vld [vmem:[#allocation279_spill] sm:$0xff] }
 0x5b6   :  { %2976 = vmatpush.msrb.mxu2 %v7465_v59  ;;  %2958 = vmatpush.msrb.mxu3 %v7466_v21  ;;  %v7525_v59 = vld [vmem:[#allocation322_spill] sm:$0xff]  ;;  %v7526_v21 = vld [vmem:[#allocation304_spill] sm:$0xff] }
 0x5b7   :  { %2910 = vmatpush.msra.mxu0 %v7463_v34  ;;  %2930 = vmatpush.msra.mxu1 %v7464_v20  ;;  %v7523_v34 = vld [vmem:[#allocation278_spill] sm:$0xff] }
 0x5b8   :  { %2977 = vmatpush.msrb.mxu2 %v7469_v19  ;;  %2959 = vmatpush.msrb.mxu3 %v7470_v5  ;;  %v7524_v20 = vld [vmem:[#allocation294_spill] sm:$0xff]  ;;  %v7531_v19 = vld [vmem:[#allocation276_spill] sm:$0xff] }
 0x5b9   :  { %2911 = vmatpush.msra.mxu0 %v7467_v48  ;;  %2931 = vmatpush.msra.mxu1 %v7468_v6  ;;  %v7527_v48 = vld [vmem:[#allocation277_spill] sm:$0xff]  ;;  %v7530_v6 = vld [vmem:[#allocation303_spill] sm:$0xff]  ;;  %v7532_v5 = vld [vmem:[#allocation292_spill] sm:$0xff] }
 0x5ba   :  { %2978 = vmatpush.msrb.mxu2 %v7473_v0  ;;  %2960 = vmatpush.msrb.mxu3 %v7474_v60  ;;  %v7535_v0 = vld [vmem:[#allocation275_spill] sm:$0xff] }
 0x5bb   :  { %2912 = vmatpush.msra.mxu0 %v7471_v3  ;;  %2932 = vmatpush.msra.mxu1 %v7472_v2  ;;  %v7533_v3 = vld [vmem:[#allocation320_spill] sm:$0xff]  ;;  %v7534_v2 = vld [vmem:[#allocation302_spill] sm:$0xff]  ;;  %v7536_v60 = vld [vmem:[#allocation291_spill] sm:$0xff] }
 0x5bc   :  { %2979 = vmatpush.msrb.mxu2 %v7477_v1  ;;  %2961 = vmatpush.msrb.mxu3 %v7478_v33  ;;  %v7539_v1 = vld [vmem:[#allocation274_spill] sm:$0xff] }
 0x5bd   :  { %2913 = vmatpush.msra.mxu0 %v7475_v50  ;;  %2933 = vmatpush.msra.mxu1 %v7476_v52  ;;  %v7537_v50 = vld [vmem:[#allocation319_spill] sm:$0xff]  ;;  %v7538_v52 = vld [vmem:[#allocation301_spill] sm:$0xff]  ;;  %v7540_v33 = vld [vmem:[#allocation290_spill] sm:$0xff] }
 0x5be   :  { %2980 = vmatpush.msrb.mxu2 %v7481_v36  ;;  %2962 = vmatpush.msrb.mxu3 %v7482_v44  ;;  %v7543_v36 = vld [vmem:[#allocation273_spill] sm:$0xff] }
 0x5bf   :  { %2914 = vmatpush.msra.mxu0 %v7479_v23  ;;  %2934 = vmatpush.msra.mxu1 %v7480_v24  ;;  %v7541_v23 = vld [vmem:[#allocation318_spill] sm:$0xff]  ;;  %v7542_v24 = vld [vmem:[#allocation300_spill] sm:$0xff]  ;;  %v7544_v44 = vld [vmem:[#allocation289_spill] sm:$0xff] }
 0x5c0   :  { %2981 = vmatpush.msrb.mxu2 %v7485_v18  ;;  %2963 = vmatpush.msrb.mxu3 %v7486_v41  ;;  %v7547_v18 = vld [vmem:[#allocation272_spill] sm:$0xff] }
 0x5c1   :  { %2915 = vmatpush.msra.mxu0 %v7483_v8  ;;  %2935 = vmatpush.msra.mxu1 %v7484_v35  ;;  %v7545_v8 = vld [vmem:[#allocation317_spill] sm:$0xff]  ;;  %v7546_v35 = vld [vmem:[#allocation299_spill] sm:$0xff]  ;;  %v7548_v41 = vld [vmem:[#allocation288_spill] sm:$0xff] }
 0x5c2   :  { %2982 = vmatpush.msrb.mxu2 %v7489_v10  ;;  %2964 = vmatpush.msrb.mxu3 %v7490_v14  ;;  %v7552_v10 = vld [vmem:[#allocation287_spill] sm:$0xff] }
 0x5c3   :  { %2916 = vmatpush.msra.mxu0 %v7487_v11  ;;  %2936 = vmatpush.msra.mxu1 %v7488_v12  ;;  %v7549_v11 = vld [vmem:[#allocation316_spill] sm:$0xff]  ;;  %v7550_v12 = vld [vmem:[#allocation298_spill] sm:$0xff]  ;;  %v7553_v14 = vld [vmem:[#allocation315_spill] sm:$0xff] }
 0x5c4   :  { %2983 = vmatpush.msrb.mxu2 %v7493_v9  ;;  %2965 = vmatmul.f32.vlgmr.msrb.gmra.mxu3 %v2583_v13  ;;  %v7551_v13 = vld [vmem:[#allocation271_spill] sm:$0xff]  ;;  %v7556_v9 = vld [vmem:[#allocation286_spill] sm:$0xff] }
 0x5c5   :  { %2917 = vmatpush.msra.mxu0 %v7491_v15  ;;  %2937 = vmatpush.msra.mxu1 %v7492_v16  ;;  %v7554_v15 = vld [vmem:[#allocation297_spill] sm:$0xff]  ;;  %v7555_v16 = vld [vmem:[#allocation270_spill] sm:$0xff] }
 0x5c6   :  { %3029 = vmatpush.msra.mxu3 %v7496_v28  ;;  %2984 = vmatpush.msrb.mxu2 %v7497_v29  ;;  %v2585_v28 = vld.sshfl [vmem:[#allocation1 + $0x10] sm:$0xff pattern:$0x73625140] }
 0x5c7   :  { %2918 = vmatpush.msra.mxu0 %v7494_v25  ;;  %2938 = vmatpush.msra.mxu1 %v7495_v26  ;;  %v2587_v25 = vld.sshfl [vmem:[#allocation1 + $0x20] sm:$0xff pattern:$0x73625140]  ;;  %v7557_v26 = vld [vmem:[#allocation314_spill] sm:$0xff]  ;;  %v7559_v29 = vld [vmem:[#allocation269_spill] sm:$0xff] }
 0x5c8   :  { %2985 = vmatmul.f32.vlgmr.msrb.gmra.mxu2 %v2584_v27  ;;  %3030 = vmatpush.msra.mxu3 %v7500_v32  ;;  %v7558_v27 = vld [vmem:[#allocation296_spill] sm:$0xff]  ;;  %v2066_v32 = vld [vmem:[#allocation2 + $0x30] sm:$0xff] }
 0x5c9   :  { %2919 = vmatpush.msra.mxu0 %v7498_v30  ;;  %2939 = vmatpush.msra.mxu1 %v7499_v31  ;;  %v7560_v30 = vld [vmem:[#allocation285_spill] sm:$0xff]  ;;  %v2586_v31 = vld.sshfl [vmem:[#allocation1 + $0x18] sm:$0xff pattern:$0x73625140] }
 0x5ca   :  { %3049 = vmatpush.msra.mxu2 %v7503_v39  ;;  %3031 = vmatpush.msra.mxu3 %v7504_v40  ;;  %2591 = vst [vmem:[#allocation1] ss:$4 sm:$0xff] %v2066_v32  ;;  %v7563_v39 = vld [vmem:[#allocation284_spill] sm:$0xff]  ;;  %v2067_v32 = vld [vmem:[#allocation2 + $0x38] sm:$0xf] }
 0x5cb   :  { %2920 = vmatpush.msra.mxu0 %v7501_v37  ;;  %2940 = vmatpush.msra.mxu1 %v7502_v38  ;;  %v7561_v37 = vld [vmem:[#allocation313_spill] sm:$0xff]  ;;  %v7562_v38 = vld [vmem:[#allocation268_spill] sm:$0xff] }
 0x5cc   :  { %3050 = vmatpush.msra.mxu2 %v7507_v47  ;;  %3032 = vmatpush.msra.mxu3 %v7508_v49  ;;  %v2588_v40 = vld.sshfl [vmem:[#allocation1 + $0x28] sm:$0xff pattern:$0x73625140]  ;;  %v7566_v47 = vld [vmem:[#allocation267_spill] sm:$0xff] }
 0x5cd   :  { %2921 = vmatpush.msra.mxu0 %v7505_v45  ;;  %2941 = vmatpush.msra.mxu1 %v7506_v46  ;;  %v7564_v45 = vld [vmem:[#allocation375_spill] sm:$0xff]  ;;  %v7565_v46 = vld [vmem:[#allocation312_spill] sm:$0xff] }
 0x5ce   :  { %3051 = vmatpush.msra.mxu2 %v7511_v55  ;;  %3033 = vmatpush.msra.mxu3 %v7512_v56  ;;  %v7567_v49 = vld [vmem:[#allocation283_spill] sm:$0xff]  ;;  %v7570_v55 = vld [vmem:[#allocation282_spill] sm:$0xff] }
 0x5cf   :  { %2922 = vmatpush.msra.mxu0 %v7509_v53  ;;  %2942 = vmatpush.msra.mxu1 %v7510_v54  ;;  %v7568_v53 = vld [vmem:[#allocation374_spill] sm:$0xff]  ;;  %v7571_v56 = vld [vmem:[#allocation391_spill] sm:$0xff] }
 0x5d0   :  { %3052 = vmatpush.msra.mxu2 %v7515_v62  ;;  %3034 = vmatpush.msra.mxu3 %v7516_v63  ;;  %v7569_v54 = vld [vmem:[#allocation266_spill] sm:$0xff]  ;;  %v7574_v62 = vld [vmem:[#allocation281_spill] sm:$0xff] }
 0x5d1   :  { %2923 = vmatpush.msra.mxu0 %v7513_v57  ;;  %2943 = vmatpush.msra.mxu1 %v7514_v61  ;;  %v7572_v57 = vld [vmem:[#allocation373_spill] sm:$0xff]  ;;  %v7575_v63 = vld [vmem:[#allocation390_spill] sm:$0xff] }
 0x5d2   :  { %3053 = vmatpush.msra.mxu2 %v7521_v22  ;;  %3035 = vmatpush.msra.mxu3 %v7522_v4  ;;  %v7573_v61 = vld [vmem:[#allocation265_spill] sm:$0xff]  ;;  %v7580_v22 = vld [vmem:[#allocation359_spill] sm:$0xff] }
 0x5d3   :  { %2924 = vmatpush.msra.mxu0 %v7517_v43  ;;  %2944 = vmatpush.msra.mxu1 %v7518_v17  ;;  %v7576_v43 = vld [vmem:[#allocation372_spill] sm:$0xff]  ;;  %v7581_v4 = vld [vmem:[#allocation389_spill] sm:$0xff] }
 0x5d4   :  { %2925 = vmatmul.f32.vlgmr.msra.gmra.mxu0 %v6533_v42  ;;  %2945 = vmatmul.f32.vlgmr.msra.gmra.mxu1 %v6537_v7  ;;  %v7528_v42 = vld [vmem:[#allocation293_spill] sm:$0xff]  ;;  %v7577_v17 = vld [vmem:[#allocation264_spill] sm:$0xff] }
 0x5d5   :  { %2989 = vmatpush.msrb.mxu0 %v7519_v51  ;;  %3009 = vmatpush.msrb.mxu1 %v7520_v58  ;;  %v7529_v7 = vld [vmem:[#allocation321_spill] sm:$0xff]  ;;  %v7578_v51 = vld [vmem:[#allocation280_spill] sm:$0xff]  ;;  %v7579_v58 = vld [vmem:[#allocation343_spill] sm:$0xff] }
 0x5d6   :  { %3054 = vmatpush.msra.mxu2 %v7525_v59  ;;  %3036 = vmatpush.msra.mxu3 %v7526_v21  ;;  %v7584_v59 = vld [vmem:[#allocation358_spill] sm:$0xff]  ;;  %v7585_v21 = vld [vmem:[#allocation388_spill] sm:$0xff] }
 0x5d7   :  { %2990 = vmatpush.msrb.mxu0 %v7523_v34  ;;  %3010 = vmatpush.msrb.mxu1 %v7524_v20  ;;  %v7582_v34 = vld [vmem:[#allocation371_spill] sm:$0xff]  ;;  %v7583_v20 = vld [vmem:[#allocation342_spill] sm:$0xff] }
 0x5d8   :  { %3055 = vmatpush.msra.mxu2 %v7529_v7  ;;  %3037 = vmatpush.msra.mxu3 %v7530_v6  ;;  %v7588_v7 = vld [vmem:[#allocation357_spill] sm:$0xff]  ;;  %v7589_v6 = vld [vmem:[#allocation387_spill] sm:$0xff] }
 0x5d9   :  { %2991 = vmatpush.msrb.mxu0 %v7527_v48  ;;  %3011 = vmatpush.msrb.mxu1 %v7528_v42  ;;  %v7586_v48 = vld [vmem:[#allocation370_spill] sm:$0xff]  ;;  %v7587_v42 = vld [vmem:[#allocation341_spill] sm:$0xff] }
 0x5da   :  { %3056 = vmatpush.msra.mxu2 %v7533_v3  ;;  %3038 = vmatpush.msra.mxu3 %v7534_v2  ;;  %v7592_v3 = vld [vmem:[#allocation356_spill] sm:$0xff]  ;;  %v7593_v2 = vld [vmem:[#allocation386_spill] sm:$0xff] }
 0x5db   :  { %2992 = vmatpush.msrb.mxu0 %v7531_v19  ;;  %3012 = vmatpush.msrb.mxu1 %v7532_v5  ;;  %v7590_v19 = vld [vmem:[#allocation369_spill] sm:$0xff]  ;;  %v7591_v5 = vld [vmem:[#allocation340_spill] sm:$0xff] }
 0x5dc   :  { %3057 = vmatpush.msra.mxu2 %v7537_v50  ;;  %3039 = vmatpush.msra.mxu3 %v7538_v52  ;;  %v7596_v50 = vld [vmem:[#allocation355_spill] sm:$0xff]  ;;  %v7597_v52 = vld [vmem:[#allocation385_spill] sm:$0xff] }
 0x5dd   :  { %2993 = vmatpush.msrb.mxu0 %v7535_v0  ;;  %3013 = vmatpush.msrb.mxu1 %v7536_v60  ;;  %v7594_v0 = vld [vmem:[#allocation368_spill] sm:$0xff]  ;;  %v7595_v60 = vld [vmem:[#allocation339_spill] sm:$0xff] }
 0x5de   :  { %3058 = vmatpush.msra.mxu2 %v7541_v23  ;;  %3040 = vmatpush.msra.mxu3 %v7542_v24  ;;  %v7600_v23 = vld [vmem:[#allocation354_spill] sm:$0xff]  ;;  %v7601_v24 = vld [vmem:[#allocation384_spill] sm:$0xff] }
 0x5df   :  { %2994 = vmatpush.msrb.mxu0 %v7539_v1  ;;  %3014 = vmatpush.msrb.mxu1 %v7540_v33  ;;  %v7598_v1 = vld [vmem:[#allocation367_spill] sm:$0xff]  ;;  %v7599_v33 = vld [vmem:[#allocation338_spill] sm:$0xff] }
 0x5e0   :  { %3059 = vmatpush.msra.mxu2 %v7545_v8  ;;  %3041 = vmatpush.msra.mxu3 %v7546_v35  ;;  %v7604_v8 = vld [vmem:[#allocation353_spill] sm:$0xff]  ;;  %v7605_v35 = vld [vmem:[#allocation383_spill] sm:$0xff] }
 0x5e1   :  { %2995 = vmatpush.msrb.mxu0 %v7543_v36  ;;  %3015 = vmatpush.msrb.mxu1 %v7544_v44  ;;  %v7602_v36 = vld [vmem:[#allocation366_spill] sm:$0xff]  ;;  %v7603_v44 = vld [vmem:[#allocation337_spill] sm:$0xff] }
 0x5e2   :  { %3060 = vmatpush.msra.mxu2 %v7549_v11  ;;  %3042 = vmatpush.msra.mxu3 %v7550_v12  ;;  %v7608_v11 = vld [vmem:[#allocation352_spill] sm:$0xff]  ;;  %v7609_v12 = vld [vmem:[#allocation382_spill] sm:$0xff] }
 0x5e3   :  { %2996 = vmatpush.msrb.mxu0 %v7547_v18  ;;  %3016 = vmatpush.msrb.mxu1 %v7548_v41  ;;  %v7606_v18 = vld [vmem:[#allocation365_spill] sm:$0xff]  ;;  %v7607_v41 = vld [vmem:[#allocation336_spill] sm:$0xff] }
 0x5e4   :  { %3061 = vmatpush.msra.mxu2 %v7553_v14  ;;  %3043 = vmatpush.msra.mxu3 %v7554_v15  ;;  %v7612_v14 = vld [vmem:[#allocation351_spill] sm:$0xff]  ;;  %v7613_v15 = vld [vmem:[#allocation381_spill] sm:$0xff] }
 0x5e5   :  { %2997 = vmatpush.msrb.mxu0 %v7551_v13  ;;  %3017 = vmatpush.msrb.mxu1 %v7552_v10  ;;  %v7610_v13 = vld [vmem:[#allocation364_spill] sm:$0xff]  ;;  %v7611_v10 = vld [vmem:[#allocation335_spill] sm:$0xff] }
 0x5e6   :  { %3062 = vmatpush.msra.mxu2 %v7557_v26  ;;  %3044 = vmatpush.msra.mxu3 %v7558_v27  ;;  %v7617_v26 = vld [vmem:[#allocation380_spill] sm:$0xff]  ;;  %v7618_v27 = vld [vmem:[#allocation362_spill] sm:$0xff] }
 0x5e7   :  { %2998 = vmatpush.msrb.mxu0 %v7555_v16  ;;  %3018 = vmatpush.msrb.mxu1 %v7556_v9  ;;  %v7614_v16 = vld [vmem:[#allocation363_spill] sm:$0xff]  ;;  %v7615_v9 = vld [vmem:[#allocation334_spill] sm:$0xff] }
 0x5e8   :  { %3063 = vmatpush.msra.mxu2 %v7561_v37  ;;  %3045 = vmatmul.f32.vlgmr.msra.gmra.mxu3 %v2587_v25  ;;  %v7616_v25 = vld [vmem:[#allocation350_spill] sm:$0xff]  ;;  %v7621_v37 = vld [vmem:[#allocation379_spill] sm:$0xff] }
 0x5e9   :  { %2999 = vmatpush.msrb.mxu0 %v7559_v29  ;;  %3019 = vmatpush.msrb.mxu1 %v7560_v30  ;;  %v7619_v29 = vld [vmem:[#allocation333_spill] sm:$0xff] }
 0x5ea   :  { %3109 = vmatpush.msrb.mxu3 %v7564_v45  ;;  %3064 = vmatpush.msra.mxu2 %v7565_v46  ;;  %v7620_v30 = vld [vmem:[#allocation349_spill] sm:$0xff]  ;;  %v2593_v45 = vld.sshfl [vmem:[#allocation1] sm:$0xff pattern:$0x73625140]  ;;  %v7625_v46 = vld [vmem:[#allocation378_spill] sm:$0xff] }
 0x5eb   :  { %3000 = vmatpush.msrb.mxu0 %v7562_v38  ;;  %3020 = vmatpush.msrb.mxu1 %v7563_v39  ;;  %v7622_v38 = vld [vmem:[#allocation361_spill] sm:$0xff]  ;;  %v7623_v39 = vld [vmem:[#allocation332_spill] sm:$0xff] }
 0x5ec   :  { %3065 = vmatmul.f32.vlgmr.msra.gmra.mxu2 %v2588_v40  ;;  %3110 = vmatpush.msrb.mxu3 %v7568_v53  ;;  %v7624_v40 = vld [vmem:[#allocation348_spill] sm:$0xff]  ;;  %v7628_v53 = vld [vmem:[#allocation347_spill] sm:$0xff] }
 0x5ed   :  { %3001 = vmatpush.msrb.mxu0 %v7566_v47  ;;  %3021 = vmatpush.msrb.mxu1 %v7567_v49  ;;  %v7626_v47 = vld [vmem:[#allocation360_spill] sm:$0xff]  ;;  %v7627_v49 = vld [vmem:[#allocation331_spill] sm:$0xff] }
 0x5ee   :  { %3129 = vmatpush.msrb.mxu2 %v7571_v56  ;;  %3111 = vmatpush.msrb.mxu3 %v7572_v57  ;;  %v7631_v56 = vld [vmem:[#allocation346_spill] sm:$0xff]  ;;  %v2594_v57 = vld.sshfl [vmem:[#allocation1 + $0x8] sm:$0xff pattern:$0x73625140] }
 0x5ef   :  { %3002 = vmatpush.msrb.mxu0 %v7569_v54  ;;  %3022 = vmatpush.msrb.mxu1 %v7570_v55  ;;  %v7629_v54 = vld [vmem:[#allocation377_spill] sm:$0xff]  ;;  %v7630_v55 = vld [vmem:[#allocation330_spill] sm:$0xff] }
 0x5f0   :  { %3130 = vmatpush.msrb.mxu2 %v7575_v63  ;;  %3112 = vmatpush.msrb.mxu3 %v7576_v43  ;;  %v7634_v63 = vld [vmem:[#allocation329_spill] sm:$0xff] }
 0x5f1   :  { %3003 = vmatpush.msrb.mxu0 %v7573_v61  ;;  %3023 = vmatpush.msrb.mxu1 %v7574_v62  ;;  %v7632_v61 = vld [vmem:[#allocation439_spill] sm:$0xff]  ;;  %v7633_v62 = vld [vmem:[#allocation376_spill] sm:$0xff]  ;;  %v7635_v43 = vld [vmem:[#allocation345_spill] sm:$0xff] }
 0x5f2   :  { %3131 = vmatpush.msrb.mxu2 %v7581_v4  ;;  %3113 = vmatpush.msrb.mxu3 %v7582_v34  ;;  %v7640_v4 = vld [vmem:[#allocation407_spill] sm:$0xff] }
 0x5f3   :  { %3004 = vmatpush.msrb.mxu0 %v7577_v17  ;;  %3024 = vmatpush.msrb.mxu1 %v7578_v51  ;;  %v7636_v17 = vld [vmem:[#allocation438_spill] sm:$0xff]  ;;  %v7637_v51 = vld [vmem:[#allocation328_spill] sm:$0xff]  ;;  %v7641_v34 = vld [vmem:[#allocation423_spill] sm:$0xff] }
 0x5f4   :  { %3005 = vmatmul.f32.vlgmr.msrb.gmra.mxu0 %v2585_v28  ;;  %3025 = vmatmul.f32.vlgmr.msrb.gmra.mxu1 %v2586_v31  ;;  %v2589_v28 = vld.sshfl [vmem:[#allocation1 + $0x30] sm:$0xff pattern:$0x73625140]  ;;  %v2590_v31 = vld.sshfl [vmem:[#allocation1 + $0x38] sm:$0xff pattern:$0x73625140] }
 0x5f5   :  { %3069 = vmatpush.msra.mxu0 %v7579_v58  ;;  %3089 = vmatpush.msra.mxu1 %v7580_v22  ;;  %2592 = vst [vmem:[#allocation1 + $0x20] ss:$4 sm:$0xff] %v2067_v32  ;;  %v7638_v58 = vld [vmem:[#allocation455_spill] sm:$0xff]  ;;  %v7639_v22 = vld [vmem:[#allocation344_spill] sm:$0xff] }
 0x5f6   :  { %3132 = vmatpush.msrb.mxu2 %v7585_v21  ;;  %3114 = vmatpush.msrb.mxu3 %v7586_v48  ;;  %v7644_v21 = vld [vmem:[#allocation454_spill] sm:$0xff]  ;;  %v7682_v32 = vld [vmem:[#allocation427_spill] sm:$0xff] }
 0x5f7   :  { %3070 = vmatpush.msra.mxu0 %v7583_v20  ;;  %3090 = vmatpush.msra.mxu1 %v7584_v59  ;;  %v7642_v20 = vld [vmem:[#allocation437_spill] sm:$0xff]  ;;  %v7643_v59 = vld [vmem:[#allocation406_spill] sm:$0xff] }
 0x5f8   :  { %3133 = vmatpush.msrb.mxu2 %v7589_v6  ;;  %3115 = vmatpush.msrb.mxu3 %v7590_v19  ;;  %v7645_v48 = vld [vmem:[#allocation422_spill] sm:$0xff]  ;;  %v7648_v6 = vld [vmem:[#allocation453_spill] sm:$0xff] }
 0x5f9   :  { %3071 = vmatpush.msra.mxu0 %v7587_v42  ;;  %3091 = vmatpush.msra.mxu1 %v7588_v7  ;;  %v7646_v42 = vld [vmem:[#allocation436_spill] sm:$0xff]  ;;  %v7647_v7 = vld [vmem:[#allocation405_spill] sm:$0xff] }
 0x5fa   :  { %3134 = vmatpush.msrb.mxu2 %v7593_v2  ;;  %3116 = vmatpush.msrb.mxu3 %v7594_v0  ;;  %v7649_v19 = vld [vmem:[#allocation421_spill] sm:$0xff]  ;;  %v7652_v2 = vld [vmem:[#allocation452_spill] sm:$0xff] }
 0x5fb   :  { %3072 = vmatpush.msra.mxu0 %v7591_v5  ;;  %3092 = vmatpush.msra.mxu1 %v7592_v3  ;;  %v7650_v5 = vld [vmem:[#allocation435_spill] sm:$0xff]  ;;  %v7651_v3 = vld [vmem:[#allocation404_spill] sm:$0xff] }
 0x5fc   :  { %3135 = vmatpush.msrb.mxu2 %v7597_v52  ;;  %3117 = vmatpush.msrb.mxu3 %v7598_v1  ;;  %v7653_v0 = vld [vmem:[#allocation420_spill] sm:$0xff]  ;;  %v7656_v52 = vld [vmem:[#allocation451_spill] sm:$0xff] }
 0x5fd   :  { %3073 = vmatpush.msra.mxu0 %v7595_v60  ;;  %3093 = vmatpush.msra.mxu1 %v7596_v50  ;;  %v7654_v60 = vld [vmem:[#allocation434_spill] sm:$0xff]  ;;  %v7655_v50 = vld [vmem:[#allocation403_spill] sm:$0xff] }
 0x5fe   :  { %3136 = vmatpush.msrb.mxu2 %v7601_v24  ;;  %3118 = vmatpush.msrb.mxu3 %v7602_v36  ;;  %v7657_v1 = vld [vmem:[#allocation419_spill] sm:$0xff]  ;;  %v7660_v24 = vld [vmem:[#allocation450_spill] sm:$0xff] }
 0x5ff   :  { %3074 = vmatpush.msra.mxu0 %v7599_v33  ;;  %3094 = vmatpush.msra.mxu1 %v7600_v23  ;;  %v7658_v33 = vld [vmem:[#allocation433_spill] sm:$0xff]  ;;  %v7659_v23 = vld [vmem:[#allocation402_spill] sm:$0xff] }
 0x600   :  { %3137 = vmatpush.msrb.mxu2 %v7605_v35  ;;  %3119 = vmatpush.msrb.mxu3 %v7606_v18  ;;  %v7661_v36 = vld [vmem:[#allocation418_spill] sm:$0xff]  ;;  %v7664_v35 = vld [vmem:[#allocation449_spill] sm:$0xff] }
 0x601   :  { %3075 = vmatpush.msra.mxu0 %v7603_v44  ;;  %3095 = vmatpush.msra.mxu1 %v7604_v8  ;;  %v7662_v44 = vld [vmem:[#allocation432_spill] sm:$0xff]  ;;  %v7663_v8 = vld [vmem:[#allocation401_spill] sm:$0xff] }
 0x602   :  { %3138 = vmatpush.msrb.mxu2 %v7609_v12  ;;  %3120 = vmatpush.msrb.mxu3 %v7610_v13  ;;  %v7665_v18 = vld [vmem:[#allocation417_spill] sm:$0xff]  ;;  %v7668_v12 = vld [vmem:[#allocation448_spill] sm:$0xff] }
 0x603   :  { %3076 = vmatpush.msra.mxu0 %v7607_v41  ;;  %3096 = vmatpush.msra.mxu1 %v7608_v11  ;;  %v7666_v41 = vld [vmem:[#allocation431_spill] sm:$0xff]  ;;  %v7667_v11 = vld [vmem:[#allocation400_spill] sm:$0xff] }
 0x604   :  { %3139 = vmatpush.msrb.mxu2 %v7613_v15  ;;  %3121 = vmatpush.msrb.mxu3 %v7614_v16  ;;  %v7669_v13 = vld [vmem:[#allocation416_spill] sm:$0xff]  ;;  %v7672_v15 = vld [vmem:[#allocation447_spill] sm:$0xff] }
 0x605   :  { %3077 = vmatpush.msra.mxu0 %v7611_v10  ;;  %3097 = vmatpush.msra.mxu1 %v7612_v14  ;;  %v7670_v10 = vld [vmem:[#allocation430_spill] sm:$0xff]  ;;  %v7671_v14 = vld [vmem:[#allocation399_spill] sm:$0xff] }
 0x606   :  { %3140 = vmatpush.msrb.mxu2 %v7617_v26  ;;  %3122 = vmatpush.msrb.mxu3 %v7618_v27  ;;  %v7673_v16 = vld [vmem:[#allocation415_spill] sm:$0xff]  ;;  %v7676_v26 = vld [vmem:[#allocation446_spill] sm:$0xff] }
 0x607   :  { %3078 = vmatpush.msra.mxu0 %v7615_v9  ;;  %3098 = vmatpush.msra.mxu1 %v7616_v25  ;;  %v7674_v9 = vld [vmem:[#allocation429_spill] sm:$0xff]  ;;  %v7675_v25 = vld [vmem:[#allocation398_spill] sm:$0xff] }
 0x608   :  { %3141 = vmatpush.msrb.mxu2 %v7621_v37  ;;  %3123 = vmatpush.msrb.mxu3 %v7622_v38  ;;  %v7677_v27 = vld [vmem:[#allocation414_spill] sm:$0xff]  ;;  %v7683_v37 = vld [vmem:[#allocation396_spill] sm:$0xff] }
 0x609   :  { %3079 = vmatpush.msra.mxu0 %v7619_v29  ;;  %3099 = vmatpush.msra.mxu1 %v7620_v30  ;;  %v7679_v29 = vld [vmem:[#allocation397_spill] sm:$0xff]  ;;  %v7684_v38 = vld [vmem:[#allocation444_spill] sm:$0xff] }
 0x60a   :  { %3142 = vmatpush.msrb.mxu2 %v7625_v46  ;;  %3124 = vmatpush.msrb.mxu3 %v7626_v47  ;;  %v7680_v30 = vld [vmem:[#allocation445_spill] sm:$0xff]  ;;  %v7688_v46 = vld [vmem:[#allocation443_spill] sm:$0xff] }
 0x60b   :  { %3080 = vmatpush.msra.mxu0 %v7623_v39  ;;  %3100 = vmatpush.msra.mxu1 %v7624_v40  ;;  %v7685_v39 = vld [vmem:[#allocation412_spill] sm:$0xff]  ;;  %v7686_v40 = vld [vmem:[#allocation426_spill] sm:$0xff]  ;;  %v7689_v47 = vld [vmem:[#allocation411_spill] sm:$0xff] }
 0x60c   :  { %3143 = vmatpush.msrb.mxu2 %v7629_v54  ;;  %3125 = vmatmul.f32.vlgmr.msrb.gmra.mxu3 %v2593_v45  ;;  %v7687_v45 = vld [vmem:[#allocation395_spill] sm:$0xff]  ;;  %v7692_v54 = vld [vmem:[#allocation442_spill] sm:$0xff] }
 0x60d   :  { %3081 = vmatpush.msra.mxu0 %v7627_v49  ;;  %3101 = vmatpush.msra.mxu1 %v7628_v53  ;;  %v7690_v49 = vld [vmem:[#allocation425_spill] sm:$0xff]  ;;  %v7691_v53 = vld [vmem:[#allocation394_spill] sm:$0xff] }
 0x60e   :  { %3189 = vmatpush.msra.mxu3 %v7632_v61  ;;  %3144 = vmatpush.msrb.mxu2 %v7633_v62  ;;  %v7695_v61 = vld [vmem:[#allocation393_spill] sm:$0xff] }
 0x60f   :  { %3082 = vmatpush.msra.mxu0 %v7630_v55  ;;  %3102 = vmatpush.msra.mxu1 %v7631_v56  ;;  %v2597_v55 = vld.sshfl [vmem:[#allocation1 + $0x20] sm:$0xff pattern:$0x73625140]  ;;  %v7693_v56 = vld [vmem:[#allocation410_spill] sm:$0xff]  ;;  %v7696_v62 = vld [vmem:[#allocation441_spill] sm:$0xff] }
 0x610   :  { %3145 = vmatmul.f32.vlgmr.msrb.gmra.mxu2 %v2594_v57  ;;  %3190 = vmatpush.msra.mxu3 %v7636_v17  ;;  %v7694_v57 = vld [vmem:[#allocation424_spill] sm:$0xff]  ;;  %v7697_v17 = vld [vmem:[#allocation409_spill] sm:$0xff] }
 0x611   :  { %3083 = vmatpush.msra.mxu0 %v7634_v63  ;;  %3103 = vmatpush.msra.mxu1 %v7635_v43  ;;  %v2595_v63 = vld.sshfl [vmem:[#allocation1 + $0x10] sm:$0xff pattern:$0x73625140]  ;;  %v2598_v43 = vld.sshfl [vmem:[#allocation1 + $0x28] sm:$0xff pattern:$0x73625140] }
 0x612   :  { %3209 = vmatpush.msra.mxu2 %v7638_v58  ;;  %3191 = vmatpush.msra.mxu3 %v7642_v20  ;;  %v7699_v58 = vld [vmem:[#allocation440_spill] sm:$0xff]  ;;  %v3318_v20 = vld [vmem:[%s6799_s9] ss:$0 sm:$0xff] }
 0x613   :  { %3084 = vmatpush.msra.mxu0 %v7637_v51  ;;  %3104 = vmatpush.msra.mxu1 %v7639_v22  ;;  %v7698_v51 = vld [vmem:[#allocation392_spill] sm:$0xff]  ;;  %v2596_v22 = vld.sshfl [vmem:[#allocation1 + $0x18] sm:$0xff pattern:$0x73625140] }
 0x614   :  { %3085 = vmatmul.f32.vlgmr.msra.gmra.mxu0 %v2589_v28  ;;  %3105 = vmatmul.f32.vlgmr.msra.gmra.mxu1 %v2590_v31  ;;  %v7678_v28 = vld [vmem:[#allocation428_spill] sm:$0xff]  ;;  %v7681_v31 = vld [vmem:[#allocation413_spill] sm:$0xff] }
 0x615   :  { %3149 = vmatpush.msrb.mxu0 %v7640_v4  ;;  %3169 = vmatpush.msrb.mxu1 %v7641_v34  ;;  %v7700_v4 = vld [vmem:[#allocation408_spill] sm:$0xff]  ;;  %v2646_v34 = vpop.f32.mrf.mxu0 }
 0x616   :  { %3210 = vmatpush.msra.mxu2 %v7644_v21  ;;  %3192 = vmatpush.msra.mxu3 %v7646_v42  ;;  %v2647_v21 = vadd.f32 %v3318_v20, %v2646_v34  ;;  %v3320_v20 = vld [vmem:[#allocation5] ss:$0 sm:$0xff] }
 0x617   :  { %3150 = vmatpush.msrb.mxu0 %v7643_v59  ;;  %3170 = vmatpush.msrb.mxu1 %v7645_v48  ;;  %v2666_v59 = vpop.f32.mrf.mxu1 }
 0x618   :  { %3211 = vmatpush.msra.mxu2 %v7648_v6  ;;  %3193 = vmatpush.msra.mxu3 %v7650_v5  ;;  %v2667_v48 = vadd.f32 %v2666_v59, %v2647_v21  ;;  %v2726_v5 = vpop.f32.mrf.mxu3 }
 0x619   :  { %3151 = vmatpush.msrb.mxu0 %v7647_v7  ;;  %3171 = vmatpush.msrb.mxu1 %v7649_v19 }
 0x61a   :  { %3212 = vmatpush.msra.mxu2 %v7652_v2  ;;  %3194 = vmatpush.msra.mxu3 %v7654_v60  ;;  %v2746_v2 = vpop.f32.mrf.mxu2 }
 0x61b   :  { %3152 = vmatpush.msrb.mxu0 %v7651_v3  ;;  %3172 = vmatpush.msrb.mxu1 %v7653_v0 }
 0x61c   :  { %3213 = vmatpush.msra.mxu2 %v7656_v52  ;;  %3195 = vmatpush.msra.mxu3 %v7658_v33 }
 0x61d   :  { %3153 = vmatpush.msrb.mxu0 %v7655_v50  ;;  %3173 = vmatpush.msrb.mxu1 %v7657_v1  ;;  %v2686_v42 = vpop.f32.mrf.mxu0 }
 0x61e   :  { %3214 = vmatpush.msra.mxu2 %v7660_v24  ;;  %3196 = vmatpush.msra.mxu3 %v7662_v44  ;;  %v2687_v7 = vadd.f32 %v2686_v42, %v2667_v48 }
 0x61f   :  { %3154 = vmatpush.msrb.mxu0 %v7659_v23  ;;  %3174 = vmatpush.msrb.mxu1 %v7661_v36  ;;  %v2706_v6 = vpop.f32.mrf.mxu1 }
 0x620   :  { %3215 = vmatpush.msra.mxu2 %v7664_v35  ;;  %3197 = vmatpush.msra.mxu3 %v7666_v41  ;;  %v2707_v19 = vadd.f32 %v2706_v6, %v2687_v7  ;;  %v2806_v33 = vpop.f32.mrf.mxu3 }
 0x621   :  { %3155 = vmatpush.msrb.mxu0 %v7663_v8  ;;  %3175 = vmatpush.msrb.mxu1 %v7665_v18 }
 0x622   :  { %3216 = vmatpush.msra.mxu2 %v7668_v12  ;;  %3198 = vmatpush.msra.mxu3 %v7670_v10  ;;  %v2727_v3 = vadd.f32 %v2726_v5, %v2707_v19  ;;  %v2826_v24 = vpop.f32.mrf.mxu2 }
 0x623   :  { %3156 = vmatpush.msrb.mxu0 %v7667_v11  ;;  %3176 = vmatpush.msrb.mxu1 %v7669_v13 }
 0x624   :  { %3217 = vmatpush.msra.mxu2 %v7672_v15  ;;  %3199 = vmatpush.msra.mxu3 %v7674_v9  ;;  %v2747_v60 = vadd.f32 %v2746_v2, %v2727_v3 }
 0x625   :  { %3157 = vmatpush.msrb.mxu0 %v7671_v14  ;;  %3177 = vmatpush.msrb.mxu1 %v7673_v16  ;;  %v2766_v0 = vpop.f32.mrf.mxu0 }
 0x626   :  { %3218 = vmatpush.msra.mxu2 %v7676_v26  ;;  %3200 = vmatpush.msra.mxu3 %v7678_v28  ;;  %v2767_v50 = vadd.f32 %v2766_v0, %v2747_v60 }
 0x627   :  { %3158 = vmatpush.msrb.mxu0 %v7675_v25  ;;  %3178 = vmatpush.msrb.mxu1 %v7677_v27  ;;  %v2786_v52 = vpop.f32.mrf.mxu1 }
 0x628   :  { %3219 = vmatpush.msra.mxu2 %v7680_v30  ;;  %3201 = vmatpush.msra.mxu3 %v7682_v32  ;;  %v2787_v1 = vadd.f32 %v2786_v52, %v2767_v50  ;;  %v2886_v41 = vpop.f32.mrf.mxu3 }
 0x629   :  { %3159 = vmatpush.msrb.mxu0 %v7679_v29  ;;  %3179 = vmatpush.msrb.mxu1 %v7681_v31 }
 0x62a   :  { %3220 = vmatpush.msra.mxu2 %v7684_v38  ;;  %3202 = vmatpush.msra.mxu3 %v7686_v40  ;;  %v2807_v23 = vadd.f32 %v2806_v33, %v2787_v1  ;;  %v2906_v12 = vpop.f32.mrf.mxu2 }
 0x62b   :  { %3160 = vmatpush.msrb.mxu0 %v7683_v37  ;;  %3180 = vmatpush.msrb.mxu1 %v7685_v39 }
 0x62c   :  { %3221 = vmatpush.msra.mxu2 %v7688_v46  ;;  %3203 = vmatpush.msra.mxu3 %v7690_v49  ;;  %v2827_v44 = vadd.f32 %v2826_v24, %v2807_v23 }
 0x62d   :  { %3161 = vmatpush.msrb.mxu0 %v7687_v45  ;;  %3181 = vmatpush.msrb.mxu1 %v7689_v47 }
 0x62e   :  { %3222 = vmatpush.msra.mxu2 %v7692_v54  ;;  %3204 = vmatpush.msra.mxu3 %v7694_v57 }
 0x62f   :  { %3162 = vmatpush.msrb.mxu0 %v7691_v53  ;;  %3182 = vmatpush.msrb.mxu1 %v7693_v56 }
 0x630   :  { %3223 = vmatpush.msra.mxu2 %v7696_v62  ;;  %3205 = vmatmul.f32.vlgmr.msra.gmra.mxu3 %v2597_v55 }
 0x631   :  { %3163 = vmatpush.msrb.mxu0 %v7695_v61  ;;  %3183 = vmatpush.msrb.mxu1 %v7697_v17  ;;  %v2846_v36 = vpop.f32.mrf.mxu0  ;;  %v2866_v35 = vpop.f32.mrf.mxu1 }
 0x632   :  { %3224 = vmatpush.msra.mxu2 %v7699_v58  ;;  %v2847_v8 = vadd.f32 %v2846_v36, %v2827_v44  ;;  %v3319_v58 = vld [vmem:[%s6800_s10] ss:$0 sm:$0xff] }
 0x633   :  { %3164 = vmatpush.msrb.mxu0 %v7698_v51  ;;  %3225 = vmatmul.f32.vlgmr.msra.gmra.mxu2 %v2598_v43 }
 0x634   :  { %3165 = vmatmul.f32.vlgmr.msrb.gmra.mxu0 %v2595_v63  ;;  %3184 = vmatpush.msrb.mxu1 %v7700_v4  ;;  %v2867_v18 = vadd.f32 %v2866_v35, %v2847_v8 }
 0x635   :  { %3185 = vmatmul.f32.vlgmr.msrb.gmra.mxu1 %v2596_v22 }
 0x636   :  { %v2887_v11 = vadd.f32 %v2886_v41, %v2867_v18 }
 0x638   :  { %v2907_v10 = vadd.f32 %v2906_v12, %v2887_v11 }
 0x647   :  { %v2966_v9 = vpop.f32.mrf.mxu3 }
 0x64b   :  { %v2986_v26 = vpop.f32.mrf.mxu2 }
 0x651   :  { %v2926_v13 = vpop.f32.mrf.mxu0  ;;  %v2946_v15 = vpop.f32.mrf.mxu1 }
 0x652   :  { %v2927_v14 = vadd.f32 %v2926_v13, %v2907_v10 }
 0x654   :  { %v2947_v16 = vadd.f32 %v2946_v15, %v2927_v14 }
 0x656   :  { %v2967_v25 = vadd.f32 %v2966_v9, %v2947_v16 }
 0x658   :  { %v2987_v28 = vadd.f32 %v2986_v26, %v2967_v25 }
 0x66b   :  { %v3046_v32 = vpop.f32.mrf.mxu3 }
 0x66f   :  { %v3066_v38 = vpop.f32.mrf.mxu2 }
 0x671   :  { %v3006_v27 = vpop.f32.mrf.mxu0  ;;  %v3026_v30 = vpop.f32.mrf.mxu1 }
 0x672   :  { %v3007_v29 = vadd.f32 %v3006_v27, %v2987_v28 }
 0x674   :  { %v3027_v31 = vadd.f32 %v3026_v30, %v3007_v29 }
 0x676   :  { %v3047_v37 = vadd.f32 %v3046_v32, %v3027_v31 }
 0x678   :  { %v3067_v40 = vadd.f32 %v3066_v38, %v3047_v37 }
 0x68f   :  { %v3126_v49 = vpop.f32.mrf.mxu3 }
 0x691   :  { %v3086_v39 = vpop.f32.mrf.mxu0  ;;  %v3106_v46 = vpop.f32.mrf.mxu1 }
 0x692   :  { %v3087_v45 = vadd.f32 %v3086_v39, %v3067_v40 }
 0x693   :  { %v3146_v54 = vpop.f32.mrf.mxu2 }
 0x694   :  { %v3107_v47 = vadd.f32 %v3106_v46, %v3087_v45 }
 0x696   :  { %v3127_v53 = vadd.f32 %v3126_v49, %v3107_v47 }
 0x698   :  { %v3147_v55 = vadd.f32 %v3146_v54, %v3127_v53 }
 0x6b1   :  { %v3166_v56 = vpop.f32.mrf.mxu0 }
 0x6b2   :  { %v3167_v57 = vadd.f32 %v3166_v56, %v3147_v55  ;;  %v3186_v61 = vpop.f32.mrf.mxu1 }
 0x6b3   :  { %v3206_v63 = vpop.f32.mrf.mxu3 }
 0x6b4   :  { %v3187_v62 = vadd.f32 %v3186_v61, %v3167_v57 }
 0x6b6   :  { %v3207_v43 = vadd.f32 %v3206_v63, %v3187_v62  ;;  %v3226_v17 = vpop.f32.mrf.mxu2 }
 0x6b8   :  { %v3227_v51 = vadd.f32 %v3226_v17, %v3207_v43 }
 0x6ba   :  { %v3229_v22 = vmax.f32 %v3227_v51, 0.0 }
 0x6bc   :  { %v3234_v4 = vmul.f32 %v3319_v58, %v3229_v22 }
 0x6be   :  { %v3236_v34 = vsel %vm3235_vm6, %v3234_v4, 0.0 }
 0x6bf   :  { %3237 = vadd.xlane.f32.xlu0 %v3236_v34 }
 0x732   :  { %v3238_v59 = vpop.xlane.xlu0 %3237 }
 0x733   :  { %v3243_v21 = vadd.f32 %v3320_v20, %v3238_v59 }
 0x735   :  { %3245 = vst.msk [vmem:[%s6802_s12] sm:$0x3] %vm3244_vm7, %v3243_v21 }
 0x736   :  { %3250 = vsyncmov [#allocation4] }
 0x739   :  { %s3251_s23 = vpop.sfrf %3250 }
 0x73a   :  { %p3308_p0 = scmp.ne.s32.totalorder %s3251_s23, 0 }
 0x73c   :  { %3255 = shalt.err (%p3308_p0)  }

</bundles_post_ra>
